<compile_context>
chip_gen: v7x
topology: tpu7x:2x2x1
jax: 0.10.0
libtpu: 0.0.40
codegen_flags: <defaults>
</compile_context>

<pallas_src>
import jax
import jax.numpy as jnp
from jax.experimental import pallas as pl
from jax.experimental.pallas import tpu as pltpu


def _round_up(x, m):
    return (x + m - 1) // m * m


def _leaky_relu(x, slope=0.2):
    # LeakyReLU(0.2): max(x, 0.2*x) is exact for slope in (0, 1).
    return jnp.maximum(x, slope * x)


# ----------------------------- Pallas kernel ------------------------------

def _discriminator_kernel(x_ref, w1_ref, b1_ref, w2_ref, b2_ref,
                          w3_ref, b3_ref, w4t_ref, b4_ref, o_ref):
    """Fused MLP: 3x (matmul + bias + LeakyReLU) -> row-reduce + bias -> sigmoid.

    x_ref:   (bm, Din)  f32 batch tile
    wK_ref:  (in, out)  bf16 weights (full, VMEM-resident across grid steps)
    bK_ref:  (1, out)   f32 biases
    w4t_ref: (1, 256)   f32 last-layer weight row (used via VPU mul + reduce)
    o_ref:   (bm, 1)    f32 sigmoid output
    """
    x = x_ref[...].astype(jnp.bfloat16)

    h = jnp.dot(x, w1_ref[...], preferred_element_type=jnp.float32) + b1_ref[...]
    h = _leaky_relu(h)

    h = jnp.dot(h.astype(jnp.bfloat16), w2_ref[...],
                preferred_element_type=jnp.float32) + b2_ref[...]
    h = _leaky_relu(h)

    h = jnp.dot(h.astype(jnp.bfloat16), w3_ref[...],
                preferred_element_type=jnp.float32) + b3_ref[...]
    h = _leaky_relu(h)

    # Final Linear(256 -> 1): VPU multiply + XLU lane-reduce (avoids a
    # lane-sparse 1-column MXU matmul).  Kept in f32.
    logit = jnp.sum(h * w4t_ref[...], axis=-1, keepdims=True) + b4_ref[...]
    o_ref[...] = 1.0 / (1.0 + jnp.exp(-logit))


# ----------------------------- model wrapper ------------------------------

def init_params(key, image_size, input_channel):
    """PyTorch-default Linear init: U(-1/sqrt(fan_in), 1/sqrt(fan_in))."""
    d_in = input_channel * image_size * image_size
    dims = [d_in, 1024, 512, 256, 1]
    ks = jax.random.split(key, 2 * (len(dims) - 1))
    params = {}
    for li in range(len(dims) - 1):
        fan_in, fan_out = dims[li], dims[li + 1]
        bound = 1.0 / (fan_in ** 0.5)
        params[f"w{li + 1}"] = jax.random.uniform(
            ks[2 * li], (fan_in, fan_out), jnp.float32, -bound, bound)
        params[f"b{li + 1}"] = jax.random.uniform(
            ks[2 * li + 1], (fan_out,), jnp.float32, -bound, bound)
    return params


def discriminator_forward(params, img, *, block_m=256):
    """img: (B, C, H, W) -> (B, 1) sigmoid probabilities."""
    B = img.shape[0]
    x = img.reshape(B, -1).astype(jnp.float32)     # view(B, -1) — free reshape
    d_in, h1 = params["w1"].shape
    h2 = params["w2"].shape[1]
    h3 = params["w3"].shape[1]
    assert x.shape[1] == d_in, (x.shape, d_in)

    # Batch (M) tiling: multiple of 8 sublanes, pad B up to a tile multiple.
    bm = min(block_m, _round_up(B, 8))
    b_pad = _round_up(B, bm)
    if b_pad != B:
        x = jnp.pad(x, ((0, b_pad - B), (0, 0)))

    # bf16 operands for the MXU; biases / last-layer row stay f32.
    w1 = params["w1"].astype(jnp.bfloat16)
    w2 = params["w2"].astype(jnp.bfloat16)
    w3 = params["w3"].astype(jnp.bfloat16)
    w4t = params["w4"].reshape(1, h3).astype(jnp.float32)
    b1 = params["b1"].reshape(1, h1).astype(jnp.float32)
    b2 = params["b2"].reshape(1, h2).astype(jnp.float32)
    b3 = params["b3"].reshape(1, h3).astype(jnp.float32)
    b4 = params["b4"].reshape(1, 1).astype(jnp.float32)

    const = lambda i: (0, 0)          # weights/biases: fetched once, stay in VMEM
    row = lambda i: (i, 0)            # batch tile / output tile

    flops = 2 * b_pad * (d_in * h1 + h1 * h2 + h2 * h3 + h3)
    bytes_accessed = (x.size * 4 + (w1.size + w2.size + w3.size) * 2
                      + (w4t.size + b1.size + b2.size + b3.size + b4.size) * 4
                      + b_pad * 4)

    out = pl.pallas_call(
        _discriminator_kernel,
        out_shape=jax.ShapeDtypeStruct((b_pad, 1), jnp.float32),
        grid_spec=pltpu.PrefetchScalarGridSpec(
            num_scalar_prefetch=0,
            grid=(b_pad // bm,),
            in_specs=[
                pl.BlockSpec((bm, d_in), row),
                pl.BlockSpec((d_in, h1), const),
                pl.BlockSpec((1, h1), const),
                pl.BlockSpec((h1, h2), const),
                pl.BlockSpec((1, h2), const),
                pl.BlockSpec((h2, h3), const),
                pl.BlockSpec((1, h3), const),
                pl.BlockSpec((1, h3), const),
                pl.BlockSpec((1, 1), const),
            ],
            out_specs=pl.BlockSpec((bm, 1), row),
        ),
        compiler_params=pltpu.CompilerParams(
            dimension_semantics=("parallel",),
            vmem_limit_bytes=32 * 1024 * 1024,
        ),
        cost_estimate=pl.CostEstimate(
            flops=flops, transcendentals=b_pad, bytes_accessed=bytes_accessed),
    )(x, w1, b1, w2, b2, w3, b3, w4t, b4)

    return out[:B]


# ----------------------------- reference (f32) ----------------------------

def reference_forward(params, img):
    x = img.reshape(img.shape[0], -1).astype(jnp.float32)
    h = _leaky_relu(x @ params["w1"] + params["b1"])
    h = _leaky_relu(h @ params["w2"] + params["b2"])
    h = _leaky_relu(h @ params["w3"] + params["b3"])
    logit = h @ params["w4"] + params["b4"]
    return jax.nn.sigmoid(logit)


if __name__ == "__main__":
    image_size, input_channel, batch = 16, 3, 8
    key = jax.random.PRNGKey(0)
    pkey, xkey = jax.random.split(key)

    params = init_params(pkey, image_size, input_channel)
    img = jax.random.normal(
        xkey, (batch, input_channel, image_size, image_size), jnp.float32)

    fwd = jax.jit(discriminator_forward)
    out = fwd(params, img)
    jax.block_until_ready(out)

    assert out.shape == (batch, 1), out.shape
    assert out.dtype == jnp.float32

    ref = reference_forward(params, img)
    err = float(jnp.max(jnp.abs(out - ref)))
    assert err < 3e-2, f"max abs error vs f32 reference: {err}"

    print("KERNEL_OK")
</pallas_src>

<mosaic_0001>
module attributes {stable_mosaic.version = 11 : i64} {
  func.func @_discriminator_kernel(%arg0: i32, %arg1: memref<8x768xf32, #tpu.memory_space<vmem>>, %arg2: memref<768x1024xbf16, #tpu.memory_space<vmem>>, %arg3: memref<1x1024xf32, #tpu.memory_space<vmem>>, %arg4: memref<1024x512xbf16, #tpu.memory_space<vmem>>, %arg5: memref<1x512xf32, #tpu.memory_space<vmem>>, %arg6: memref<512x256xbf16, #tpu.memory_space<vmem>>, %arg7: memref<1x256xf32, #tpu.memory_space<vmem>>, %arg8: memref<1x256xf32, #tpu.memory_space<vmem>>, %arg9: memref<1x1xf32, #tpu.memory_space<vmem>>, %arg10: memref<8x1xf32, #tpu.memory_space<vmem>>) attributes {dimension_semantics = [#tpu.dimension_semantics<parallel>], iteration_bounds = array<i64: 1>, scalar_prefetch = 0 : i64, scratch_operands = 0 : i64, tpu.core_type = #tpu.core_type<tc>, window_params = [{transform_indices = @transform_0, window_bounds = array<i64: 8, 768>}, {pipeline_mode = #tpu.pipeline_mode<synchronous>, transform_indices = @transform_1, window_bounds = array<i64: 768, 1024>}, {pipeline_mode = #tpu.pipeline_mode<synchronous>, transform_indices = @transform_2, window_bounds = array<i64: 1, 1024>}, {pipeline_mode = #tpu.pipeline_mode<synchronous>, transform_indices = @transform_3, window_bounds = array<i64: 1024, 512>}, {pipeline_mode = #tpu.pipeline_mode<synchronous>, transform_indices = @transform_4, window_bounds = array<i64: 1, 512>}, {pipeline_mode = #tpu.pipeline_mode<synchronous>, transform_indices = @transform_5, window_bounds = array<i64: 512, 256>}, {pipeline_mode = #tpu.pipeline_mode<synchronous>, transform_indices = @transform_6, window_bounds = array<i64: 1, 256>}, {pipeline_mode = #tpu.pipeline_mode<synchronous>, transform_indices = @transform_7, window_bounds = array<i64: 1, 256>}, {pipeline_mode = #tpu.pipeline_mode<synchronous>, transform_indices = @transform_8, window_bounds = array<i64: 1, 1>}, {transform_indices = @transform_9, window_bounds = array<i64: 8, 1>}]} {
    %c0 = arith.constant 0 : index
    %c0_0 = arith.constant 0 : index
    %0 = vector.load %arg1[%c0, %c0_0] : memref<8x768xf32, #tpu.memory_space<vmem>>, vector<8x768xf32>
    %1 = arith.truncf %0 : vector<8x768xf32> to vector<8x768xbf16>
    %c0_1 = arith.constant 0 : index
    %c0_2 = arith.constant 0 : index
    %2 = vector.load %arg2[%c0_1, %c0_2] : memref<768x1024xbf16, #tpu.memory_space<vmem>>, vector<768x1024xbf16>
    %cst = arith.constant dense<0.000000e+00> : vector<8x1024xf32>
    %3 = tpu.matmul %1, %2, %cst {dimension_numbers = #tpu.dot_dimension_numbers<[1], [0], [0], [1], [0, 0, 1, 1], [], []>} : vector<8x768xbf16>, vector<768x1024xbf16>, vector<8x1024xf32> -> vector<8x1024xf32>
    %c0_3 = arith.constant 0 : index
    %c0_4 = arith.constant 0 : index
    %4 = vector.load %arg3[%c0_3, %c0_4] : memref<1x1024xf32, #tpu.memory_space<vmem>>, vector<1x1024xf32>
    %5 = vector.broadcast %4 : vector<1x1024xf32> to vector<8x1024xf32>
    %6 = arith.addf %3, %5 : vector<8x1024xf32>
    %cst_5 = arith.constant 2.000000e-01 : f32
    %7 = vector.broadcast %cst_5 : f32 to vector<8x1024xf32>
    %8 = arith.mulf %7, %6 : vector<8x1024xf32>
    %9 = arith.maximumf %6, %8 : vector<8x1024xf32>
    %10 = arith.truncf %9 : vector<8x1024xf32> to vector<8x1024xbf16>
    %c0_6 = arith.constant 0 : index
    %c0_7 = arith.constant 0 : index
    %11 = vector.load %arg4[%c0_6, %c0_7] : memref<1024x512xbf16, #tpu.memory_space<vmem>>, vector<1024x512xbf16>
    %cst_8 = arith.constant dense<0.000000e+00> : vector<8x512xf32>
    %12 = tpu.matmul %10, %11, %cst_8 {dimension_numbers = #tpu.dot_dimension_numbers<[1], [0], [0], [1], [0, 0, 1, 1], [], []>} : vector<8x1024xbf16>, vector<1024x512xbf16>, vector<8x512xf32> -> vector<8x512xf32>
    %c0_9 = arith.constant 0 : index
    %c0_10 = arith.constant 0 : index
    %13 = vector.load %arg5[%c0_9, %c0_10] : memref<1x512xf32, #tpu.memory_space<vmem>>, vector<1x512xf32>
    %14 = vector.broadcast %13 : vector<1x512xf32> to vector<8x512xf32>
    %15 = arith.addf %12, %14 : vector<8x512xf32>
    %cst_11 = arith.constant 2.000000e-01 : f32
    %16 = vector.broadcast %cst_11 : f32 to vector<8x512xf32>
    %17 = arith.mulf %16, %15 : vector<8x512xf32>
    %18 = arith.maximumf %15, %17 : vector<8x512xf32>
    %19 = arith.truncf %18 : vector<8x512xf32> to vector<8x512xbf16>
    %c0_12 = arith.constant 0 : index
    %c0_13 = arith.constant 0 : index
    %20 = vector.load %arg6[%c0_12, %c0_13] : memref<512x256xbf16, #tpu.memory_space<vmem>>, vector<512x256xbf16>
    %cst_14 = arith.constant dense<0.000000e+00> : vector<8x256xf32>
    %21 = tpu.matmul %19, %20, %cst_14 {dimension_numbers = #tpu.dot_dimension_numbers<[1], [0], [0], [1], [0, 0, 1, 1], [], []>} : vector<8x512xbf16>, vector<512x256xbf16>, vector<8x256xf32> -> vector<8x256xf32>
    %c0_15 = arith.constant 0 : index
    %c0_16 = arith.constant 0 : index
    %22 = vector.load %arg7[%c0_15, %c0_16] : memref<1x256xf32, #tpu.memory_space<vmem>>, vector<1x256xf32>
    %23 = vector.broadcast %22 : vector<1x256xf32> to vector<8x256xf32>
    %24 = arith.addf %21, %23 : vector<8x256xf32>
    %cst_17 = arith.constant 2.000000e-01 : f32
    %25 = vector.broadcast %cst_17 : f32 to vector<8x256xf32>
    %26 = arith.mulf %25, %24 : vector<8x256xf32>
    %27 = arith.maximumf %24, %26 : vector<8x256xf32>
    %c0_18 = arith.constant 0 : index
    %c0_19 = arith.constant 0 : index
    %28 = vector.load %arg8[%c0_18, %c0_19] : memref<1x256xf32, #tpu.memory_space<vmem>>, vector<1x256xf32>
    %29 = vector.broadcast %28 : vector<1x256xf32> to vector<8x256xf32>
    %30 = arith.mulf %27, %29 : vector<8x256xf32>
    %cst_20 = arith.constant dense<0.000000e+00> : vector<8xf32>
    %31 = vector.multi_reduction <add>, %30, %cst_20 [1] : vector<8x256xf32> to vector<8xf32>
    %32 = vector.shape_cast %31 : vector<8xf32> to vector<8x1xf32>
    %c0_21 = arith.constant 0 : index
    %c0_22 = arith.constant 0 : index
    %33 = vector.load %arg9[%c0_21, %c0_22] : memref<1x1xf32, #tpu.memory_space<vmem>>, vector<1x1xf32>
    %34 = vector.broadcast %33 : vector<1x1xf32> to vector<8x1xf32>
    %35 = arith.addf %32, %34 : vector<8x1xf32>
    %cst_23 = arith.constant 0.000000e+00 : f32
    %36 = vector.broadcast %cst_23 : f32 to vector<8x1xf32>
    %37 = arith.subf %36, %35 : vector<8x1xf32>
    %38 = math.exp %37 : vector<8x1xf32>
    %cst_24 = arith.constant 1.000000e+00 : f32
    %39 = vector.broadcast %cst_24 : f32 to vector<8x1xf32>
    %40 = arith.addf %39, %38 : vector<8x1xf32>
    %cst_25 = arith.constant 1.000000e+00 : f32
    %41 = vector.broadcast %cst_25 : f32 to vector<8x1xf32>
    %42 = arith.divf %41, %40 : vector<8x1xf32>
    %c0_26 = arith.constant 0 : index
    %c0_27 = arith.constant 0 : index
    %43 = vector.load %arg10[%c0_26, %c0_27] : memref<8x1xf32, #tpu.memory_space<vmem>>, vector<8x1xf32>
    tpu.vector_store %arg10[%c0_26, %c0_27], %42 {strides = array<i32>} : memref<8x1xf32, #tpu.memory_space<vmem>>, vector<8x1xf32>,
    return
  }
  func.func @transform_0(%arg0: i32) -> (i32, i32) {
    %c0_i32 = arith.constant 0 : i32
    %c0_i32_0 = arith.constant 0 : i32
    return %arg0, %c0_i32 : i32, i32
  }
  func.func @transform_1(%arg0: i32) -> (i32, i32) {
    %c0_i32 = arith.constant 0 : i32
    %c0_i32_0 = arith.constant 0 : i32
    %c0_i32_1 = arith.constant 0 : i32
    return %c0_i32, %c0_i32_0 : i32, i32
  }
  func.func @transform_2(%arg0: i32) -> (i32, i32) {
    %c0_i32 = arith.constant 0 : i32
    %c0_i32_0 = arith.constant 0 : i32
    %c0_i32_1 = arith.constant 0 : i32
    return %c0_i32, %c0_i32_0 : i32, i32
  }
  func.func @transform_3(%arg0: i32) -> (i32, i32) {
    %c0_i32 = arith.constant 0 : i32
    %c0_i32_0 = arith.constant 0 : i32
    %c0_i32_1 = arith.constant 0 : i32
    return %c0_i32, %c0_i32_0 : i32, i32
  }
  func.func @transform_4(%arg0: i32) -> (i32, i32) {
    %c0_i32 = arith.constant 0 : i32
    %c0_i32_0 = arith.constant 0 : i32
    %c0_i32_1 = arith.constant 0 : i32
    return %c0_i32, %c0_i32_0 : i32, i32
  }
  func.func @transform_5(%arg0: i32) -> (i32, i32) {
    %c0_i32 = arith.constant 0 : i32
    %c0_i32_0 = arith.constant 0 : i32
    %c0_i32_1 = arith.constant 0 : i32
    return %c0_i32, %c0_i32_0 : i32, i32
  }
  func.func @transform_6(%arg0: i32) -> (i32, i32) {
    %c0_i32 = arith.constant 0 : i32
    %c0_i32_0 = arith.constant 0 : i32
    %c0_i32_1 = arith.constant 0 : i32
    return %c0_i32, %c0_i32_0 : i32, i32
  }
  func.func @transform_7(%arg0: i32) -> (i32, i32) {
    %c0_i32 = arith.constant 0 : i32
    %c0_i32_0 = arith.constant 0 : i32
    %c0_i32_1 = arith.constant 0 : i32
    return %c0_i32, %c0_i32_0 : i32, i32
  }
  func.func @transform_8(%arg0: i32) -> (i32, i32) {
    %c0_i32 = arith.constant 0 : i32
    %c0_i32_0 = arith.constant 0 : i32
    %c0_i32_1 = arith.constant 0 : i32
    return %c0_i32, %c0_i32_0 : i32, i32
  }
  func.func @transform_9(%arg0: i32) -> (i32, i32) {
    %c0_i32 = arith.constant 0 : i32
    %c0_i32_0 = arith.constant 0 : i32
    return %arg0, %c0_i32 : i32, i32
  }
}

</mosaic_0001>

<bundles_post_ra>
// kernel: discriminator_forward.1
= control target key start
LH: loop header
LB: loop body
LE: loop exit
PB: predicated region body
PF: predicated region fallthrough
CT: control target
= control target key end

     0   :  { %vm5319_vm0 = vcmask 7168   ;;  %s8906_s1 = inlined_call_operand.vmem [shape: bf16[768,1024], index: 1, kind: input, shape index: {}]   ;;  %s8907_s0 = inlined_call_operand.vmem [shape: f32[8,768], index: 0, kind: input, shape index: {}]   ;;  %s8908_s3 = inlined_call_operand.vmem [shape: bf16[1024,512], index: 3, kind: input, shape index: {}]   ;;  %s8909_s2 = inlined_call_operand.vmem [shape: f32[1,1024], index: 2, kind: input, shape index: {}]   ;;  %s8910_s5 = inlined_call_operand.vmem [shape: bf16[512,256], index: 5, kind: input, shape index: {}]   ;;  %s8911_s4 = inlined_call_operand.vmem [shape: f32[1,512], index: 4, kind: input, shape index: {}]   ;;  %s8912_s8 = inlined_call_operand.<no memory space> [shape: f32[1,1], index: 8, kind: input, shape index: {}]   ;;  %s8913_s6 = inlined_call_operand.vmem [shape: f32[1,256], index: 6, kind: input, shape index: {}]   ;;  %s8914_s7 = inlined_call_operand.vmem [shape: f32[1,256], index: 7, kind: input, shape index: {}]   ;;  %s8915_s9 = inlined_call_operand.vmem [shape: f32[8,1], index: 9, kind: output, shape index: {}]  }
   0x1   :  { %v46_v0 = vld [vmem:[%s8906_s1] sm:$0xff]  ;;  %v35_v53 = vld [vmem:[%s8907_s0 + $0x8] sm:$0xff]  ;;  %v37_v58 = vld [vmem:[%s8907_s0 + $0x18] sm:$0xff] }
   0x2   :  { %v50_v1 = vld [vmem:[%s8906_s1 + $0x20] sm:$0xff]  ;;  %v6730_v57 = vpack.c.bf16 %v35_v53, %v35_v53  ;;  %v6741_v61 = vpack.c.bf16 %v37_v58, %v37_v58 }
   0x3   :  { %v174_v2 = vld [vmem:[%s8906_s1 + $0x400] sm:$0xff]  ;;  %v5326_v3 = vcombine.high %v46_v0, %v50_v1  ;;  %v5325_v5 = vcombine.low %v46_v0, %v50_v1 }
   0x4   :  { %v178_v4 = vld [vmem:[%s8906_s1 + $0x420] sm:$0xff]  ;;  %2424 = vmatprep.mubr.bf16.mxu1 %v6730_v57  ;;  %2465 = vmatprep.mubr.bf16.mxu0 %v6741_v61 }
   0x5   :  { %v54_v6 = vld [vmem:[%s8906_s1 + $0x40] sm:$0xff]  ;;  %v5454_v8 = vcombine.high %v174_v2, %v178_v4  ;;  %v5453_v9 = vcombine.low %v174_v2, %v178_v4  ;;  %2392 = vmatprep.subr.bf16.mxu1 %v5326_v3 }
   0x6   :  { %v58_v7 = vld [vmem:[%s8906_s1 + $0x60] sm:$0xff]  ;;  %2393 = vmatpush1.bf16.msra.mxu1 %v5325_v5 }
   0x7   :  { %v5334_v10 = vcombine.high %v54_v6, %v58_v7  ;;  %v182_v11 = vld [vmem:[%s8906_s1 + $0x440] sm:$0xff]  ;;  %2433 = vmatprep.subr.bf16.mxu0 %v5454_v8  ;;  %v5333_v18 = vcombine.low %v54_v6, %v58_v7 }
   0x8   :  { %v186_v12 = vld [vmem:[%s8906_s1 + $0x460] sm:$0xff]  ;;  %2434 = vmatpush1.bf16.msra.mxu0 %v5453_v9 }
   0x9   :  { %v62_v13 = vld [vmem:[%s8906_s1 + $0x80] sm:$0xff]  ;;  %v5462_v14 = vcombine.high %v182_v11, %v186_v12  ;;  %2394 = vmatprep.subr.bf16.mxu1 %v5334_v10  ;;  %v5461_v19 = vcombine.low %v182_v11, %v186_v12 }
   0xa   :  { %v66_v15 = vld [vmem:[%s8906_s1 + $0xa0] sm:$0xff]  ;;  %2395 = vmatpush1.bf16.msra.mxu1 %v5333_v18 }
   0xb   :  { %v190_v16 = vld [vmem:[%s8906_s1 + $0x480] sm:$0xff]  ;;  %v5342_v20 = vcombine.high %v62_v13, %v66_v15  ;;  %2435 = vmatprep.subr.bf16.mxu0 %v5462_v14  ;;  %v5341_v26 = vcombine.low %v62_v13, %v66_v15 }
   0xc   :  { %v194_v17 = vld [vmem:[%s8906_s1 + $0x4a0] sm:$0xff]  ;;  %2436 = vmatpush1.bf16.msra.mxu0 %v5461_v19 }
   0xd   :  { %v5470_v21 = vcombine.high %v190_v16, %v194_v17  ;;  %v70_v22 = vld [vmem:[%s8906_s1 + $0xc0] sm:$0xff]  ;;  %2396 = vmatprep.subr.bf16.mxu1 %v5342_v20  ;;  %v5469_v27 = vcombine.low %v190_v16, %v194_v17 }
   0xe   :  { %v74_v23 = vld [vmem:[%s8906_s1 + $0xe0] sm:$0xff]  ;;  %2397 = vmatpush1.bf16.msra.mxu1 %v5341_v26 }
   0xf   :  { %v198_v24 = vld [vmem:[%s8906_s1 + $0x4c0] sm:$0xff]  ;;  %v5350_v28 = vcombine.high %v70_v22, %v74_v23  ;;  %2437 = vmatprep.subr.bf16.mxu0 %v5470_v21  ;;  %v5349_v34 = vcombine.low %v70_v22, %v74_v23 }
  0x10   :  { %v202_v25 = vld [vmem:[%s8906_s1 + $0x4e0] sm:$0xff]  ;;  %2438 = vmatpush1.bf16.msra.mxu0 %v5469_v27 }
  0x11   :  { %v5478_v29 = vcombine.high %v198_v24, %v202_v25  ;;  %v78_v30 = vld [vmem:[%s8906_s1 + $0x100] sm:$0xff]  ;;  %2398 = vmatprep.subr.bf16.mxu1 %v5350_v28  ;;  %v5477_v35 = vcombine.low %v198_v24, %v202_v25 }
  0x12   :  { %v82_v31 = vld [vmem:[%s8906_s1 + $0x120] sm:$0xff]  ;;  %2399 = vmatpush1.bf16.msra.mxu1 %v5349_v34 }
  0x13   :  { %v206_v32 = vld [vmem:[%s8906_s1 + $0x500] sm:$0xff]  ;;  %v5358_v36 = vcombine.high %v78_v30, %v82_v31  ;;  %2439 = vmatprep.subr.bf16.mxu0 %v5478_v29  ;;  %v5357_v42 = vcombine.low %v78_v30, %v82_v31 }
  0x14   :  { %v210_v33 = vld [vmem:[%s8906_s1 + $0x520] sm:$0xff]  ;;  %2440 = vmatpush1.bf16.msra.mxu0 %v5477_v35 }
  0x15   :  { %v5486_v37 = vcombine.high %v206_v32, %v210_v33  ;;  %v86_v38 = vld [vmem:[%s8906_s1 + $0x140] sm:$0xff]  ;;  %2400 = vmatprep.subr.bf16.mxu1 %v5358_v36  ;;  %v5485_v43 = vcombine.low %v206_v32, %v210_v33 }
  0x16   :  { %v90_v39 = vld [vmem:[%s8906_s1 + $0x160] sm:$0xff]  ;;  %2401 = vmatpush1.bf16.msra.mxu1 %v5357_v42 }
  0x17   :  { %v214_v40 = vld [vmem:[%s8906_s1 + $0x540] sm:$0xff]  ;;  %v5366_v44 = vcombine.high %v86_v38, %v90_v39  ;;  %2441 = vmatprep.subr.bf16.mxu0 %v5486_v37  ;;  %v5365_v50 = vcombine.low %v86_v38, %v90_v39 }
  0x18   :  { %v218_v41 = vld [vmem:[%s8906_s1 + $0x560] sm:$0xff]  ;;  %2442 = vmatpush1.bf16.msra.mxu0 %v5485_v43 }
  0x19   :  { %v5494_v45 = vcombine.high %v214_v40, %v218_v41  ;;  %v94_v46 = vld [vmem:[%s8906_s1 + $0x180] sm:$0xff]  ;;  %2402 = vmatprep.subr.bf16.mxu1 %v5366_v44  ;;  %v5493_v51 = vcombine.low %v214_v40, %v218_v41 }
  0x1a   :  { %v98_v47 = vld [vmem:[%s8906_s1 + $0x1a0] sm:$0xff]  ;;  %2403 = vmatpush1.bf16.msra.mxu1 %v5365_v50 }
  0x1b   :  { %v222_v48 = vld [vmem:[%s8906_s1 + $0x580] sm:$0xff]  ;;  %v5374_v52 = vcombine.high %v94_v46, %v98_v47  ;;  %2443 = vmatprep.subr.bf16.mxu0 %v5494_v45  ;;  %v5373_v62 = vcombine.low %v94_v46, %v98_v47 }
  0x1c   :  { %v226_v49 = vld [vmem:[%s8906_s1 + $0x5a0] sm:$0xff]  ;;  %2444 = vmatpush1.bf16.msra.mxu0 %v5493_v51 }
  0x1d   :  { %v5502_v54 = vcombine.high %v222_v48, %v226_v49  ;;  %v102_v55 = vld [vmem:[%s8906_s1 + $0x1c0] sm:$0xff]  ;;  %2404 = vmatprep.subr.bf16.mxu1 %v5374_v52  ;;  %v5501_v63 = vcombine.low %v222_v48, %v226_v49 }
  0x1e   :  { %v106_v56 = vld [vmem:[%s8906_s1 + $0x1e0] sm:$0xff]  ;;  %2405 = vmatpush1.bf16.msra.mxu1 %v5373_v62 }
  0x1f   :  { %v230_v59 = vld [vmem:[%s8906_s1 + $0x5c0] sm:$0xff]  ;;  %v5382_v0 = vcombine.high %v102_v55, %v106_v56  ;;  %2445 = vmatprep.subr.bf16.mxu0 %v5502_v54  ;;  %v5381_v6 = vcombine.low %v102_v55, %v106_v56 }
  0x20   :  { %v234_v60 = vld [vmem:[%s8906_s1 + $0x5e0] sm:$0xff]  ;;  %2446 = vmatpush1.bf16.msra.mxu0 %v5501_v63 }
  0x21   :  { %v5510_v1 = vcombine.high %v230_v59, %v234_v60  ;;  %v110_v2 = vld [vmem:[%s8906_s1 + $0x200] sm:$0xff]  ;;  %2406 = vmatprep.subr.bf16.mxu1 %v5382_v0  ;;  %v5509_v7 = vcombine.low %v230_v59, %v234_v60 }
  0x22   :  { %v114_v3 = vld [vmem:[%s8906_s1 + $0x220] sm:$0xff]  ;;  %2407 = vmatpush1.bf16.msra.mxu1 %v5381_v6 }
  0x23   :  { %v238_v4 = vld [vmem:[%s8906_s1 + $0x600] sm:$0xff]  ;;  %v5390_v8 = vcombine.high %v110_v2, %v114_v3  ;;  %2447 = vmatprep.subr.bf16.mxu0 %v5510_v1  ;;  %v5389_v14 = vcombine.low %v110_v2, %v114_v3 }
  0x24   :  { %v242_v5 = vld [vmem:[%s8906_s1 + $0x620] sm:$0xff]  ;;  %2448 = vmatpush1.bf16.msra.mxu0 %v5509_v7 }
  0x25   :  { %v5518_v9 = vcombine.high %v238_v4, %v242_v5  ;;  %v118_v10 = vld [vmem:[%s8906_s1 + $0x240] sm:$0xff]  ;;  %2408 = vmatprep.subr.bf16.mxu1 %v5390_v8  ;;  %v5517_v15 = vcombine.low %v238_v4, %v242_v5  ;;  %v47_v4 = vld [vmem:[%s8906_s1 + $0x8] sm:$0xff] }
  0x26   :  { %v122_v11 = vld [vmem:[%s8906_s1 + $0x260] sm:$0xff]  ;;  %2409 = vmatpush1.bf16.msra.mxu1 %v5389_v14  ;;  %v51_v5 = vld [vmem:[%s8906_s1 + $0x28] sm:$0xff] }
  0x27   :  { %v246_v12 = vld [vmem:[%s8906_s1 + $0x640] sm:$0xff]  ;;  %v5398_v16 = vcombine.high %v118_v10, %v122_v11  ;;  %2449 = vmatprep.subr.bf16.mxu0 %v5518_v9  ;;  %v5397_v22 = vcombine.low %v118_v10, %v122_v11  ;;  %v5328_v11 = vcombine.high %v47_v4, %v51_v5  ;;  %v55_v14 = vld [vmem:[%s8906_s1 + $0x48] sm:$0xff] }
  0x28   :  { %v250_v13 = vld [vmem:[%s8906_s1 + $0x660] sm:$0xff]  ;;  %2450 = vmatpush1.bf16.msra.mxu0 %v5517_v15  ;;  %v59_v15 = vld [vmem:[%s8906_s1 + $0x68] sm:$0xff] }
  0x29   :  { %v5526_v17 = vcombine.high %v246_v12, %v250_v13  ;;  %v126_v18 = vld [vmem:[%s8906_s1 + $0x280] sm:$0xff]  ;;  %2410 = vmatprep.subr.bf16.mxu1 %v5398_v16  ;;  %v5525_v23 = vcombine.low %v246_v12, %v250_v13  ;;  %v36_v12 = vld [vmem:[%s8907_s0 + $0x10] sm:$0xff] }
  0x2a   :  { %v130_v19 = vld [vmem:[%s8906_s1 + $0x2a0] sm:$0xff]  ;;  %2411 = vmatpush1.bf16.msra.mxu1 %v5397_v22 }
  0x2b   :  { %v254_v20 = vld [vmem:[%s8906_s1 + $0x680] sm:$0xff]  ;;  %v5406_v24 = vcombine.high %v126_v18, %v130_v19  ;;  %2451 = vmatprep.subr.bf16.mxu0 %v5526_v17  ;;  %v5405_v30 = vcombine.low %v126_v18, %v130_v19  ;;  %v39_v19 = vld [vmem:[%s8907_s0 + $0x28] sm:$0xff] }
  0x2c   :  { %v258_v21 = vld [vmem:[%s8906_s1 + $0x6a0] sm:$0xff]  ;;  %2452 = vmatpush1.bf16.msra.mxu0 %v5525_v23  ;;  %v5336_v23 = vcombine.high %v55_v14, %v59_v15 }
  0x2d   :  { %v5534_v25 = vcombine.high %v254_v20, %v258_v21  ;;  %v134_v26 = vld [vmem:[%s8906_s1 + $0x2c0] sm:$0xff]  ;;  %2412 = vmatprep.subr.bf16.mxu1 %v5406_v24  ;;  %v5533_v31 = vcombine.low %v254_v20, %v258_v21  ;;  %v5327_v20 = vcombine.low %v47_v4, %v51_v5  ;;  %v6876_v21 = vpack.c.bf16 %v36_v12, %v36_v12  ;;  %v103_v4 = vld [vmem:[%s8906_s1 + $0x1c8] sm:$0xff] }
  0x2e   :  { %v138_v27 = vld [vmem:[%s8906_s1 + $0x2e0] sm:$0xff]  ;;  %2413 = vmatpush1.bf16.msra.mxu1 %v5405_v30  ;;  %v5335_v30 = vcombine.low %v55_v14, %v59_v15  ;;  %v107_v5 = vld [vmem:[%s8906_s1 + $0x1e8] sm:$0xff] }
  0x2f   :  { %v262_v28 = vld [vmem:[%s8906_s1 + $0x6c0] sm:$0xff]  ;;  %v5414_v32 = vcombine.high %v134_v26, %v138_v27  ;;  %2453 = vmatprep.subr.bf16.mxu0 %v5534_v25  ;;  %v5413_v38 = vcombine.low %v134_v26, %v138_v27  ;;  %v63_v25 = vld [vmem:[%s8906_s1 + $0x88] sm:$0xff]  ;;  %v6884_v27 = vpack.c.bf16 %v39_v19, %v39_v19 }
  0x30   :  { %v266_v29 = vld [vmem:[%s8906_s1 + $0x6e0] sm:$0xff]  ;;  %2454 = vmatpush1.bf16.msra.mxu0 %v5533_v31  ;;  %v67_v26 = vld [vmem:[%s8906_s1 + $0xa8] sm:$0xff] }
  0x31   :  { %v5542_v33 = vcombine.high %v262_v28, %v266_v29  ;;  %v142_v34 = vld [vmem:[%s8906_s1 + $0x300] sm:$0xff]  ;;  %2414 = vmatprep.subr.bf16.mxu1 %v5414_v32  ;;  %v5541_v39 = vcombine.low %v262_v28, %v266_v29  ;;  %v5344_v32 = vcombine.high %v63_v25, %v67_v26  ;;  %v111_v12 = vld [vmem:[%s8906_s1 + $0x208] sm:$0xff] }
  0x32   :  { %v146_v35 = vld [vmem:[%s8906_s1 + $0x320] sm:$0xff]  ;;  %2415 = vmatpush1.bf16.msra.mxu1 %v5413_v38  ;;  %v5343_v38 = vcombine.low %v63_v25, %v67_v26 }
  0x33   :  { %v270_v36 = vld [vmem:[%s8906_s1 + $0x700] sm:$0xff]  ;;  %v5422_v40 = vcombine.high %v142_v34, %v146_v35  ;;  %2455 = vmatprep.subr.bf16.mxu0 %v5542_v33  ;;  %v5421_v46 = vcombine.low %v142_v34, %v146_v35  ;;  %v71_v34 = vld [vmem:[%s8906_s1 + $0xc8] sm:$0xff] }
  0x34   :  { %v274_v37 = vld [vmem:[%s8906_s1 + $0x720] sm:$0xff]  ;;  %2456 = vmatpush1.bf16.msra.mxu0 %v5541_v39  ;;  %v75_v35 = vld [vmem:[%s8906_s1 + $0xe8] sm:$0xff] }
  0x35   :  { %v5550_v41 = vcombine.high %v270_v36, %v274_v37  ;;  %v150_v42 = vld [vmem:[%s8906_s1 + $0x340] sm:$0xff]  ;;  %2416 = vmatprep.subr.bf16.mxu1 %v5422_v40  ;;  %v5549_v47 = vcombine.low %v270_v36, %v274_v37  ;;  %v5352_v40 = vcombine.high %v71_v34, %v75_v35 }
  0x36   :  { %v154_v43 = vld [vmem:[%s8906_s1 + $0x360] sm:$0xff]  ;;  %2417 = vmatpush1.bf16.msra.mxu1 %v5421_v46  ;;  %v5351_v46 = vcombine.low %v71_v34, %v75_v35 }
  0x37   :  { %v278_v44 = vld [vmem:[%s8906_s1 + $0x740] sm:$0xff]  ;;  %v5430_v48 = vcombine.high %v150_v42, %v154_v43  ;;  %2457 = vmatprep.subr.bf16.mxu0 %v5550_v41  ;;  %v5429_v54 = vcombine.low %v150_v42, %v154_v43  ;;  %v79_v42 = vld [vmem:[%s8906_s1 + $0x108] sm:$0xff] }
  0x38   :  { %v282_v45 = vld [vmem:[%s8906_s1 + $0x760] sm:$0xff]  ;;  %2458 = vmatpush1.bf16.msra.mxu0 %v5549_v47  ;;  %v83_v43 = vld [vmem:[%s8906_s1 + $0x128] sm:$0xff] }
  0x39   :  { %v5558_v49 = vcombine.high %v278_v44, %v282_v45  ;;  %v158_v50 = vld [vmem:[%s8906_s1 + $0x380] sm:$0xff]  ;;  %2418 = vmatprep.subr.bf16.mxu1 %v5430_v48  ;;  %v5557_v55 = vcombine.low %v278_v44, %v282_v45  ;;  %v5360_v48 = vcombine.high %v79_v42, %v83_v43 }
  0x3a   :  { %v162_v51 = vld [vmem:[%s8906_s1 + $0x3a0] sm:$0xff]  ;;  %2419 = vmatpush1.bf16.msra.mxu1 %v5429_v54  ;;  %v5359_v54 = vcombine.low %v79_v42, %v83_v43 }
  0x3b   :  { %v286_v52 = vld [vmem:[%s8906_s1 + $0x780] sm:$0xff]  ;;  %v5438_v56 = vcombine.high %v158_v50, %v162_v51  ;;  %2459 = vmatprep.subr.bf16.mxu0 %v5558_v49  ;;  %v5437_v0 = vcombine.low %v158_v50, %v162_v51  ;;  %v87_v50 = vld [vmem:[%s8906_s1 + $0x148] sm:$0xff] }
  0x3c   :  { %v290_v53 = vld [vmem:[%s8906_s1 + $0x7a0] sm:$0xff]  ;;  %2460 = vmatpush1.bf16.msra.mxu0 %v5557_v55  ;;  %v91_v51 = vld [vmem:[%s8906_s1 + $0x168] sm:$0xff] }
  0x3d   :  { %v5566_v58 = vcombine.high %v286_v52, %v290_v53  ;;  %v166_v59 = vld [vmem:[%s8906_s1 + $0x3c0] sm:$0xff]  ;;  %2420 = vmatprep.subr.bf16.mxu1 %v5438_v56  ;;  %v5565_v1 = vcombine.low %v286_v52, %v290_v53  ;;  %v5368_v56 = vcombine.high %v87_v50, %v91_v51 }
  0x3e   :  { %v170_v60 = vld [vmem:[%s8906_s1 + $0x3e0] sm:$0xff]  ;;  %2421 = vmatpush1.bf16.msra.mxu1 %v5437_v0  ;;  %v5367_v0 = vcombine.low %v87_v50, %v91_v51 }
  0x3f   :  { %v294_v62 = vld [vmem:[%s8906_s1 + $0x7c0] sm:$0xff]  ;;  %v5446_v2 = vcombine.high %v166_v59, %v170_v60  ;;  %2461 = vmatprep.subr.bf16.mxu0 %v5566_v58  ;;  %v5445_v8 = vcombine.low %v166_v59, %v170_v60  ;;  %v95_v59 = vld [vmem:[%s8906_s1 + $0x188] sm:$0xff] }
  0x40   :  { %v298_v63 = vld [vmem:[%s8906_s1 + $0x7e0] sm:$0xff]  ;;  %2462 = vmatpush1.bf16.msra.mxu0 %v5565_v1  ;;  %v99_v60 = vld [vmem:[%s8906_s1 + $0x1a8] sm:$0xff] }
  0x41   :  { %v5574_v3 = vcombine.high %v294_v62, %v298_v63  ;;  %v302_v6 = vld [vmem:[%s8906_s1 + $0x800] sm:$0xff]  ;;  %2422 = vmatprep.subr.bf16.mxu1 %v5446_v2  ;;  %v5573_v10 = vcombine.low %v294_v62, %v298_v63  ;;  %v5376_v2 = vcombine.high %v95_v59, %v99_v60 }
  0x42   :  { %v306_v7 = vld [vmem:[%s8906_s1 + $0x820] sm:$0xff]  ;;  %2423 = vmatpush1.bf16.msra.mxu1 %v5445_v8  ;;  %v5375_v8 = vcombine.low %v95_v59, %v99_v60 }
  0x43   :  { %v34_v9 = vld [vmem:[%s8907_s0] sm:$0xff]  ;;  %2463 = vmatprep.subr.bf16.mxu0 %v5574_v3  ;;  %v5582_v13 = vcombine.high %v302_v6, %v306_v7  ;;  %v5581_v22 = vcombine.low %v302_v6, %v306_v7  ;;  %2515 = vmatprep.subr.bf16.mxu1 %v5328_v11 }
  0x44   :  { %v6865_v16 = vpack.c.bf16 %v34_v9, %v34_v9  ;;  %v310_v17 = vld [vmem:[%s8906_s1 + $0x840] sm:$0xff]  ;;  %2464 = vmatpush1.bf16.msra.mxu0 %v5573_v10  ;;  %v5384_v10 = vcombine.high %v103_v4, %v107_v5 }
  0x45   :  { %v314_v18 = vld [vmem:[%s8906_s1 + $0x860] sm:$0xff]  ;;  %2474 = vmatprep.subr.bf16.mxu0 %v5582_v13  ;;  %v115_v13 = vld [vmem:[%s8906_s1 + $0x228] sm:$0xff] }
  0x46   :  { %v5590_v24 = vcombine.high %v310_v17, %v314_v18  ;;  %2425 = vmatmul.mubr.bf16.vlgmr.msra.gmra.mrb[0].mxu1 %v6865_v16  ;;  %v318_v28 = vld [vmem:[%s8906_s1 + $0x880] sm:$0xff]  ;;  %v5589_v31 = vcombine.low %v310_v17, %v314_v18  ;;  %v5383_v17 = vcombine.low %v103_v4, %v107_v5  ;;  %v5392_v19 = vcombine.high %v111_v12, %v115_v13 }
  0x47   :  { %v322_v29 = vld [vmem:[%s8906_s1 + $0x8a0] sm:$0xff]  ;;  %2466 = vmatmul.mubr.bf16.vlgmr.msra.gmra.mrb[0].mxu0 %v6876_v21  ;;  %2516 = vmatpush1.bf16.msra.mxu1 %v5327_v20  ;;  %v5391_v26 = vcombine.low %v111_v12, %v115_v13 }
  0x48   :  { %2475 = vmatpush1.bf16.msra.mxu0 %v5581_v22  ;;  %2517 = vmatprep.subr.bf16.mxu1 %v5336_v23  ;;  %v5598_v33 = vcombine.high %v318_v28, %v322_v29  ;;  %v326_v36 = vld [vmem:[%s8906_s1 + $0x8c0] sm:$0xff]  ;;  %v5597_v39 = vcombine.low %v318_v28, %v322_v29  ;;  %v119_v22 = vld [vmem:[%s8906_s1 + $0x248] sm:$0xff] }
  0x49   :  { %2476 = vmatprep.subr.bf16.mxu0 %v5590_v24  ;;  %2506 = vmatprep.mubr.bf16.mxu0 %v6884_v27  ;;  %v330_v37 = vld [vmem:[%s8906_s1 + $0x8e0] sm:$0xff]  ;;  %v123_v23 = vld [vmem:[%s8906_s1 + $0x268] sm:$0xff] }
  0x4a   :  { %2547 = vmatprep.mubr.bf16.mxu1 %v6730_v57  ;;  %v5606_v41 = vcombine.high %v326_v36, %v330_v37  ;;  %v334_v44 = vld [vmem:[%s8906_s1 + $0x900] sm:$0xff]  ;;  %v5605_v47 = vcombine.low %v326_v36, %v330_v37  ;;  %v5400_v29 = vcombine.high %v119_v22, %v123_v23  ;;  %v5399_v35 = vcombine.low %v119_v22, %v123_v23  ;;  %v52_v22 = vld [vmem:[%s8906_s1 + $0x30] sm:$0xff] }
  0x4b   :  { %2518 = vmatpush1.bf16.msra.mxu1 %v5335_v30  ;;  %v338_v45 = vld [vmem:[%s8906_s1 + $0x920] sm:$0xff] }
  0x4c   :  { %2477 = vmatpush1.bf16.msra.mxu0 %v5589_v31  ;;  %2519 = vmatprep.subr.bf16.mxu1 %v5344_v32  ;;  %v5614_v49 = vcombine.high %v334_v44, %v338_v45  ;;  %v342_v52 = vld [vmem:[%s8906_s1 + $0x940] sm:$0xff]  ;;  %v5613_v55 = vcombine.low %v334_v44, %v338_v45  ;;  %v127_v31 = vld [vmem:[%s8906_s1 + $0x288] sm:$0xff] }
  0x4d   :  { %2478 = vmatprep.subr.bf16.mxu0 %v5598_v33  ;;  %v346_v53 = vld [vmem:[%s8906_s1 + $0x960] sm:$0xff]  ;;  %v131_v32 = vld [vmem:[%s8906_s1 + $0x2a8] sm:$0xff] }
  0x4e   :  { %v5622_v58 = vcombine.high %v342_v52, %v346_v53  ;;  %v350_v62 = vld [vmem:[%s8906_s1 + $0x980] sm:$0xff]  ;;  %v5621_v1 = vcombine.low %v342_v52, %v346_v53  ;;  %v5408_v37 = vcombine.high %v127_v31, %v131_v32  ;;  %v5407_v43 = vcombine.low %v127_v31, %v131_v32  ;;  %v56_v31 = vld [vmem:[%s8906_s1 + $0x50] sm:$0xff] }
  0x4f   :  { %2520 = vmatpush1.bf16.msra.mxu1 %v5343_v38  ;;  %v354_v63 = vld [vmem:[%s8906_s1 + $0x9a0] sm:$0xff]  ;;  %v60_v32 = vld [vmem:[%s8906_s1 + $0x70] sm:$0xff] }
  0x50   :  { %2479 = vmatpush1.bf16.msra.mxu0 %v5597_v39  ;;  %2521 = vmatprep.subr.bf16.mxu1 %v5352_v40  ;;  %v5630_v3 = vcombine.high %v350_v62, %v354_v63  ;;  %v358_v6 = vld [vmem:[%s8906_s1 + $0x9c0] sm:$0xff]  ;;  %v5629_v9 = vcombine.low %v350_v62, %v354_v63  ;;  %v135_v39 = vld [vmem:[%s8906_s1 + $0x2c8] sm:$0xff] }
  0x51   :  { %2480 = vmatprep.subr.bf16.mxu0 %v5606_v41  ;;  %v362_v7 = vld [vmem:[%s8906_s1 + $0x9e0] sm:$0xff]  ;;  %v139_v40 = vld [vmem:[%s8906_s1 + $0x2e8] sm:$0xff] }
  0x52   :  { %v5638_v11 = vcombine.high %v358_v6, %v362_v7  ;;  %v366_v14 = vld [vmem:[%s8906_s1 + $0xa00] sm:$0xff]  ;;  %v5637_v18 = vcombine.low %v358_v6, %v362_v7  ;;  %v5416_v45 = vcombine.high %v135_v39, %v139_v40  ;;  %v5415_v51 = vcombine.low %v135_v39, %v139_v40  ;;  %v195_v39 = vld [vmem:[%s8906_s1 + $0x4a8] sm:$0xff]  ;;  %v64_v40 = vld [vmem:[%s8906_s1 + $0x90] sm:$0xff] }
  0x53   :  { %2522 = vmatpush1.bf16.msra.mxu1 %v5351_v46  ;;  %v370_v15 = vld [vmem:[%s8906_s1 + $0xa20] sm:$0xff] }
  0x54   :  { %2481 = vmatpush1.bf16.msra.mxu0 %v5605_v47  ;;  %2523 = vmatprep.subr.bf16.mxu1 %v5360_v48  ;;  %v5646_v20 = vcombine.high %v366_v14, %v370_v15  ;;  %v374_v24 = vld [vmem:[%s8906_s1 + $0xa40] sm:$0xff]  ;;  %v5645_v28 = vcombine.low %v366_v14, %v370_v15  ;;  %v143_v47 = vld [vmem:[%s8906_s1 + $0x308] sm:$0xff] }
  0x55   :  { %2482 = vmatprep.subr.bf16.mxu0 %v5614_v49  ;;  %v378_v25 = vld [vmem:[%s8906_s1 + $0xa60] sm:$0xff]  ;;  %v147_v48 = vld [vmem:[%s8906_s1 + $0x328] sm:$0xff] }
  0x56   :  { %v5654_v30 = vcombine.high %v374_v24, %v378_v25  ;;  %v382_v33 = vld [vmem:[%s8906_s1 + $0xa80] sm:$0xff]  ;;  %v5653_v36 = vcombine.low %v374_v24, %v378_v25  ;;  %v5424_v53 = vcombine.high %v143_v47, %v147_v48  ;;  %v5423_v60 = vcombine.low %v143_v47, %v147_v48  ;;  %v203_v47 = vld [vmem:[%s8906_s1 + $0x4e8] sm:$0xff]  ;;  %v72_v48 = vld [vmem:[%s8906_s1 + $0xd0] sm:$0xff] }
  0x57   :  { %2524 = vmatpush1.bf16.msra.mxu1 %v5359_v54  ;;  %v386_v34 = vld [vmem:[%s8906_s1 + $0xaa0] sm:$0xff] }
  0x58   :  { %2483 = vmatpush1.bf16.msra.mxu0 %v5613_v55  ;;  %2525 = vmatprep.subr.bf16.mxu1 %v5368_v56  ;;  %v5662_v38 = vcombine.high %v382_v33, %v386_v34  ;;  %v390_v41 = vld [vmem:[%s8906_s1 + $0xac0] sm:$0xff]  ;;  %v5661_v44 = vcombine.low %v382_v33, %v386_v34  ;;  %v151_v55 = vld [vmem:[%s8906_s1 + $0x348] sm:$0xff] }
  0x59   :  { %2484 = vmatprep.subr.bf16.mxu0 %v5622_v58  ;;  %v394_v42 = vld [vmem:[%s8906_s1 + $0xae0] sm:$0xff]  ;;  %v155_v56 = vld [vmem:[%s8906_s1 + $0x368] sm:$0xff] }
  0x5a   :  { %v5670_v46 = vcombine.high %v390_v41, %v394_v42  ;;  %v398_v49 = vld [vmem:[%s8906_s1 + $0xb00] sm:$0xff]  ;;  %v5669_v52 = vcombine.low %v390_v41, %v394_v42  ;;  %v5432_v63 = vcombine.high %v151_v55, %v155_v56  ;;  %v5431_v5 = vcombine.low %v151_v55, %v155_v56  ;;  %v68_v41 = vld [vmem:[%s8906_s1 + $0xb0] sm:$0xff]  ;;  %v211_v55 = vld [vmem:[%s8906_s1 + $0x528] sm:$0xff] }
  0x5b   :  { %2526 = vmatpush1.bf16.msra.mxu1 %v5367_v0  ;;  %v402_v50 = vld [vmem:[%s8906_s1 + $0xb20] sm:$0xff]  ;;  %v80_v56 = vld [vmem:[%s8906_s1 + $0x110] sm:$0xff] }
  0x5c   :  { %2485 = vmatpush1.bf16.msra.mxu0 %v5621_v1  ;;  %2527 = vmatprep.subr.bf16.mxu1 %v5376_v2  ;;  %v5678_v54 = vcombine.high %v398_v49, %v402_v50  ;;  %v406_v58 = vld [vmem:[%s8906_s1 + $0xb40] sm:$0xff]  ;;  %v5677_v62 = vcombine.low %v398_v49, %v402_v50  ;;  %v159_v1 = vld [vmem:[%s8906_s1 + $0x388] sm:$0xff]  ;;  %v76_v49 = vld [vmem:[%s8906_s1 + $0xf0] sm:$0xff] }
  0x5d   :  { %2486 = vmatprep.subr.bf16.mxu0 %v5630_v3  ;;  %v410_v59 = vld [vmem:[%s8906_s1 + $0xb60] sm:$0xff]  ;;  %v163_v2 = vld [vmem:[%s8906_s1 + $0x3a8] sm:$0xff] }
  0x5e   :  { %v5686_v0 = vcombine.high %v406_v58, %v410_v59  ;;  %v414_v3 = vld [vmem:[%s8906_s1 + $0xb80] sm:$0xff]  ;;  %v5685_v6 = vcombine.low %v406_v58, %v410_v59  ;;  %v5440_v7 = vcombine.high %v159_v1, %v163_v2  ;;  %v5439_v13 = vcombine.low %v159_v1, %v163_v2  ;;  %v84_v58 = vld [vmem:[%s8906_s1 + $0x130] sm:$0xff]  ;;  %v219_v1 = vld [vmem:[%s8906_s1 + $0x568] sm:$0xff] }
  0x5f   :  { %2528 = vmatpush1.bf16.msra.mxu1 %v5375_v8  ;;  %v418_v4 = vld [vmem:[%s8906_s1 + $0xba0] sm:$0xff]  ;;  %v88_v2 = vld [vmem:[%s8906_s1 + $0x150] sm:$0xff] }
  0x60   :  { %2487 = vmatpush1.bf16.msra.mxu0 %v5629_v9  ;;  %2529 = vmatprep.subr.bf16.mxu1 %v5384_v10  ;;  %v5694_v8 = vcombine.high %v414_v3, %v418_v4  ;;  %v167_v9 = vld [vmem:[%s8906_s1 + $0x3c8] sm:$0xff]  ;;  %v426_v12 = vld [vmem:[%s8906_s1 + $0xbe0] sm:$0xff]  ;;  %v5693_v14 = vcombine.low %v414_v3, %v418_v4  ;;  %v92_v3 = vld [vmem:[%s8906_s1 + $0x170] sm:$0xff] }
  0x61   :  { %2488 = vmatprep.subr.bf16.mxu0 %v5638_v11  ;;  %v171_v10 = vld [vmem:[%s8906_s1 + $0x3e8] sm:$0xff]  ;;  %v422_v11 = vld [vmem:[%s8906_s1 + $0xbc0] sm:$0xff] }
  0x62   :  { %v5448_v15 = vcombine.high %v167_v9, %v171_v10  ;;  %v5447_v23 = vcombine.low %v167_v9, %v171_v10  ;;  %v5701_v24 = vcombine.low %v422_v11, %v426_v12  ;;  %v38_v25 = vld [vmem:[%s8907_s0 + $0x20] sm:$0xff]  ;;  %v227_v9 = vld [vmem:[%s8906_s1 + $0x5a8] sm:$0xff]  ;;  %v96_v10 = vld [vmem:[%s8906_s1 + $0x190] sm:$0xff] }
  0x63   :  { %2530 = vmatpush1.bf16.msra.mxu1 %v5383_v17  ;;  %v5702_v17 = vcombine.high %v422_v11, %v426_v12  ;;  %v7079_v33 = vpack.c.bf16 %v38_v25, %v38_v25  ;;  %v100_v11 = vld [vmem:[%s8906_s1 + $0x1b0] sm:$0xff] }
  0x64   :  { %2489 = vmatpush1.bf16.msra.mxu0 %v5637_v18  ;;  %2531 = vmatprep.subr.bf16.mxu1 %v5392_v19  ;;  %v175_v18 = vld [vmem:[%s8906_s1 + $0x408] sm:$0xff] }
  0x65   :  { %2490 = vmatprep.subr.bf16.mxu0 %v5646_v20  ;;  %v179_v19 = vld [vmem:[%s8906_s1 + $0x428] sm:$0xff]  ;;  %v48_v20 = vld [vmem:[%s8906_s1 + $0x10] sm:$0xff] }
  0x66   :  { %v5455_v34 = vcombine.low %v175_v18, %v179_v19 }
  0x67   :  { %2532 = vmatpush1.bf16.msra.mxu1 %v5391_v26  ;;  %v5456_v26 = vcombine.high %v175_v18, %v179_v19  ;;  %v235_v18 = vld [vmem:[%s8906_s1 + $0x5e8] sm:$0xff]  ;;  %v104_v19 = vld [vmem:[%s8906_s1 + $0x1d0] sm:$0xff] }
  0x68   :  { %2491 = vmatpush1.bf16.msra.mxu0 %v5645_v28  ;;  %2533 = vmatprep.subr.bf16.mxu1 %v5400_v29  ;;  %v5330_v28 = vcombine.high %v48_v20, %v52_v22  ;;  %v183_v29 = vld [vmem:[%s8906_s1 + $0x448] sm:$0xff] }
  0x69   :  { %2492 = vmatprep.subr.bf16.mxu0 %v5654_v30  ;;  %v187_v30 = vld [vmem:[%s8906_s1 + $0x468] sm:$0xff] }
  0x6a   :  { %v5463_v42 = vcombine.low %v183_v29, %v187_v30 }
  0x6b   :  { %2534 = vmatpush1.bf16.msra.mxu1 %v5399_v35  ;;  %v5329_v35 = vcombine.low %v48_v20, %v52_v22  ;;  %v108_v20 = vld [vmem:[%s8906_s1 + $0x1f0] sm:$0xff] }
  0x6c   :  { %2493 = vmatpush1.bf16.msra.mxu0 %v5653_v36  ;;  %2535 = vmatprep.subr.bf16.mxu1 %v5408_v37  ;;  %v5464_v36 = vcombine.high %v183_v29, %v187_v30  ;;  %v5338_v37 = vcombine.high %v56_v31, %v60_v32  ;;  %v5386_v25 = vcombine.high %v104_v19, %v108_v20  ;;  %v112_v29 = vld [vmem:[%s8906_s1 + $0x210] sm:$0xff] }
  0x6d   :  { %2494 = vmatprep.subr.bf16.mxu0 %v5662_v38  ;;  %v191_v38 = vld [vmem:[%s8906_s1 + $0x488] sm:$0xff]  ;;  %v116_v30 = vld [vmem:[%s8906_s1 + $0x230] sm:$0xff] }
  0x6e   :  { %v5471_v50 = vcombine.low %v191_v38, %v195_v39 }
  0x6f   :  { %2536 = vmatpush1.bf16.msra.mxu1 %v5407_v43  ;;  %v5337_v43 = vcombine.low %v56_v31, %v60_v32  ;;  %v5385_v32 = vcombine.low %v104_v19, %v108_v20 }
  0x70   :  { %2495 = vmatpush1.bf16.msra.mxu0 %v5661_v44  ;;  %2537 = vmatprep.subr.bf16.mxu1 %v5416_v45  ;;  %v5472_v44 = vcombine.high %v191_v38, %v195_v39  ;;  %v5346_v45 = vcombine.high %v64_v40, %v68_v41  ;;  %v120_v38 = vld [vmem:[%s8906_s1 + $0x250] sm:$0xff] }
  0x71   :  { %2496 = vmatprep.subr.bf16.mxu0 %v5670_v46  ;;  %v199_v46 = vld [vmem:[%s8906_s1 + $0x4c8] sm:$0xff]  ;;  %v124_v39 = vld [vmem:[%s8906_s1 + $0x270] sm:$0xff] }
  0x72   :  { %v5479_v59 = vcombine.low %v199_v46, %v203_v47 }
  0x73   :  { %2538 = vmatpush1.bf16.msra.mxu1 %v5415_v51  ;;  %v5345_v51 = vcombine.low %v64_v40, %v68_v41  ;;  %v5393_v41 = vcombine.low %v112_v29, %v116_v30 }
  0x74   :  { %2497 = vmatpush1.bf16.msra.mxu0 %v5669_v52  ;;  %2539 = vmatprep.subr.bf16.mxu1 %v5424_v53  ;;  %v5480_v52 = vcombine.high %v199_v46, %v203_v47  ;;  %v5354_v53 = vcombine.high %v72_v48, %v76_v49  ;;  %v128_v46 = vld [vmem:[%s8906_s1 + $0x290] sm:$0xff] }
  0x75   :  { %2498 = vmatprep.subr.bf16.mxu0 %v5678_v54  ;;  %v207_v54 = vld [vmem:[%s8906_s1 + $0x508] sm:$0xff]  ;;  %v132_v47 = vld [vmem:[%s8906_s1 + $0x2b0] sm:$0xff] }
  0x76   :  { %v5487_v4 = vcombine.low %v207_v54, %v211_v55 }
  0x77   :  { %2540 = vmatpush1.bf16.msra.mxu1 %v5423_v60  ;;  %v5353_v60 = vcombine.low %v72_v48, %v76_v49  ;;  %v5401_v49 = vcombine.low %v120_v38, %v124_v39 }
  0x78   :  { %2499 = vmatpush1.bf16.msra.mxu0 %v5677_v62  ;;  %2541 = vmatprep.subr.bf16.mxu1 %v5432_v63  ;;  %v5488_v62 = vcombine.high %v207_v54, %v211_v55  ;;  %v5362_v63 = vcombine.high %v80_v56, %v84_v58  ;;  %v136_v54 = vld [vmem:[%s8906_s1 + $0x2d0] sm:$0xff] }
  0x79   :  { %2500 = vmatprep.subr.bf16.mxu0 %v5686_v0  ;;  %v215_v0 = vld [vmem:[%s8906_s1 + $0x548] sm:$0xff]  ;;  %v140_v55 = vld [vmem:[%s8906_s1 + $0x2f0] sm:$0xff] }
  0x7a   :  { %v5495_v12 = vcombine.low %v215_v0, %v219_v1 }
  0x7b   :  { %2542 = vmatpush1.bf16.msra.mxu1 %v5431_v5  ;;  %v5361_v5 = vcombine.low %v80_v56, %v84_v58  ;;  %v5409_v58 = vcombine.low %v128_v46, %v132_v47 }
  0x7c   :  { %2501 = vmatpush1.bf16.msra.mxu0 %v5685_v6  ;;  %2543 = vmatprep.subr.bf16.mxu1 %v5440_v7  ;;  %v5496_v6 = vcombine.high %v215_v0, %v219_v1  ;;  %v5370_v7 = vcombine.high %v88_v2, %v92_v3  ;;  %v144_v0 = vld [vmem:[%s8906_s1 + $0x310] sm:$0xff] }
  0x7d   :  { %2502 = vmatprep.subr.bf16.mxu0 %v5694_v8  ;;  %v223_v8 = vld [vmem:[%s8906_s1 + $0x588] sm:$0xff]  ;;  %v148_v1 = vld [vmem:[%s8906_s1 + $0x330] sm:$0xff] }
  0x7e   :  { %v5503_v22 = vcombine.low %v223_v8, %v227_v9 }
  0x7f   :  { %2544 = vmatpush1.bf16.msra.mxu1 %v5439_v13  ;;  %v5369_v13 = vcombine.low %v88_v2, %v92_v3  ;;  %v5417_v3 = vcombine.low %v136_v54, %v140_v55 }
  0x80   :  { %2503 = vmatpush1.bf16.msra.mxu0 %v5693_v14  ;;  %2545 = vmatprep.subr.bf16.mxu1 %v5448_v15  ;;  %v5504_v14 = vcombine.high %v223_v8, %v227_v9  ;;  %v5378_v15 = vcombine.high %v96_v10, %v100_v11  ;;  %v152_v8 = vld [vmem:[%s8906_s1 + $0x350] sm:$0xff] }
  0x81   :  { %2504 = vmatprep.subr.bf16.mxu0 %v5702_v17  ;;  %v231_v17 = vld [vmem:[%s8906_s1 + $0x5c8] sm:$0xff]  ;;  %v156_v9 = vld [vmem:[%s8906_s1 + $0x370] sm:$0xff] }
  0x82   :  { %v5511_v31 = vcombine.low %v231_v17, %v235_v18  ;;  %v5433_v20 = vcombine.low %v152_v8, %v156_v9 }
  0x83   :  { %2546 = vmatpush1.bf16.msra.mxu1 %v5447_v23  ;;  %v5377_v23 = vcombine.low %v96_v10, %v100_v11  ;;  %v5425_v11 = vcombine.low %v144_v0, %v148_v1 }
  0x84   :  { %2505 = vmatpush1.bf16.msra.mxu0 %v5701_v24  ;;  %2556 = vmatprep.subr.bf16.mxu1 %v5456_v26  ;;  %v5512_v24 = vcombine.high %v231_v17, %v235_v18  ;;  %v239_v26 = vld [vmem:[%s8906_s1 + $0x608] sm:$0xff]  ;;  %v160_v17 = vld [vmem:[%s8906_s1 + $0x390] sm:$0xff] }
  0x85   :  { %2638 = vmatprep.subr.bf16.mxu0 %v5330_v28  ;;  %v243_v28 = vld [vmem:[%s8906_s1 + $0x628] sm:$0xff]  ;;  %v164_v18 = vld [vmem:[%s8906_s1 + $0x3b0] sm:$0xff] }
  0x86   :  { %2548 = vmatmul.mubr.bf16.vlgmr.msra.gmra.mrb[4].mxu1 %v6865_v16  ;;  %v5519_v40 = vcombine.low %v239_v26, %v243_v28 }
  0x87   :  { %2507 = vmatmul.mubr.bf16.vlgmr.msra.gmra.mrb[0].mxu0 %v7079_v33  ;;  %2557 = vmatpush1.bf16.msra.mxu1 %v5455_v34  ;;  %v5520_v34 = vcombine.high %v239_v26, %v243_v28  ;;  %v168_v26 = vld [vmem:[%s8906_s1 + $0x3d0] sm:$0xff] }
  0x88   :  { %2639 = vmatpush1.bf16.msra.mxu0 %v5329_v35  ;;  %2558 = vmatprep.subr.bf16.mxu1 %v5464_v36  ;;  %v5394_v35 = vcombine.high %v112_v29, %v116_v30  ;;  %v247_v36 = vld [vmem:[%s8906_s1 + $0x648] sm:$0xff]  ;;  %v172_v28 = vld [vmem:[%s8906_s1 + $0x3f0] sm:$0xff]  ;;  %v5441_v30 = vcombine.low %v160_v17, %v164_v18 }
  0x89   :  { %2640 = vmatprep.subr.bf16.mxu0 %v5338_v37  ;;  %2588 = vmatprep.mubr.bf16.mxu1 %v6741_v61  ;;  %v251_v37 = vld [vmem:[%s8906_s1 + $0x668] sm:$0xff] }
  0x8a   :  { %2670 = vmatprep.mubr.bf16.mxu0 %v6730_v57  ;;  %v5527_v48 = vcombine.low %v247_v36, %v251_v37 }
  0x8b   :  { %2559 = vmatpush1.bf16.msra.mxu1 %v5463_v42  ;;  %v5528_v42 = vcombine.high %v247_v36, %v251_v37  ;;  %v176_v36 = vld [vmem:[%s8906_s1 + $0x410] sm:$0xff] }
  0x8c   :  { %2641 = vmatpush1.bf16.msra.mxu0 %v5337_v43  ;;  %2560 = vmatprep.subr.bf16.mxu1 %v5472_v44  ;;  %v5402_v43 = vcombine.high %v120_v38, %v124_v39  ;;  %v255_v44 = vld [vmem:[%s8906_s1 + $0x688] sm:$0xff]  ;;  %v180_v37 = vld [vmem:[%s8906_s1 + $0x430] sm:$0xff]  ;;  %v5449_v39 = vcombine.low %v168_v26, %v172_v28 }
  0x8d   :  { %2642 = vmatprep.subr.bf16.mxu0 %v5346_v45  ;;  %v259_v45 = vld [vmem:[%s8906_s1 + $0x6a8] sm:$0xff] }
  0x8e   :  { %v5535_v56 = vcombine.low %v255_v44, %v259_v45 }
  0x8f   :  { %2561 = vmatpush1.bf16.msra.mxu1 %v5471_v50  ;;  %v5536_v50 = vcombine.high %v255_v44, %v259_v45  ;;  %v184_v44 = vld [vmem:[%s8906_s1 + $0x450] sm:$0xff] }
  0x90   :  { %2643 = vmatpush1.bf16.msra.mxu0 %v5345_v51  ;;  %2562 = vmatprep.subr.bf16.mxu1 %v5480_v52  ;;  %v5410_v51 = vcombine.high %v128_v46, %v132_v47  ;;  %v263_v52 = vld [vmem:[%s8906_s1 + $0x6c8] sm:$0xff]  ;;  %v188_v45 = vld [vmem:[%s8906_s1 + $0x470] sm:$0xff]  ;;  %v5457_v47 = vcombine.low %v176_v36, %v180_v37 }
  0x91   :  { %2644 = vmatprep.subr.bf16.mxu0 %v5354_v53  ;;  %v267_v53 = vld [vmem:[%s8906_s1 + $0x6e8] sm:$0xff] }
  0x92   :  { %v5543_v2 = vcombine.low %v263_v52, %v267_v53 }
  0x93   :  { %2563 = vmatpush1.bf16.msra.mxu1 %v5479_v59  ;;  %v5544_v59 = vcombine.high %v263_v52, %v267_v53  ;;  %v192_v52 = vld [vmem:[%s8906_s1 + $0x490] sm:$0xff] }
  0x94   :  { %2645 = vmatpush1.bf16.msra.mxu0 %v5353_v60  ;;  %2564 = vmatprep.subr.bf16.mxu1 %v5488_v62  ;;  %v5418_v60 = vcombine.high %v136_v54, %v140_v55  ;;  %v271_v62 = vld [vmem:[%s8906_s1 + $0x708] sm:$0xff]  ;;  %v196_v53 = vld [vmem:[%s8906_s1 + $0x4b0] sm:$0xff]  ;;  %v5465_v55 = vcombine.low %v184_v44, %v188_v45 }
  0x95   :  { %2646 = vmatprep.subr.bf16.mxu0 %v5362_v63  ;;  %v275_v63 = vld [vmem:[%s8906_s1 + $0x728] sm:$0xff] }
  0x96   :  { %v5551_v10 = vcombine.low %v271_v62, %v275_v63 }
  0x97   :  { %2565 = vmatpush1.bf16.msra.mxu1 %v5487_v4  ;;  %v5552_v4 = vcombine.high %v271_v62, %v275_v63  ;;  %v5474_v62 = vcombine.high %v192_v52, %v196_v53  ;;  %v204_v63 = vld [vmem:[%s8906_s1 + $0x4f0] sm:$0xff] }
  0x98   :  { %2647 = vmatpush1.bf16.msra.mxu0 %v5361_v5  ;;  %2566 = vmatprep.subr.bf16.mxu1 %v5496_v6  ;;  %v5426_v5 = vcombine.high %v144_v0, %v148_v1  ;;  %v279_v6 = vld [vmem:[%s8906_s1 + $0x748] sm:$0xff]  ;;  %v5473_v1 = vcombine.low %v192_v52, %v196_v53 }
  0x99   :  { %2648 = vmatprep.subr.bf16.mxu0 %v5370_v7  ;;  %v283_v7 = vld [vmem:[%s8906_s1 + $0x768] sm:$0xff] }
  0x9a   :  { %v5559_v19 = vcombine.low %v279_v6, %v283_v7 }
  0x9b   :  { %2567 = vmatpush1.bf16.msra.mxu1 %v5495_v12  ;;  %v5560_v12 = vcombine.high %v279_v6, %v283_v7  ;;  %v212_v7 = vld [vmem:[%s8906_s1 + $0x530] sm:$0xff] }
  0x9c   :  { %2649 = vmatpush1.bf16.msra.mxu0 %v5369_v13  ;;  %2568 = vmatprep.subr.bf16.mxu1 %v5504_v14  ;;  %v5434_v13 = vcombine.high %v152_v8, %v156_v9  ;;  %v287_v14 = vld [vmem:[%s8906_s1 + $0x788] sm:$0xff] }
  0x9d   :  { %2650 = vmatprep.subr.bf16.mxu0 %v5378_v15  ;;  %v291_v15 = vld [vmem:[%s8906_s1 + $0x7a8] sm:$0xff] }
  0x9e   :  { %v5567_v29 = vcombine.low %v287_v14, %v291_v15 }
  0x9f   :  { %2569 = vmatpush1.bf16.msra.mxu1 %v5503_v22  ;;  %v5568_v22 = vcombine.high %v287_v14, %v291_v15  ;;  %v220_v15 = vld [vmem:[%s8906_s1 + $0x570] sm:$0xff] }
  0xa0   :  { %2651 = vmatpush1.bf16.msra.mxu0 %v5377_v23  ;;  %2570 = vmatprep.subr.bf16.mxu1 %v5512_v24  ;;  %v5442_v23 = vcombine.high %v160_v17, %v164_v18  ;;  %v295_v24 = vld [vmem:[%s8906_s1 + $0x7c8] sm:$0xff] }
  0xa1   :  { %2652 = vmatprep.subr.bf16.mxu0 %v5386_v25  ;;  %v299_v25 = vld [vmem:[%s8906_s1 + $0x7e8] sm:$0xff] }
  0xa2   :  { %v5575_v38 = vcombine.low %v295_v24, %v299_v25 }
  0xa3   :  { %2571 = vmatpush1.bf16.msra.mxu1 %v5511_v31  ;;  %v5576_v31 = vcombine.high %v295_v24, %v299_v25  ;;  %v228_v25 = vld [vmem:[%s8906_s1 + $0x5b0] sm:$0xff] }
  0xa4   :  { %2653 = vmatpush1.bf16.msra.mxu0 %v5385_v32  ;;  %2572 = vmatprep.subr.bf16.mxu1 %v5520_v34  ;;  %v5450_v32 = vcombine.high %v168_v26, %v172_v28  ;;  %v303_v34 = vld [vmem:[%s8906_s1 + $0x808] sm:$0xff] }
  0xa5   :  { %2654 = vmatprep.subr.bf16.mxu0 %v5394_v35  ;;  %v307_v35 = vld [vmem:[%s8906_s1 + $0x828] sm:$0xff] }
  0xa6   :  { %v5583_v46 = vcombine.low %v303_v34, %v307_v35 }
  0xa7   :  { %2573 = vmatpush1.bf16.msra.mxu1 %v5519_v40  ;;  %v5584_v40 = vcombine.high %v303_v34, %v307_v35  ;;  %v232_v34 = vld [vmem:[%s8906_s1 + $0x5d0] sm:$0xff] }
  0xa8   :  { %2655 = vmatpush1.bf16.msra.mxu0 %v5393_v41  ;;  %2574 = vmatprep.subr.bf16.mxu1 %v5528_v42  ;;  %v5458_v41 = vcombine.high %v176_v36, %v180_v37  ;;  %v311_v42 = vld [vmem:[%s8906_s1 + $0x848] sm:$0xff]  ;;  %v236_v35 = vld [vmem:[%s8906_s1 + $0x5f0] sm:$0xff] }
  0xa9   :  { %2656 = vmatprep.subr.bf16.mxu0 %v5402_v43  ;;  %v315_v43 = vld [vmem:[%s8906_s1 + $0x868] sm:$0xff] }
  0xaa   :  { %v5591_v54 = vcombine.low %v311_v42, %v315_v43 }
  0xab   :  { %2575 = vmatpush1.bf16.msra.mxu1 %v5527_v48  ;;  %v5592_v48 = vcombine.high %v311_v42, %v315_v43  ;;  %v240_v42 = vld [vmem:[%s8906_s1 + $0x610] sm:$0xff] }
  0xac   :  { %2657 = vmatpush1.bf16.msra.mxu0 %v5401_v49  ;;  %2576 = vmatprep.subr.bf16.mxu1 %v5536_v50  ;;  %v319_v49 = vld [vmem:[%s8906_s1 + $0x888] sm:$0xff]  ;;  %v244_v43 = vld [vmem:[%s8906_s1 + $0x630] sm:$0xff] }
  0xad   :  { %2658 = vmatprep.subr.bf16.mxu0 %v5410_v51  ;;  %v323_v50 = vld [vmem:[%s8906_s1 + $0x8a8] sm:$0xff]  ;;  %v5466_v51 = vcombine.high %v184_v44, %v188_v45  ;;  %v5513_v45 = vcombine.low %v232_v34, %v236_v35  ;;  %v5521_v53 = vcombine.low %v240_v42, %v244_v43 }
  0xae   :  { %v5599_v0 = vcombine.low %v319_v49, %v323_v50 }
  0xaf   :  { %2577 = vmatpush1.bf16.msra.mxu1 %v5535_v56  ;;  %v5600_v56 = vcombine.high %v319_v49, %v323_v50  ;;  %v5522_v49 = vcombine.high %v240_v42, %v244_v43  ;;  %v248_v50 = vld [vmem:[%s8906_s1 + $0x650] sm:$0xff] }
  0xb0   :  { %2659 = vmatpush1.bf16.msra.mxu0 %v5409_v58  ;;  %2578 = vmatprep.subr.bf16.mxu1 %v5544_v59  ;;  %v327_v58 = vld [vmem:[%s8906_s1 + $0x8c8] sm:$0xff] }
  0xb1   :  { %2660 = vmatprep.subr.bf16.mxu0 %v5418_v60  ;;  %v331_v59 = vld [vmem:[%s8906_s1 + $0x8e8] sm:$0xff]  ;;  %v200_v60 = vld [vmem:[%s8906_s1 + $0x4d0] sm:$0xff] }
  0xb2   :  { %v5482_v6 = vcombine.high %v200_v60, %v204_v63  ;;  %v5607_v8 = vcombine.low %v327_v58, %v331_v59  ;;  %v5481_v9 = vcombine.low %v200_v60, %v204_v63  ;;  %v260_v60 = vld [vmem:[%s8906_s1 + $0x6b0] sm:$0xff] }
  0xb3   :  { %2579 = vmatpush1.bf16.msra.mxu1 %v5543_v2  ;;  %v5608_v2 = vcombine.high %v327_v58, %v331_v59  ;;  %v256_v59 = vld [vmem:[%s8906_s1 + $0x690] sm:$0xff] }
  0xb4   :  { %2661 = vmatpush1.bf16.msra.mxu0 %v5417_v3  ;;  %2580 = vmatprep.subr.bf16.mxu1 %v5552_v4  ;;  %v335_v3 = vld [vmem:[%s8906_s1 + $0x908] sm:$0xff] }
  0xb5   :  { %2662 = vmatprep.subr.bf16.mxu0 %v5426_v5  ;;  %v339_v4 = vld [vmem:[%s8906_s1 + $0x928] sm:$0xff]  ;;  %v208_v5 = vld [vmem:[%s8906_s1 + $0x510] sm:$0xff] }
  0xb6   :  { %v5490_v14 = vcombine.high %v208_v5, %v212_v7  ;;  %v5615_v17 = vcombine.low %v335_v3, %v339_v4  ;;  %v5489_v18 = vcombine.low %v208_v5, %v212_v7  ;;  %v268_v5 = vld [vmem:[%s8906_s1 + $0x6f0] sm:$0xff]  ;;  %v5537_v7 = vcombine.low %v256_v59, %v260_v60 }
  0xb7   :  { %2581 = vmatpush1.bf16.msra.mxu1 %v5551_v10  ;;  %v5616_v10 = vcombine.high %v335_v3, %v339_v4  ;;  %v264_v3 = vld [vmem:[%s8906_s1 + $0x6d0] sm:$0xff]  ;;  %v5538_v4 = vcombine.high %v256_v59, %v260_v60 }
  0xb8   :  { %2663 = vmatpush1.bf16.msra.mxu0 %v5425_v11  ;;  %2582 = vmatprep.subr.bf16.mxu1 %v5560_v12  ;;  %v343_v11 = vld [vmem:[%s8906_s1 + $0x948] sm:$0xff] }
  0xb9   :  { %2664 = vmatprep.subr.bf16.mxu0 %v5434_v13  ;;  %v347_v12 = vld [vmem:[%s8906_s1 + $0x968] sm:$0xff]  ;;  %v216_v13 = vld [vmem:[%s8906_s1 + $0x550] sm:$0xff] }
  0xba   :  { %v5498_v24 = vcombine.high %v216_v13, %v220_v15  ;;  %v5623_v26 = vcombine.low %v343_v11, %v347_v12  ;;  %v5497_v28 = vcombine.low %v216_v13, %v220_v15  ;;  %v276_v13 = vld [vmem:[%s8906_s1 + $0x730] sm:$0xff]  ;;  %v5545_v15 = vcombine.low %v264_v3, %v268_v5 }
  0xbb   :  { %2583 = vmatpush1.bf16.msra.mxu1 %v5559_v19  ;;  %v5624_v19 = vcombine.high %v343_v11, %v347_v12  ;;  %v272_v11 = vld [vmem:[%s8906_s1 + $0x710] sm:$0xff]  ;;  %v5546_v12 = vcombine.high %v264_v3, %v268_v5  ;;  %v73_v5 = vld [vmem:[%s8906_s1 + $0xd8] sm:$0xff] }
  0xbc   :  { %2665 = vmatpush1.bf16.msra.mxu0 %v5433_v20  ;;  %2584 = vmatprep.subr.bf16.mxu1 %v5568_v22  ;;  %v351_v20 = vld [vmem:[%s8906_s1 + $0x988] sm:$0xff] }
  0xbd   :  { %2666 = vmatprep.subr.bf16.mxu0 %v5442_v23  ;;  %v355_v22 = vld [vmem:[%s8906_s1 + $0x9a8] sm:$0xff]  ;;  %v224_v23 = vld [vmem:[%s8906_s1 + $0x590] sm:$0xff] }
  0xbe   :  { %v5631_v36 = vcombine.low %v351_v20, %v355_v22  ;;  %v5505_v37 = vcombine.low %v224_v23, %v228_v25 }
  0xbf   :  { %2585 = vmatpush1.bf16.msra.mxu1 %v5567_v29  ;;  %v5632_v29 = vcombine.high %v351_v20, %v355_v22  ;;  %v280_v20 = vld [vmem:[%s8906_s1 + $0x750] sm:$0xff]  ;;  %v5554_v22 = vcombine.high %v272_v11, %v276_v13 }
  0xc0   :  { %2667 = vmatpush1.bf16.msra.mxu0 %v5441_v30  ;;  %2586 = vmatprep.subr.bf16.mxu1 %v5576_v31  ;;  %v359_v30 = vld [vmem:[%s8906_s1 + $0x9c8] sm:$0xff] }
  0xc1   :  { %2668 = vmatprep.subr.bf16.mxu0 %v5450_v32  ;;  %v363_v31 = vld [vmem:[%s8906_s1 + $0x9e8] sm:$0xff]  ;;  %v5506_v32 = vcombine.high %v224_v23, %v228_v25  ;;  %v284_v23 = vld [vmem:[%s8906_s1 + $0x770] sm:$0xff]  ;;  %v5553_v25 = vcombine.low %v272_v11, %v276_v13  ;;  %v81_v13 = vld [vmem:[%s8906_s1 + $0x118] sm:$0xff] }
  0xc2   :  { %v5639_v44 = vcombine.low %v359_v30, %v363_v31 }
  0xc3   :  { %2587 = vmatpush1.bf16.msra.mxu1 %v5575_v38  ;;  %v5640_v38 = vcombine.high %v359_v30, %v363_v31  ;;  %v288_v30 = vld [vmem:[%s8906_s1 + $0x790] sm:$0xff]  ;;  %v5562_v31 = vcombine.high %v280_v20, %v284_v23 }
  0xc4   :  { %2669 = vmatpush1.bf16.msra.mxu0 %v5449_v39  ;;  %2597 = vmatprep.subr.bf16.mxu1 %v5584_v40  ;;  %v367_v39 = vld [vmem:[%s8906_s1 + $0xa08] sm:$0xff] }
  0xc5   :  { %2679 = vmatprep.subr.bf16.mxu0 %v5458_v41  ;;  %v371_v40 = vld [vmem:[%s8906_s1 + $0xa28] sm:$0xff]  ;;  %v5514_v41 = vcombine.high %v232_v34, %v236_v35  ;;  %v5561_v35 = vcombine.low %v280_v20, %v284_v23  ;;  %v93_v23 = vld [vmem:[%s8906_s1 + $0x178] sm:$0xff] }
  0xc6   :  { %2589 = vmatmul.mubr.bf16.vlgmr.msra.gmra.mrb[4].mxu1 %v6876_v21  ;;  %v5647_v52 = vcombine.low %v367_v39, %v371_v40 }
  0xc7   :  { %2598 = vmatpush1.bf16.msra.mxu1 %v5583_v46  ;;  %2671 = vmatmul.mubr.bf16.vlgmr.msra.gmra.mrb[4].mxu0 %v6865_v16  ;;  %v5648_v46 = vcombine.high %v367_v39, %v371_v40  ;;  %v296_v39 = vld [vmem:[%s8906_s1 + $0x7d0] sm:$0xff] }
  0xc8   :  { %2680 = vmatpush1.bf16.msra.mxu0 %v5457_v47  ;;  %2599 = vmatprep.subr.bf16.mxu1 %v5592_v48  ;;  %v375_v47 = vld [vmem:[%s8906_s1 + $0xa48] sm:$0xff] }
  0xc9   :  { %2681 = vmatprep.subr.bf16.mxu0 %v5466_v51  ;;  %2629 = vmatprep.mubr.bf16.mxu1 %v6884_v27  ;;  %v379_v48 = vld [vmem:[%s8906_s1 + $0xa68] sm:$0xff]  ;;  %v252_v51 = vld [vmem:[%s8906_s1 + $0x670] sm:$0xff] }
  0xca   :  { %2711 = vmatprep.mubr.bf16.mxu0 %v6741_v61  ;;  %v5530_v58 = vcombine.high %v248_v50, %v252_v51  ;;  %v5529_v63 = vcombine.low %v248_v50, %v252_v51 }
  0xcb   :  { %2600 = vmatpush1.bf16.msra.mxu1 %v5591_v54  ;;  %v5656_v54 = vcombine.high %v375_v47, %v379_v48 }
  0xcc   :  { %2682 = vmatpush1.bf16.msra.mxu0 %v5465_v55  ;;  %2601 = vmatprep.subr.bf16.mxu1 %v5600_v56  ;;  %v383_v55 = vld [vmem:[%s8906_s1 + $0xa88] sm:$0xff] }
  0xcd   :  { %2683 = vmatprep.subr.bf16.mxu0 %v5474_v62  ;;  %v387_v56 = vld [vmem:[%s8906_s1 + $0xaa8] sm:$0xff]  ;;  %v5655_v62 = vcombine.low %v375_v47, %v379_v48  ;;  %v49_v47 = vld [vmem:[%s8906_s1 + $0x18] sm:$0xff] }
  0xcf   :  { %2602 = vmatpush1.bf16.msra.mxu1 %v5599_v0  ;;  %v5664_v0 = vcombine.high %v383_v55, %v387_v56 }
  0xd0   :  { %2684 = vmatpush1.bf16.msra.mxu0 %v5473_v1  ;;  %2603 = vmatprep.subr.bf16.mxu1 %v5608_v2  ;;  %v391_v1 = vld [vmem:[%s8906_s1 + $0xac8] sm:$0xff] }
  0xd1   :  { %2685 = vmatprep.subr.bf16.mxu0 %v5482_v6  ;;  %v395_v2 = vld [vmem:[%s8906_s1 + $0xae8] sm:$0xff]  ;;  %v5663_v6 = vcombine.low %v383_v55, %v387_v56  ;;  %v57_v55 = vld [vmem:[%s8906_s1 + $0x58] sm:$0xff] }
  0xd3   :  { %2604 = vmatpush1.bf16.msra.mxu1 %v5607_v8  ;;  %v5672_v8 = vcombine.high %v391_v1, %v395_v2 }
  0xd4   :  { %2686 = vmatpush1.bf16.msra.mxu0 %v5481_v9  ;;  %2605 = vmatprep.subr.bf16.mxu1 %v5616_v10  ;;  %v399_v9 = vld [vmem:[%s8906_s1 + $0xb08] sm:$0xff] }
  0xd5   :  { %2687 = vmatprep.subr.bf16.mxu0 %v5490_v14  ;;  %v403_v10 = vld [vmem:[%s8906_s1 + $0xb28] sm:$0xff]  ;;  %v5671_v14 = vcombine.low %v391_v1, %v395_v2  ;;  %v65_v1 = vld [vmem:[%s8906_s1 + $0x98] sm:$0xff] }
  0xd6   :  { %v69_v2 = vld [vmem:[%s8906_s1 + $0xb8] sm:$0xff] }
  0xd7   :  { %2606 = vmatpush1.bf16.msra.mxu1 %v5615_v17  ;;  %v5680_v17 = vcombine.high %v399_v9, %v403_v10 }
  0xd8   :  { %2688 = vmatpush1.bf16.msra.mxu0 %v5489_v18  ;;  %2607 = vmatprep.subr.bf16.mxu1 %v5624_v19  ;;  %v407_v18 = vld [vmem:[%s8906_s1 + $0xb48] sm:$0xff] }
  0xd9   :  { %2689 = vmatprep.subr.bf16.mxu0 %v5498_v24  ;;  %v411_v19 = vld [vmem:[%s8906_s1 + $0xb68] sm:$0xff]  ;;  %v5679_v24 = vcombine.low %v399_v9, %v403_v10  ;;  %v328_v9 = vld [vmem:[%s8906_s1 + $0x8d0] sm:$0xff] }
  0xda   :  { %v5687_v34 = vcombine.low %v407_v18, %v411_v19  ;;  %v332_v10 = vld [vmem:[%s8906_s1 + $0x8f0] sm:$0xff] }
  0xdb   :  { %2608 = vmatpush1.bf16.msra.mxu1 %v5623_v26  ;;  %v5688_v26 = vcombine.high %v407_v18, %v411_v19  ;;  %v336_v18 = vld [vmem:[%s8906_s1 + $0x910] sm:$0xff]  ;;  %v5610_v19 = vcombine.high %v328_v9, %v332_v10 }
  0xdc   :  { %2690 = vmatpush1.bf16.msra.mxu0 %v5497_v28  ;;  %2609 = vmatprep.subr.bf16.mxu1 %v5632_v29  ;;  %v415_v28 = vld [vmem:[%s8906_s1 + $0xb88] sm:$0xff] }
  0xdd   :  { %2691 = vmatprep.subr.bf16.mxu0 %v5506_v32  ;;  %v419_v29 = vld [vmem:[%s8906_s1 + $0xba8] sm:$0xff]  ;;  %v292_v32 = vld [vmem:[%s8906_s1 + $0x7b0] sm:$0xff] }
  0xde   :  { %v5570_v40 = vcombine.high %v288_v30, %v292_v32  ;;  %v5695_v42 = vcombine.low %v415_v28, %v419_v29  ;;  %v5569_v43 = vcombine.low %v288_v30, %v292_v32  ;;  %v101_v32 = vld [vmem:[%s8906_s1 + $0x1b8] sm:$0xff] }
  0xdf   :  { %2610 = vmatpush1.bf16.msra.mxu1 %v5631_v36  ;;  %v5696_v36 = vcombine.high %v415_v28, %v419_v29  ;;  %v348_v28 = vld [vmem:[%s8906_s1 + $0x970] sm:$0xff] }
  0xe0   :  { %2692 = vmatpush1.bf16.msra.mxu0 %v5505_v37  ;;  %2611 = vmatprep.subr.bf16.mxu1 %v5640_v38  ;;  %v423_v37 = vld [vmem:[%s8906_s1 + $0xbc8] sm:$0xff] }
  0xe1   :  { %2693 = vmatprep.subr.bf16.mxu0 %v5514_v41  ;;  %v427_v38 = vld [vmem:[%s8906_s1 + $0xbe8] sm:$0xff]  ;;  %v300_v41 = vld [vmem:[%s8906_s1 + $0x7f0] sm:$0xff] }
  0xe2   :  { %v5578_v48 = vcombine.high %v296_v39, %v300_v41  ;;  %v5703_v50 = vcombine.low %v423_v37, %v427_v38  ;;  %v5577_v51 = vcombine.low %v296_v39, %v300_v41  ;;  %v109_v41 = vld [vmem:[%s8906_s1 + $0x1f8] sm:$0xff] }
  0xe3   :  { %2612 = vmatpush1.bf16.msra.mxu1 %v5639_v44  ;;  %v5704_v44 = vcombine.high %v423_v37, %v427_v38  ;;  %v356_v37 = vld [vmem:[%s8906_s1 + $0x9b0] sm:$0xff] }
  0xe4   :  { %2694 = vmatpush1.bf16.msra.mxu0 %v5513_v45  ;;  %2613 = vmatprep.subr.bf16.mxu1 %v5648_v46  ;;  %v304_v45 = vld [vmem:[%s8906_s1 + $0x810] sm:$0xff] }
  0xe5   :  { %2695 = vmatprep.subr.bf16.mxu0 %v5522_v49  ;;  %v308_v46 = vld [vmem:[%s8906_s1 + $0x830] sm:$0xff]  ;;  %v53_v49 = vld [vmem:[%s8906_s1 + $0x38] sm:$0xff] }
  0xe6   :  { %v5586_v56 = vcombine.high %v304_v45, %v308_v46  ;;  %v5331_v59 = vcombine.low %v49_v47, %v53_v49  ;;  %v5585_v60 = vcombine.low %v304_v45, %v308_v46  ;;  %v364_v45 = vld [vmem:[%s8906_s1 + $0x9f0] sm:$0xff] }
  0xe7   :  { %2614 = vmatpush1.bf16.msra.mxu1 %v5647_v52  ;;  %v5332_v52 = vcombine.high %v49_v47, %v53_v49 }
  0xe8   :  { %2696 = vmatpush1.bf16.msra.mxu0 %v5521_v53  ;;  %2615 = vmatprep.subr.bf16.mxu1 %v5656_v54  ;;  %v312_v53 = vld [vmem:[%s8906_s1 + $0x850] sm:$0xff] }
  0xe9   :  { %2697 = vmatprep.subr.bf16.mxu0 %v5530_v58  ;;  %v316_v54 = vld [vmem:[%s8906_s1 + $0x870] sm:$0xff]  ;;  %v61_v58 = vld [vmem:[%s8906_s1 + $0x78] sm:$0xff] }
  0xea   :  { %v5594_v3 = vcombine.high %v312_v53, %v316_v54 }
  0xeb   :  { %2616 = vmatpush1.bf16.msra.mxu1 %v5655_v62  ;;  %v5340_v62 = vcombine.high %v57_v55, %v61_v58 }
  0xec   :  { %2698 = vmatpush1.bf16.msra.mxu0 %v5529_v63  ;;  %2617 = vmatprep.subr.bf16.mxu1 %v5664_v0  ;;  %v320_v63 = vld [vmem:[%s8906_s1 + $0x890] sm:$0xff] }
  0xed   :  { %2699 = vmatprep.subr.bf16.mxu0 %v5538_v4  ;;  %v324_v0 = vld [vmem:[%s8906_s1 + $0x8b0] sm:$0xff]  ;;  %v5339_v4 = vcombine.low %v57_v55, %v61_v58 }
  0xee   :  { %v5602_v11 = vcombine.high %v320_v63, %v324_v0  ;;  %v372_v58 = vld [vmem:[%s8906_s1 + $0xa30] sm:$0xff] }
  0xef   :  { %2618 = vmatpush1.bf16.msra.mxu1 %v5663_v6  ;;  %v77_v6 = vld [vmem:[%s8906_s1 + $0xf8] sm:$0xff] }
  0xf0   :  { %2700 = vmatpush1.bf16.msra.mxu0 %v5537_v7  ;;  %2619 = vmatprep.subr.bf16.mxu1 %v5672_v8  ;;  %v5593_v7 = vcombine.low %v312_v53, %v316_v54  ;;  %v5348_v8 = vcombine.high %v65_v1, %v69_v2  ;;  %v5355_v20 = vcombine.low %v73_v5, %v77_v6 }
  0xf1   :  { %2701 = vmatprep.subr.bf16.mxu0 %v5546_v12  ;;  %v5347_v12 = vcombine.low %v65_v1, %v69_v2  ;;  %v376_v2 = vld [vmem:[%s8906_s1 + $0xa50] sm:$0xff] }
  0xf3   :  { %2620 = vmatpush1.bf16.msra.mxu1 %v5671_v14  ;;  %v85_v14 = vld [vmem:[%s8906_s1 + $0x138] sm:$0xff] }
  0xf4   :  { %2702 = vmatpush1.bf16.msra.mxu0 %v5545_v15  ;;  %2621 = vmatprep.subr.bf16.mxu1 %v5680_v17  ;;  %v5601_v15 = vcombine.low %v320_v63, %v324_v0  ;;  %v5356_v17 = vcombine.high %v73_v5, %v77_v6  ;;  %v5363_v30 = vcombine.low %v81_v13, %v85_v14  ;;  %v125_v63 = vld [vmem:[%s8906_s1 + $0x278] sm:$0xff] }
  0xf5   :  { %2703 = vmatprep.subr.bf16.mxu0 %v5554_v22  ;;  %v89_v22 = vld [vmem:[%s8906_s1 + $0x158] sm:$0xff] }
  0xf6   :  { %v5371_v39 = vcombine.low %v89_v22, %v93_v23  ;;  %v129_v6 = vld [vmem:[%s8906_s1 + $0x298] sm:$0xff] }
  0xf7   :  { %2622 = vmatpush1.bf16.msra.mxu1 %v5679_v24  ;;  %v5609_v24 = vcombine.low %v328_v9, %v332_v10  ;;  %v384_v9 = vld [vmem:[%s8906_s1 + $0xa90] sm:$0xff] }
  0xf8   :  { %2704 = vmatpush1.bf16.msra.mxu0 %v5553_v25  ;;  %2623 = vmatprep.subr.bf16.mxu1 %v5688_v26  ;;  %v5364_v25 = vcombine.high %v81_v13, %v85_v14  ;;  %v344_v26 = vld [vmem:[%s8906_s1 + $0x950] sm:$0xff]  ;;  %v137_v14 = vld [vmem:[%s8906_s1 + $0x2d8] sm:$0xff] }
  0xf9   :  { %2705 = vmatprep.subr.bf16.mxu0 %v5562_v31  ;;  %v97_v31 = vld [vmem:[%s8906_s1 + $0x198] sm:$0xff]  ;;  %v5626_v38 = vcombine.high %v344_v26, %v348_v28  ;;  %v388_v10 = vld [vmem:[%s8906_s1 + $0xab0] sm:$0xff] }
  0xfb   :  { %2624 = vmatpush1.bf16.msra.mxu1 %v5687_v34 }
  0xfc   :  { %2706 = vmatpush1.bf16.msra.mxu0 %v5561_v35  ;;  %2625 = vmatprep.subr.bf16.mxu1 %v5696_v36  ;;  %v5372_v35 = vcombine.high %v89_v22, %v93_v23  ;;  %v352_v36 = vld [vmem:[%s8906_s1 + $0x990] sm:$0xff]  ;;  %v145_v23 = vld [vmem:[%s8906_s1 + $0x318] sm:$0xff] }
  0xfd   :  { %2707 = vmatprep.subr.bf16.mxu0 %v5570_v40  ;;  %v105_v40 = vld [vmem:[%s8906_s1 + $0x1d8] sm:$0xff]  ;;  %v5634_v47 = vcombine.high %v352_v36, %v356_v37  ;;  %v5633_v54 = vcombine.low %v352_v36, %v356_v37  ;;  %v408_v36 = vld [vmem:[%s8906_s1 + $0xb50] sm:$0xff] }
  0xfe   :  { %v5388_v55 = vcombine.high %v105_v40, %v109_v41  ;;  %v412_v37 = vld [vmem:[%s8906_s1 + $0xb70] sm:$0xff] }
  0xff   :  { %2626 = vmatpush1.bf16.msra.mxu1 %v5695_v42  ;;  %v5625_v42 = vcombine.low %v344_v26, %v348_v28  ;;  %v400_v26 = vld [vmem:[%s8906_s1 + $0xb10] sm:$0xff] }
 0x100   :  { %2708 = vmatpush1.bf16.msra.mxu0 %v5569_v43  ;;  %2627 = vmatprep.subr.bf16.mxu1 %v5704_v44  ;;  %v5380_v43 = vcombine.high %v97_v31, %v101_v32  ;;  %v360_v44 = vld [vmem:[%s8906_s1 + $0x9d0] sm:$0xff] }
 0x101   :  { %2709 = vmatprep.subr.bf16.mxu0 %v5578_v48  ;;  %v5641_v0 = vcombine.low %v360_v44, %v364_v45  ;;  %v404_v28 = vld [vmem:[%s8906_s1 + $0xb30] sm:$0xff] }
 0x103   :  { %2628 = vmatpush1.bf16.msra.mxu1 %v5703_v50  ;;  %v5379_v50 = vcombine.low %v97_v31, %v101_v32  ;;  %v153_v32 = vld [vmem:[%s8906_s1 + $0x358] sm:$0xff] }
 0x104   :  { %2710 = vmatpush1.bf16.msra.mxu0 %v5577_v51  ;;  %2761 = vmatprep.subr.bf16.mxu1 %v5332_v52  ;;  %v113_v51 = vld [vmem:[%s8906_s1 + $0x218] sm:$0xff] }
 0x105   :  { %2720 = vmatprep.subr.bf16.mxu0 %v5586_v56  ;;  %v117_v52 = vld [vmem:[%s8906_s1 + $0x238] sm:$0xff]  ;;  %v368_v56 = vld [vmem:[%s8906_s1 + $0xa10] sm:$0xff] }
 0x106   :  { %2630 = vmatmul.mubr.bf16.vlgmr.msra.gmra.mrb[4].mxu1 %v7079_v33  ;;  %v5396_v1 = vcombine.high %v113_v51, %v117_v52  ;;  %v5395_v5 = vcombine.low %v113_v51, %v117_v52  ;;  %v169_v51 = vld [vmem:[%s8906_s1 + $0x3d8] sm:$0xff]  ;;  %v5689_v52 = vcombine.low %v408_v36, %v412_v37 }
 0x107   :  { %2712 = vmatmul.mubr.bf16.vlgmr.msra.gmra.mrb[4].mxu0 %v6876_v21  ;;  %2762 = vmatpush1.bf16.msra.mxu1 %v5331_v59  ;;  %v5642_v59 = vcombine.high %v360_v44, %v364_v45  ;;  %v416_v44 = vld [vmem:[%s8906_s1 + $0xb90] sm:$0xff] }
 0x108   :  { %2721 = vmatpush1.bf16.msra.mxu0 %v5585_v60  ;;  %2763 = vmatprep.subr.bf16.mxu1 %v5340_v62  ;;  %v5387_v60 = vcombine.low %v105_v40, %v109_v41  ;;  %v121_v62 = vld [vmem:[%s8906_s1 + $0x258] sm:$0xff]  ;;  %v420_v45 = vld [vmem:[%s8906_s1 + $0xbb0] sm:$0xff] }
 0x109   :  { %2722 = vmatprep.subr.bf16.mxu0 %v5594_v3  ;;  %2752 = vmatprep.mubr.bf16.mxu0 %v6884_v27  ;;  %v380_v3 = vld [vmem:[%s8906_s1 + $0xa70] sm:$0xff]  ;;  %v5403_v13 = vcombine.low %v121_v62, %v125_v63  ;;  %v161_v41 = vld [vmem:[%s8906_s1 + $0x398] sm:$0xff] }
 0x10a   :  { %2793 = vmatprep.mubr.bf16.mxu1 %v6730_v57  ;;  %v340_v57 = vld [vmem:[%s8906_s1 + $0x930] sm:$0xff] }
 0x10b   :  { %2764 = vmatpush1.bf16.msra.mxu1 %v5339_v4  ;;  %v5618_v29 = vcombine.high %v336_v18, %v340_v57  ;;  %v5617_v34 = vcombine.low %v336_v18, %v340_v57  ;;  %v5650_v4 = vcombine.high %v368_v56, %v372_v58  ;;  %v392_v18 = vld [vmem:[%s8906_s1 + $0xad0] sm:$0xff] }
 0x10c   :  { %2723 = vmatpush1.bf16.msra.mxu0 %v5593_v7  ;;  %2765 = vmatprep.subr.bf16.mxu1 %v5348_v8  ;;  %v5649_v7 = vcombine.low %v368_v56, %v372_v58  ;;  %v5404_v8 = vcombine.high %v121_v62, %v125_v63  ;;  %v396_v57 = vld [vmem:[%s8906_s1 + $0xaf0] sm:$0xff]  ;;  %v173_v56 = vld [vmem:[%s8906_s1 + $0x3f8] sm:$0xff]  ;;  %v5698_v58 = vcombine.high %v416_v44, %v420_v45 }
 0x10d   :  { %2724 = vmatprep.subr.bf16.mxu0 %v5602_v11  ;;  %v133_v11 = vld [vmem:[%s8906_s1 + $0x2b8] sm:$0xff]  ;;  %v5452_v62 = vcombine.high %v169_v51, %v173_v56 }
 0x10e   :  { %v5411_v22 = vcombine.low %v129_v6, %v133_v11  ;;  %v177_v63 = vld [vmem:[%s8906_s1 + $0x418] sm:$0xff] }
 0x10f   :  { %2766 = vmatpush1.bf16.msra.mxu1 %v5347_v12  ;;  %v5658_v12 = vcombine.high %v376_v2, %v380_v3 }
 0x110   :  { %2725 = vmatpush1.bf16.msra.mxu0 %v5601_v15  ;;  %2767 = vmatprep.subr.bf16.mxu1 %v5356_v17  ;;  %v5657_v15 = vcombine.low %v376_v2, %v380_v3  ;;  %v5412_v17 = vcombine.high %v129_v6, %v133_v11  ;;  %v5451_v2 = vcombine.low %v169_v51, %v173_v56  ;;  %v185_v6 = vld [vmem:[%s8906_s1 + $0x458] sm:$0xff]  ;;  %v6107_v11 = vld [vmem:[%s8908_s3 + $0x24] ss:$16 sps:$4 sm:$0xff]  }
 0x111   :  { %2726 = vmatprep.subr.bf16.mxu0 %v5610_v19  ;;  %v141_v19 = vld [vmem:[%s8906_s1 + $0x2f8] sm:$0xff] }
 0x112   :  { %v5419_v31 = vcombine.low %v137_v14, %v141_v19 }
 0x113   :  { %2768 = vmatpush1.bf16.msra.mxu1 %v5355_v20  ;;  %v5666_v20 = vcombine.high %v384_v9, %v388_v10 }
 0x114   :  { %2727 = vmatpush1.bf16.msra.mxu0 %v5609_v24  ;;  %2769 = vmatprep.subr.bf16.mxu1 %v5364_v25  ;;  %v5665_v24 = vcombine.low %v384_v9, %v388_v10  ;;  %v5420_v25 = vcombine.high %v137_v14, %v141_v19  ;;  %v6102_v9 = vld [vmem:[%s8908_s3] ss:$16 sps:$4 sm:$0xff]   ;;  %v205_v19 = vld [vmem:[%s8906_s1 + $0x4f8] sm:$0xff] }
 0x115   :  { %2728 = vmatprep.subr.bf16.mxu0 %v5618_v29  ;;  %v149_v29 = vld [vmem:[%s8906_s1 + $0x338] sm:$0xff] }
 0x116   :  { %v5427_v40 = vcombine.low %v145_v23, %v149_v29 }
 0x117   :  { %2770 = vmatpush1.bf16.msra.mxu1 %v5363_v30  ;;  %v5674_v30 = vcombine.high %v392_v18, %v396_v57 }
 0x118   :  { %2729 = vmatpush1.bf16.msra.mxu0 %v5617_v34  ;;  %2771 = vmatprep.subr.bf16.mxu1 %v5372_v35  ;;  %v5673_v34 = vcombine.low %v392_v18, %v396_v57  ;;  %v5428_v35 = vcombine.high %v145_v23, %v149_v29  ;;  %v432_v18 = vlaneseq  ;;  %v6110_v57 = vld [vmem:[%s8908_s3 + $0x44] ss:$16 sps:$4 sm:$0xff]   ;;  %v6111_v29 = vld [vmem:[%s8908_s3 + $0x60] ss:$16 sps:$4 sm:$0xff]  }
 0x119   :  { %v7549_v46 = vpop.f32.mrb[0].mxu1  ;;  %2730 = vmatprep.subr.bf16.mxu0 %v5626_v38  ;;  %v157_v38 = vld [vmem:[%s8906_s1 + $0x378] sm:$0xff] }
 0x11a   :  { %v7551_v48 = vpop.f32.mrb[1].mxu1 }
 0x11b   :  { %v2430_v49 = vpop.f32.mrb[2].mxu1  ;;  %2772 = vmatpush1.bf16.msra.mxu1 %v5371_v39  ;;  %v5682_v39 = vcombine.high %v400_v26, %v404_v28 }
 0x11c   :  { %2731 = vmatpush1.bf16.msra.mxu0 %v5625_v42  ;;  %v2431_v53 = vpop.f32.mrb[3].mxu1  ;;  %2773 = vmatprep.subr.bf16.mxu1 %v5380_v43  ;;  %v5681_v42 = vcombine.low %v400_v26, %v404_v28  ;;  %v5436_v43 = vcombine.high %v153_v32, %v157_v38  ;;  %v5690_v49 = vcombine.high %v408_v36, %v412_v37  ;;  %v213_v26 = vld [vmem:[%s8906_s1 + $0x538] sm:$0xff]  ;;  %v7723_v36 = vld [vmem:[%s8909_s2] sm:$0xff] }
 0x11d   :  { %2732 = vmatprep.subr.bf16.mxu0 %v5634_v47  ;;  %v165_v47 = vld [vmem:[%s8906_s1 + $0x3b8] sm:$0xff] }
 0x11e   :  { %v5444_v53 = vcombine.high %v161_v41, %v165_v47 }
 0x11f   :  { %2774 = vmatpush1.bf16.msra.mxu1 %v5379_v50  ;;  %v5435_v50 = vcombine.low %v153_v32, %v157_v38  ;;  %v6116_v32 = vld [vmem:[%s8908_s3 + $0x84] ss:$16 sps:$4 sm:$0xff]  }
 0x120   :  { %2733 = vmatpush1.bf16.msra.mxu0 %v5633_v54  ;;  %2775 = vmatprep.subr.bf16.mxu1 %v5388_v55  ;;  %v424_v54 = vld [vmem:[%s8906_s1 + $0xbd0] sm:$0xff] }
 0x121   :  { %2734 = vmatprep.subr.bf16.mxu0 %v5642_v59  ;;  %v428_v55 = vld [vmem:[%s8906_s1 + $0xbf0] sm:$0xff]  ;;  %v5443_v59 = vcombine.low %v161_v41, %v165_v47 }
 0x122   :  { %v5705_v3 = vcombine.low %v424_v54, %v428_v55 }
 0x123   :  { %2776 = vmatpush1.bf16.msra.mxu1 %v5387_v60  ;;  %v5697_v60 = vcombine.low %v416_v44, %v420_v45  ;;  %v229_v44 = vld [vmem:[%s8906_s1 + $0x5b8] sm:$0xff] }
 0x124   :  { %2735 = vmatpush1.bf16.msra.mxu0 %v5641_v0  ;;  %2777 = vmatprep.subr.bf16.mxu1 %v5396_v1  ;;  %v5706_v0 = vcombine.high %v424_v54, %v428_v55  ;;  %v181_v1 = vld [vmem:[%s8906_s1 + $0x438] sm:$0xff] }
 0x125   :  { %2736 = vmatprep.subr.bf16.mxu0 %v5650_v4  ;;  %v5460_v4 = vcombine.high %v177_v63, %v181_v1  ;;  %v237_v54 = vld [vmem:[%s8906_s1 + $0x5f8] sm:$0xff] }
 0x127   :  { %2778 = vmatpush1.bf16.msra.mxu1 %v5395_v5  ;;  %v6104_v5 = vld [vmem:[%s8908_s3 + $0x4] ss:$16 sps:$4 sm:$0xff]  }
 0x128   :  { %2737 = vmatpush1.bf16.msra.mxu0 %v5649_v7  ;;  %2779 = vmatprep.subr.bf16.mxu1 %v5404_v8  ;;  %v189_v7 = vld [vmem:[%s8906_s1 + $0x478] sm:$0xff]  ;;  %v5459_v8 = vcombine.low %v177_v63, %v181_v1  ;;  %v6120_v63 = vld [vmem:[%s8908_s3 + $0xc0] ss:$16 sps:$4 sm:$0xff]  }
 0x129   :  { %2738 = vmatprep.subr.bf16.mxu0 %v5658_v12  ;;  %v5468_v10 = vcombine.high %v185_v6, %v189_v7  ;;  %v193_v12 = vld [vmem:[%s8906_s1 + $0x498] sm:$0xff]  ;;  %v5467_v14 = vcombine.low %v185_v6, %v189_v7  ;;  %v6123_v7 = vld [vmem:[%s8908_s3 + $0xe0] ss:$16 sps:$4 sm:$0xff]  }
 0x12b   :  { %2780 = vmatpush1.bf16.msra.mxu1 %v5403_v13  ;;  %v197_v13 = vld [vmem:[%s8906_s1 + $0x4b8] sm:$0xff] }
 0x12c   :  { %2739 = vmatpush1.bf16.msra.mxu0 %v5657_v15  ;;  %2781 = vmatprep.subr.bf16.mxu1 %v5412_v17  ;;  %v6105_v15 = vld [vmem:[%s8908_s3 + $0x20] ss:$16 sps:$4 sm:$0xff]   ;;  %v5476_v17 = vcombine.high %v193_v12, %v197_v13 }
 0x12d   :  { %2740 = vmatprep.subr.bf16.mxu0 %v5666_v20  ;;  %v5475_v20 = vcombine.low %v193_v12, %v197_v13 }
 0x12f   :  { %2782 = vmatpush1.bf16.msra.mxu1 %v5411_v22  ;;  %v6108_v22 = vld [vmem:[%s8908_s3 + $0x40] ss:$16 sps:$4 sm:$0xff]  }
 0x130   :  { %2741 = vmatpush1.bf16.msra.mxu0 %v5665_v24  ;;  %2783 = vmatprep.subr.bf16.mxu1 %v5420_v25  ;;  %v7694_v24 = vshrl.u32 %v432_v18, 7  ;;  %v6113_v25 = vld [vmem:[%s8908_s3 + $0x64] ss:$16 sps:$4 sm:$0xff]   ;;  %v257_v18 = vld [vmem:[%s8906_s1 + $0x698] sm:$0xff] }
 0x131   :  { %2742 = vmatprep.subr.bf16.mxu0 %v5674_v30 }
 0x132   :  { %v7726_v37 = vsub.s32 1, %v7694_v24 }
 0x133   :  { %2784 = vmatpush1.bf16.msra.mxu1 %v5419_v31  ;;  %v7709_v31 = vsub.s32 0, %v7694_v24 }
 0x134   :  { %2743 = vmatpush1.bf16.msra.mxu0 %v5673_v34  ;;  %2785 = vmatprep.subr.bf16.mxu1 %v5428_v35  ;;  %v217_v34 = vld [vmem:[%s8906_s1 + $0x558] sm:$0xff]  ;;  %v439_v45 = vrot.slane %v7723_v36, %v7726_v37 }
 0x135   :  { %2744 = vmatprep.subr.bf16.mxu0 %v5682_v39  ;;  %v221_v35 = vld [vmem:[%s8906_s1 + $0x578] sm:$0xff]  ;;  %v6114_v39 = vld [vmem:[%s8908_s3 + $0x80] ss:$16 sps:$4 sm:$0xff]   ;;  %v435_v41 = vrot.slane %v7723_v36, %v7709_v31 }
 0x136   :  { %v5499_v47 = vcombine.low %v217_v34, %v221_v35  ;;  %v2429_v55 = vadd.f32 %v7551_v48, %v439_v45  ;;  %v6125_v48 = vld [vmem:[%s8908_s3 + $0xe4] ss:$16 sps:$4 sm:$0xff]  }
 0x137   :  { %2786 = vmatpush1.bf16.msra.mxu1 %v5427_v40  ;;  %v5500_v40 = vcombine.high %v217_v34, %v221_v35  ;;  %v2427_v51 = vadd.f32 %v7549_v46, %v435_v41  ;;  %v6135_v35 = vld [vmem:[%s8908_s3 + $0x160] ss:$16 sps:$4 sm:$0xff]   ;;  %v285_v41 = vld [vmem:[%s8906_s1 + $0x778] sm:$0xff]  ;;  %v6143_v45 = vld [vmem:[%s8908_s3 + $0x1a4] ss:$16 sps:$4 sm:$0xff]  }
 0x138   :  { %2745 = vmatpush1.bf16.msra.mxu0 %v5681_v42  ;;  %2787 = vmatprep.subr.bf16.mxu1 %v5436_v43  ;;  %v6119_v42 = vld [vmem:[%s8908_s3 + $0xa4] ss:$16 sps:$4 sm:$0xff]   ;;  %v225_v43 = vld [vmem:[%s8906_s1 + $0x598] sm:$0xff] }
 0x139   :  { %2746 = vmatprep.subr.bf16.mxu0 %v5690_v49  ;;  %v6117_v49 = vld [vmem:[%s8908_s3 + $0xa0] ss:$16 sps:$4 sm:$0xff]   ;;  %v5507_v46 = vcombine.low %v225_v43, %v229_v44 }
 0x13b   :  { %2788 = vmatpush1.bf16.msra.mxu1 %v5435_v50  ;;  %v5508_v50 = vcombine.high %v225_v43, %v229_v44  ;;  %v6138_v43 = vld [vmem:[%s8908_s3 + $0x180] ss:$16 sps:$4 sm:$0xff]  }
 0x13c   :  { %2747 = vmatpush1.bf16.msra.mxu0 %v5689_v52  ;;  %2789 = vmatprep.subr.bf16.mxu1 %v5444_v53  ;;  %v6122_v52 = vld [vmem:[%s8908_s3 + $0xc4] ss:$16 sps:$4 sm:$0xff]   ;;  %v233_v53 = vld [vmem:[%s8906_s1 + $0x5d8] sm:$0xff] }
 0x13d   :  { %2748 = vmatprep.subr.bf16.mxu0 %v5698_v58 }
 0x13f   :  { %2790 = vmatpush1.bf16.msra.mxu1 %v5443_v59 }
 0x140   :  { %2749 = vmatpush1.bf16.msra.mxu0 %v5697_v60  ;;  %2791 = vmatprep.subr.bf16.mxu1 %v5452_v62 }
 0x141   :  { %2750 = vmatprep.subr.bf16.mxu0 %v5706_v0  ;;  %v5516_v0 = vcombine.high %v233_v53, %v237_v54 }
 0x143   :  { %2792 = vmatpush1.bf16.msra.mxu1 %v5451_v2 }
 0x144   :  { %2751 = vmatpush1.bf16.msra.mxu0 %v5705_v3  ;;  %2802 = vmatprep.subr.bf16.mxu1 %v5460_v4  ;;  %v241_v3 = vld [vmem:[%s8906_s1 + $0x618] sm:$0xff] }
 0x145   :  { %4466 = vmatprep.subr.bf16.mxu0 %v6104_v5  ;;  %v245_v4 = vld [vmem:[%s8906_s1 + $0x638] sm:$0xff]  ;;  %v5515_v5 = vcombine.low %v233_v53, %v237_v54  ;;  %v6146_v53 = vld [vmem:[%s8908_s3 + $0x1c4] ss:$16 sps:$4 sm:$0xff]  }
 0x146   :  { %2794 = vmatmul.mubr.bf16.vlgmr.msra.gmra.mrb[8].mxu1 %v6865_v16  ;;  %v201_v16 = vld [vmem:[%s8906_s1 + $0x4d8] sm:$0xff]  ;;  %v5523_v13 = vcombine.low %v241_v3, %v245_v4 }
 0x147   :  { %2753 = vmatmul.mubr.bf16.vlgmr.msra.gmra.mrb[4].mxu0 %v7079_v33  ;;  %2803 = vmatpush1.bf16.msra.mxu1 %v5459_v8  ;;  %v5484_v23 = vcombine.high %v201_v16, %v205_v19  ;;  %v5483_v28 = vcombine.low %v201_v16, %v205_v19  ;;  %v5524_v8 = vcombine.high %v241_v3, %v245_v4  ;;  %v6129_v19 = vld [vmem:[%s8908_s3 + $0x120] ss:$16 sps:$4 sm:$0xff]   ;;  %v297_v54 = vld [vmem:[%s8906_s1 + $0x7d8] sm:$0xff] }
 0x148   :  { %4467 = vmatpush1.bf16.msra.mxu0 %v6102_v9  ;;  %2804 = vmatprep.subr.bf16.mxu1 %v5468_v10  ;;  %v6128_v9 = vld [vmem:[%s8908_s3 + $0x104] ss:$16 sps:$4 sm:$0xff]   ;;  %v249_v10 = vld [vmem:[%s8906_s1 + $0x658] sm:$0xff] }
 0x149   :  { %4468 = vmatprep.subr.bf16.mxu0 %v6107_v11  ;;  %2834 = vmatprep.mubr.bf16.mxu1 %v6741_v61  ;;  %v209_v61 = vld [vmem:[%s8906_s1 + $0x518] sm:$0xff] }
 0x14a   :  { %v5492_v30 = vcombine.high %v209_v61, %v213_v26  ;;  %v5491_v38 = vcombine.low %v209_v61, %v213_v26  ;;  %v253_v11 = vld [vmem:[%s8906_s1 + $0x678] sm:$0xff]  ;;  %v6132_v26 = vld [vmem:[%s8908_s3 + $0x140] ss:$16 sps:$4 sm:$0xff]  }
 0x14b   :  { %2805 = vmatpush1.bf16.msra.mxu1 %v5467_v14  ;;  %v6126_v14 = vld [vmem:[%s8908_s3 + $0x100] ss:$16 sps:$4 sm:$0xff]   ;;  %v5531_v16 = vcombine.low %v249_v10, %v253_v11  ;;  %v313_v4 = vld [vmem:[%s8906_s1 + $0x858] sm:$0xff] }
 0x14c   :  { %4469 = vmatpush1.bf16.msra.mxu0 %v6105_v15  ;;  %2806 = vmatprep.subr.bf16.mxu1 %v5476_v17  ;;  %v5532_v15 = vcombine.high %v249_v10, %v253_v11  ;;  %v6131_v17 = vld [vmem:[%s8908_s3 + $0x124] ss:$16 sps:$4 sm:$0xff]   ;;  %v321_v10 = vld [vmem:[%s8906_s1 + $0x898] sm:$0xff] }
 0x14d   :  { %4470 = vmatprep.subr.bf16.mxu0 %v6110_v57  ;;  %v261_v57 = vld [vmem:[%s8906_s1 + $0x6b8] sm:$0xff] }
 0x14e   :  { %v5539_v61 = vcombine.low %v257_v18, %v261_v57  ;;  %v325_v11 = vld [vmem:[%s8906_s1 + $0x8b8] sm:$0xff] }
 0x14f   :  { %2807 = vmatpush1.bf16.msra.mxu1 %v5475_v20  ;;  %v5540_v20 = vcombine.high %v257_v18, %v261_v57  ;;  %v329_v18 = vld [vmem:[%s8906_s1 + $0x8d8] sm:$0xff] }
 0x150   :  { %4471 = vmatpush1.bf16.msra.mxu0 %v6108_v22  ;;  %2808 = vmatprep.subr.bf16.mxu1 %v5484_v23  ;;  %v6134_v22 = vld [vmem:[%s8908_s3 + $0x144] ss:$16 sps:$4 sm:$0xff]   ;;  %v265_v23 = vld [vmem:[%s8906_s1 + $0x6d8] sm:$0xff] }
 0x151   :  { %4472 = vmatprep.subr.bf16.mxu0 %v6113_v25  ;;  %v269_v25 = vld [vmem:[%s8906_s1 + $0x6f8] sm:$0xff] }
 0x152   :  { %v5547_v34 = vcombine.low %v265_v23, %v269_v25  ;;  %v333_v57 = vld [vmem:[%s8906_s1 + $0x8f8] sm:$0xff] }
 0x153   :  { %2809 = vmatpush1.bf16.msra.mxu1 %v5483_v28  ;;  %v5548_v28 = vcombine.high %v265_v23, %v269_v25  ;;  %v341_v23 = vld [vmem:[%s8906_s1 + $0x938] sm:$0xff]  ;;  %v5611_v25 = vcombine.low %v329_v18, %v333_v57 }
 0x154   :  { %4473 = vmatpush1.bf16.msra.mxu0 %v6111_v29  ;;  %2810 = vmatprep.subr.bf16.mxu1 %v5492_v30  ;;  %v6137_v29 = vld [vmem:[%s8908_s3 + $0x164] ss:$16 sps:$4 sm:$0xff]   ;;  %v273_v30 = vld [vmem:[%s8906_s1 + $0x718] sm:$0xff] }
 0x155   :  { %4474 = vmatprep.subr.bf16.mxu0 %v6116_v32  ;;  %v277_v32 = vld [vmem:[%s8906_s1 + $0x738] sm:$0xff] }
 0x157   :  { %2811 = vmatpush1.bf16.msra.mxu1 %v5491_v38  ;;  %v5556_v38 = vcombine.high %v273_v30, %v277_v32 }
 0x158   :  { %4475 = vmatpush1.bf16.msra.mxu0 %v6114_v39  ;;  %2812 = vmatprep.subr.bf16.mxu1 %v5500_v40  ;;  %v6140_v39 = vld [vmem:[%s8908_s3 + $0x184] ss:$16 sps:$4 sm:$0xff]   ;;  %v281_v40 = vld [vmem:[%s8906_s1 + $0x758] sm:$0xff] }
 0x159   :  { %4476 = vmatprep.subr.bf16.mxu0 %v6119_v42  ;;  %v5555_v42 = vcombine.low %v273_v30, %v277_v32  ;;  %v5564_v44 = vcombine.high %v281_v40, %v285_v41  ;;  %v6164_v30 = vld [vmem:[%s8908_s3 + $0x284] ss:$16 sps:$4 sm:$0xff]  }
 0x15a   :  { %v2508_v56 = vpop.f32.mrb[0].mxu0 }
 0x15b   :  { %v7758_v58 = vadd.f32 %v2508_v56, %v2427_v51  ;;  %v2510_v59 = vpop.f32.mrb[1].mxu0  ;;  %2813 = vmatpush1.bf16.msra.mxu1 %v5499_v47  ;;  %v289_v47 = vld [vmem:[%s8906_s1 + $0x798] sm:$0xff]  ;;  %v6141_v51 = vld [vmem:[%s8908_s3 + $0x1a0] ss:$16 sps:$4 sm:$0xff]  }
 0x15c   :  { %v6033_v60 = vadd.f32 %v2510_v59, %v2429_v55  ;;  %v2512_v62 = vpop.f32.mrb[2].mxu0  ;;  %4477 = vmatpush1.bf16.msra.mxu0 %v6117_v49  ;;  %2814 = vmatprep.subr.bf16.mxu1 %v5508_v50  ;;  %v293_v49 = vld [vmem:[%s8906_s1 + $0x7b8] sm:$0xff]  ;;  %v5563_v50 = vcombine.low %v281_v40, %v285_v41  ;;  %v6144_v59 = vld [vmem:[%s8908_s3 + $0x1c0] ss:$16 sps:$4 sm:$0xff]   ;;  %v6167_v40 = vld [vmem:[%s8908_s3 + $0x2a4] ss:$16 sps:$4 sm:$0xff]  }
 0x15d   :  { %v2513_v1 = vpop.f32.mrb[3].mxu0  ;;  %4478 = vmatprep.subr.bf16.mxu0 %v6122_v52  ;;  %v5572_v52 = vcombine.high %v289_v47, %v293_v49  ;;  %v301_v55 = vld [vmem:[%s8906_s1 + $0x7f8] sm:$0xff]  ;;  %v5571_v56 = vcombine.low %v289_v47, %v293_v49  ;;  %v6149_v62 = vld [vmem:[%s8908_s3 + $0x1e4] ss:$16 sps:$4 sm:$0xff]  }
 0x15e   :  { %v2885_v2 = vmul.f32 0.2, %v6033_v60  ;;  %v5579_v1 = vcombine.low %v297_v54, %v301_v55  ;;  %v6170_v47 = vld [vmem:[%s8908_s3 + $0x2c4] ss:$16 sps:$4 sm:$0xff]  }
 0x15f   :  { %2815 = vmatpush1.bf16.msra.mxu1 %v5507_v46  ;;  %v5580_v46 = vcombine.high %v297_v54, %v301_v55  ;;  %v6173_v54 = vld [vmem:[%s8908_s3 + $0x2e4] ss:$16 sps:$4 sm:$0xff]  }
 0x160   :  { %v2893_v6 = vmax.f32 %v6033_v60, %v2885_v2  ;;  %4479 = vmatpush1.bf16.msra.mxu0 %v6120_v63  ;;  %2816 = vmatprep.subr.bf16.mxu1 %v5516_v0  ;;  %v2884_v60 = vmul.f32 0.2, %v7758_v58  ;;  %v305_v63 = vld [vmem:[%s8906_s1 + $0x818] sm:$0xff] }
 0x161   :  { %4480 = vmatprep.subr.bf16.mxu0 %v6125_v48  ;;  %v309_v0 = vld [vmem:[%s8906_s1 + $0x838] sm:$0xff]  ;;  %v6147_v48 = vld [vmem:[%s8908_s3 + $0x1e0] ss:$16 sps:$4 sm:$0xff]  }
 0x162   :  { %v7784_v12 = vpack.c.bf16 %v2893_v6, %v2893_v6  ;;  %v5588_v2 = vcombine.high %v305_v63, %v309_v0  ;;  %v2892_v3 = vmax.f32 %v7758_v58, %v2884_v60  ;;  %v6152_v6 = vld [vmem:[%s8908_s3 + $0x204] ss:$16 sps:$4 sm:$0xff]   ;;  %v6150_v58 = vld [vmem:[%s8908_s3 + $0x200] ss:$16 sps:$4 sm:$0xff]   ;;  %v381_v60 = vld [vmem:[%s8906_s1 + $0xa78] sm:$0xff] }
 0x163   :  { %2817 = vmatpush1.bf16.msra.mxu1 %v5515_v5  ;;  %v317_v5 = vld [vmem:[%s8906_s1 + $0x878] sm:$0xff] }
 0x164   :  { %4481 = vmatpush1.bf16.msra.mxu0 %v6123_v7  ;;  %4498 = vmatprep.mubr.bf16.mxu0 %v7784_v12  ;;  %v5587_v7 = vcombine.low %v305_v63, %v309_v0 }
 0x165   :  { %2818 = vmatprep.subr.bf16.mxu1 %v5524_v8  ;;  %4482 = vmatprep.subr.bf16.mxu0 %v6128_v9  ;;  %v5596_v8 = vcombine.high %v313_v4, %v317_v5  ;;  %v7888_v9 = vpack.c.bf16 %v2892_v3, %v2892_v3  ;;  %v6182_v3 = vld [vmem:[%s8908_s3 + $0x324] ss:$16 sps:$4 sm:$0xff]  }
 0x167   :  { %2819 = vmatpush1.bf16.msra.mxu1 %v5523_v13  ;;  %v6155_v13 = vld [vmem:[%s8908_s3 + $0x224] ss:$16 sps:$4 sm:$0xff]  }
 0x168   :  { %4483 = vmatpush1.bf16.msra.mxu0 %v6126_v14  ;;  %2820 = vmatprep.subr.bf16.mxu1 %v5532_v15  ;;  %v5595_v14 = vcombine.low %v313_v4, %v317_v5  ;;  %v5604_v15 = vcombine.high %v321_v10, %v325_v11 }
 0x169   :  { %4484 = vmatprep.subr.bf16.mxu0 %v6131_v17  ;;  %v6153_v17 = vld [vmem:[%s8908_s3 + $0x220] ss:$16 sps:$4 sm:$0xff]  }
 0x16b   :  { %2821 = vmatpush1.bf16.msra.mxu1 %v5531_v16  ;;  %v5603_v16 = vcombine.low %v321_v10, %v325_v11 }
 0x16c   :  { %4485 = vmatpush1.bf16.msra.mxu0 %v6129_v19  ;;  %2822 = vmatprep.subr.bf16.mxu1 %v5540_v20  ;;  %v5612_v19 = vcombine.high %v329_v18, %v333_v57  ;;  %v6156_v20 = vld [vmem:[%s8908_s3 + $0x240] ss:$16 sps:$4 sm:$0xff]  }
 0x16d   :  { %4486 = vmatprep.subr.bf16.mxu0 %v6134_v22  ;;  %v337_v22 = vld [vmem:[%s8906_s1 + $0x918] sm:$0xff] }
 0x16e   :  { %v5619_v32 = vcombine.low %v337_v22, %v341_v23 }
 0x16f   :  { %2823 = vmatpush1.bf16.msra.mxu1 %v5539_v61  ;;  %v5620_v61 = vcombine.high %v337_v22, %v341_v23 }
 0x170   :  { %4487 = vmatpush1.bf16.msra.mxu0 %v6132_v26  ;;  %2824 = vmatprep.subr.bf16.mxu1 %v5548_v28  ;;  %v6159_v26 = vld [vmem:[%s8908_s3 + $0x260] ss:$16 sps:$4 sm:$0xff]   ;;  %v345_v28 = vld [vmem:[%s8906_s1 + $0x958] sm:$0xff] }
 0x171   :  { %4488 = vmatprep.subr.bf16.mxu0 %v6137_v29  ;;  %v349_v29 = vld [vmem:[%s8906_s1 + $0x978] sm:$0xff] }
 0x172   :  { %v5627_v41 = vcombine.low %v345_v28, %v349_v29 }
 0x173   :  { %2825 = vmatpush1.bf16.msra.mxu1 %v5547_v34  ;;  %v5628_v34 = vcombine.high %v345_v28, %v349_v29 }
 0x174   :  { %4489 = vmatpush1.bf16.msra.mxu0 %v6135_v35  ;;  %2826 = vmatprep.subr.bf16.mxu1 %v5556_v38  ;;  %v6162_v35 = vld [vmem:[%s8908_s3 + $0x280] ss:$16 sps:$4 sm:$0xff]   ;;  %v353_v38 = vld [vmem:[%s8906_s1 + $0x998] sm:$0xff] }
 0x175   :  { %4490 = vmatprep.subr.bf16.mxu0 %v6140_v39  ;;  %v357_v39 = vld [vmem:[%s8906_s1 + $0x9b8] sm:$0xff] }
 0x176   :  { %v5635_v49 = vcombine.low %v353_v38, %v357_v39 }
 0x177   :  { %2827 = vmatpush1.bf16.msra.mxu1 %v5555_v42  ;;  %v5636_v42 = vcombine.high %v353_v38, %v357_v39 }
 0x178   :  { %4491 = vmatpush1.bf16.msra.mxu0 %v6138_v43  ;;  %2828 = vmatprep.subr.bf16.mxu1 %v5564_v44  ;;  %v6165_v43 = vld [vmem:[%s8908_s3 + $0x2a0] ss:$16 sps:$4 sm:$0xff]   ;;  %v361_v44 = vld [vmem:[%s8906_s1 + $0x9d8] sm:$0xff] }
 0x179   :  { %4492 = vmatprep.subr.bf16.mxu0 %v6143_v45  ;;  %v365_v45 = vld [vmem:[%s8906_s1 + $0x9f8] sm:$0xff] }
 0x17a   :  { %v5643_v55 = vcombine.low %v361_v44, %v365_v45 }
 0x17b   :  { %2829 = vmatpush1.bf16.msra.mxu1 %v5563_v50  ;;  %v5644_v50 = vcombine.high %v361_v44, %v365_v45  ;;  %v6216_v44 = vld [vmem:[%s8908_s3 + $0x3e0] ss:$16 sps:$4 sm:$0xff]   ;;  %v6224_v45 = vld [vmem:[%s8908_s3 + $0x404] ss:$16 sps:$4 sm:$0xff]  }
 0x17c   :  { %4493 = vmatpush1.bf16.msra.mxu0 %v6141_v51  ;;  %2830 = vmatprep.subr.bf16.mxu1 %v5572_v52  ;;  %v6168_v51 = vld [vmem:[%s8908_s3 + $0x2c0] ss:$16 sps:$4 sm:$0xff]   ;;  %v369_v52 = vld [vmem:[%s8906_s1 + $0xa18] sm:$0xff] }
 0x17d   :  { %4494 = vmatprep.subr.bf16.mxu0 %v6146_v53  ;;  %v373_v53 = vld [vmem:[%s8906_s1 + $0xa38] sm:$0xff] }
 0x17e   :  { %v5651_v63 = vcombine.low %v369_v52, %v373_v53 }
 0x17f   :  { %2831 = vmatpush1.bf16.msra.mxu1 %v5571_v56  ;;  %v5652_v56 = vcombine.high %v369_v52, %v373_v53  ;;  %v6189_v52 = vld [vmem:[%s8908_s3 + $0x48] ss:$16 sps:$4 sm:$0xff]   ;;  %v6203_v53 = vld [vmem:[%s8908_s3 + $0x8c] ss:$16 sps:$4 sm:$0xff]  }
 0x180   :  { %4495 = vmatpush1.bf16.msra.mxu0 %v6144_v59  ;;  %2832 = vmatprep.subr.bf16.mxu1 %v5580_v46  ;;  %v6171_v59 = vld [vmem:[%s8908_s3 + $0x2e0] ss:$16 sps:$4 sm:$0xff]   ;;  %v377_v46 = vld [vmem:[%s8906_s1 + $0xa58] sm:$0xff] }
 0x181   :  { %4496 = vmatprep.subr.bf16.mxu0 %v6149_v62  ;;  %v6176_v62 = vld [vmem:[%s8908_s3 + $0x304] ss:$16 sps:$4 sm:$0xff]   ;;  %v5660_v0 = vcombine.high %v377_v46, %v381_v60  ;;  %v5659_v4 = vcombine.low %v377_v46, %v381_v60 }
 0x183   :  { %2833 = vmatpush1.bf16.msra.mxu1 %v5579_v1  ;;  %v6174_v1 = vld [vmem:[%s8908_s3 + $0x300] ss:$16 sps:$4 sm:$0xff]  }
 0x184   :  { %4497 = vmatpush1.bf16.msra.mxu0 %v6147_v48  ;;  %2843 = vmatprep.subr.bf16.mxu1 %v5588_v2  ;;  %v385_v48 = vld [vmem:[%s8906_s1 + $0xa98] sm:$0xff] }
 0x185   :  { %4507 = vmatprep.subr.bf16.mxu0 %v6152_v6  ;;  %v389_v2 = vld [vmem:[%s8906_s1 + $0xab8] sm:$0xff]  ;;  %v6180_v6 = vld [vmem:[%s8908_s3 + $0x320] ss:$16 sps:$4 sm:$0xff]  }
 0x186   :  { %2835 = vmatmul.mubr.bf16.vlgmr.msra.gmra.mrb[8].mxu1 %v6876_v21  ;;  %v6158_v21 = vld [vmem:[%s8908_s3 + $0x244] ss:$16 sps:$4 sm:$0xff]   ;;  %v5668_v5 = vcombine.high %v385_v48, %v389_v2  ;;  %v5667_v10 = vcombine.low %v385_v48, %v389_v2 }
 0x187   :  { %4499 = vmatmul.mubr.bf16.vlgmr.msra.gmra.mrb[8].mxu0 %v7888_v9  ;;  %2844 = vmatpush1.bf16.msra.mxu1 %v5587_v7  ;;  %v393_v7 = vld [vmem:[%s8906_s1 + $0xad8] sm:$0xff] }
 0x188   :  { %2845 = vmatprep.subr.bf16.mxu1 %v5596_v8  ;;  %4508 = vmatpush1.bf16.msra.mxu0 %v6150_v58  ;;  %v397_v8 = vld [vmem:[%s8906_s1 + $0xaf8] sm:$0xff]  ;;  %v6188_v58 = vld [vmem:[%s8908_s3 + $0x344] ss:$16 sps:$4 sm:$0xff]  }
 0x189   :  { %4509 = vmatprep.subr.bf16.mxu0 %v6155_v13  ;;  %2875 = vmatprep.mubr.bf16.mxu1 %v6884_v27  ;;  %v6161_v27 = vld [vmem:[%s8908_s3 + $0x264] ss:$16 sps:$4 sm:$0xff]   ;;  %v5676_v11 = vcombine.high %v393_v7, %v397_v8  ;;  %v6186_v13 = vld [vmem:[%s8908_s3 + $0x340] ss:$16 sps:$4 sm:$0xff]   ;;  %v5675_v18 = vcombine.low %v393_v7, %v397_v8  ;;  %v6221_v7 = vld [vmem:[%s8908_s3 + $0xec] ss:$16 sps:$4 sm:$0xff]  }
 0x18b   :  { %2846 = vmatpush1.bf16.msra.mxu1 %v5595_v14  ;;  %v401_v14 = vld [vmem:[%s8906_s1 + $0xb18] sm:$0xff] }
 0x18c   :  { %2847 = vmatprep.subr.bf16.mxu1 %v5604_v15  ;;  %4510 = vmatpush1.bf16.msra.mxu0 %v6153_v17  ;;  %v405_v15 = vld [vmem:[%s8906_s1 + $0xb38] sm:$0xff]  ;;  %v6194_v17 = vld [vmem:[%s8908_s3 + $0x364] ss:$16 sps:$4 sm:$0xff]  }
 0x18d   :  { %4511 = vmatprep.subr.bf16.mxu0 %v6158_v21  ;;  %v5684_v57 = vcombine.high %v401_v14, %v405_v15  ;;  %v6192_v21 = vld [vmem:[%s8908_s3 + $0x360] ss:$16 sps:$4 sm:$0xff]   ;;  %v5683_v22 = vcombine.low %v401_v14, %v405_v15 }
 0x18e   :  { %v6222_v15 = vld [vmem:[%s8908_s3 + $0x400] ss:$16 sps:$4 sm:$0xff]  }
 0x18f   :  { %2848 = vmatpush1.bf16.msra.mxu1 %v5603_v16  ;;  %v409_v16 = vld [vmem:[%s8906_s1 + $0xb58] sm:$0xff] }
 0x190   :  { %2849 = vmatprep.subr.bf16.mxu1 %v5612_v19  ;;  %4512 = vmatpush1.bf16.msra.mxu0 %v6156_v20  ;;  %v413_v19 = vld [vmem:[%s8906_s1 + $0xb78] sm:$0xff]  ;;  %v6200_v20 = vld [vmem:[%s8908_s3 + $0x384] ss:$16 sps:$4 sm:$0xff]  }
 0x191   :  { %4513 = vmatprep.subr.bf16.mxu0 %v6161_v27  ;;  %v5692_v23 = vcombine.high %v409_v16, %v413_v19  ;;  %v6198_v27 = vld [vmem:[%s8908_s3 + $0x380] ss:$16 sps:$4 sm:$0xff]   ;;  %v5691_v28 = vcombine.low %v409_v16, %v413_v19  ;;  %v6236_v19 = vld [vmem:[%s8908_s3 + $0x444] ss:$16 sps:$4 sm:$0xff]  }
 0x192   :  { %v6228_v16 = vld [vmem:[%s8908_s3 + $0x420] ss:$16 sps:$4 sm:$0xff]  }
 0x193   :  { %2850 = vmatpush1.bf16.msra.mxu1 %v5611_v25  ;;  %v417_v25 = vld [vmem:[%s8906_s1 + $0xb98] sm:$0xff] }
 0x194   :  { %2851 = vmatprep.subr.bf16.mxu1 %v5620_v61  ;;  %4514 = vmatpush1.bf16.msra.mxu0 %v6159_v26  ;;  %v421_v61 = vld [vmem:[%s8906_s1 + $0xbb8] sm:$0xff]  ;;  %v6206_v26 = vld [vmem:[%s8908_s3 + $0x3a4] ss:$16 sps:$4 sm:$0xff]  }
 0x195   :  { %4515 = vmatprep.subr.bf16.mxu0 %v6164_v30  ;;  %v5700_v29 = vcombine.high %v417_v25, %v421_v61  ;;  %v6204_v30 = vld [vmem:[%s8908_s3 + $0x3a0] ss:$16 sps:$4 sm:$0xff]   ;;  %v5699_v38 = vcombine.low %v417_v25, %v421_v61  ;;  %v6237_v25 = vld [vmem:[%s8908_s3 + $0x148] ss:$16 sps:$4 sm:$0xff]   ;;  %v6245_v61 = vld [vmem:[%s8908_s3 + $0x16c] ss:$16 sps:$4 sm:$0xff]  }
 0x197   :  { %2852 = vmatpush1.bf16.msra.mxu1 %v5619_v32  ;;  %v425_v32 = vld [vmem:[%s8906_s1 + $0xbd8] sm:$0xff] }
 0x198   :  { %2853 = vmatprep.subr.bf16.mxu1 %v5628_v34  ;;  %4516 = vmatpush1.bf16.msra.mxu0 %v6162_v35  ;;  %v429_v34 = vld [vmem:[%s8906_s1 + $0xbf8] sm:$0xff]  ;;  %v6212_v35 = vld [vmem:[%s8908_s3 + $0x3c4] ss:$16 sps:$4 sm:$0xff]  }
 0x199   :  { %4517 = vmatprep.subr.bf16.mxu0 %v6167_v40  ;;  %v5708_v39 = vcombine.high %v425_v32, %v429_v34  ;;  %v6210_v40 = vld [vmem:[%s8908_s3 + $0x3c0] ss:$16 sps:$4 sm:$0xff]  }
 0x19b   :  { %2854 = vmatpush1.bf16.msra.mxu1 %v5627_v41  ;;  %v6218_v41 = vld [vmem:[%s8908_s3 + $0x3e4] ss:$16 sps:$4 sm:$0xff]  }
 0x19c   :  { %2855 = vmatprep.subr.bf16.mxu1 %v5636_v42  ;;  %4518 = vmatpush1.bf16.msra.mxu0 %v6165_v43  ;;  %v5707_v42 = vcombine.low %v425_v32, %v429_v34  ;;  %v6179_v43 = vld [vmem:[%s8908_s3 + $0xc] ss:$16 sps:$4 sm:$0xff]   ;;  %v6246_v32 = vld [vmem:[%s8908_s3 + $0x480] ss:$16 sps:$4 sm:$0xff]   ;;  %v6254_v34 = vld [vmem:[%s8908_s3 + $0x4a4] ss:$16 sps:$4 sm:$0xff]  }
 0x19d   :  { %4519 = vmatprep.subr.bf16.mxu0 %v6170_v47  ;;  %v6177_v47 = vld [vmem:[%s8908_s3 + $0x8] ss:$16 sps:$4 sm:$0xff]  }
 0x19f   :  { %2856 = vmatpush1.bf16.msra.mxu1 %v5635_v49  ;;  %v6185_v49 = vld [vmem:[%s8908_s3 + $0x2c] ss:$16 sps:$4 sm:$0xff]  }
 0x1a0   :  { %2857 = vmatprep.subr.bf16.mxu1 %v5644_v50  ;;  %4520 = vmatpush1.bf16.msra.mxu0 %v6168_v51  ;;  %v6183_v50 = vld [vmem:[%s8908_s3 + $0x28] ss:$16 sps:$4 sm:$0xff]   ;;  %v6191_v51 = vld [vmem:[%s8908_s3 + $0x4c] ss:$16 sps:$4 sm:$0xff]  }
 0x1a1   :  { %4521 = vmatprep.subr.bf16.mxu0 %v6173_v54  ;;  %v442_v54 = vsub.s32 2, %v7694_v24 }
 0x1a3   :  { %2858 = vmatpush1.bf16.msra.mxu1 %v5643_v55  ;;  %v6201_v55 = vld [vmem:[%s8908_s3 + $0x88] ss:$16 sps:$4 sm:$0xff]   ;;  %v443_v46 = vrot.slane %v7723_v36, %v442_v54 }
 0x1a4   :  { %2859 = vmatprep.subr.bf16.mxu1 %v5652_v56  ;;  %4522 = vmatpush1.bf16.msra.mxu0 %v6171_v59  ;;  %v446_v56 = vsub.s32 3, %v7694_v24  ;;  %v6209_v59 = vld [vmem:[%s8908_s3 + $0xac] ss:$16 sps:$4 sm:$0xff]  }
 0x1a5   :  { %4523 = vmatprep.subr.bf16.mxu0 %v6176_v62  ;;  %v6207_v62 = vld [vmem:[%s8908_s3 + $0xa8] ss:$16 sps:$4 sm:$0xff]  }
 0x1a6   :  { %v447_v60 = vrot.slane %v7723_v36, %v446_v56 }
 0x1a7   :  { %2860 = vmatpush1.bf16.msra.mxu1 %v5651_v63  ;;  %v6215_v63 = vld [vmem:[%s8908_s3 + $0xcc] ss:$16 sps:$4 sm:$0xff]  }
 0x1a8   :  { %2861 = vmatprep.subr.bf16.mxu1 %v5660_v0  ;;  %4524 = vmatpush1.bf16.msra.mxu0 %v6174_v1 }
 0x1a9   :  { %4525 = vmatprep.subr.bf16.mxu0 %v6182_v3 }
 0x1ab   :  { %2862 = vmatpush1.bf16.msra.mxu1 %v5659_v4  ;;  %v6213_v4 = vld [vmem:[%s8908_s3 + $0xc8] ss:$16 sps:$4 sm:$0xff]  }
 0x1ac   :  { %2863 = vmatprep.subr.bf16.mxu1 %v5668_v5  ;;  %4526 = vmatpush1.bf16.msra.mxu0 %v6180_v6 }
 0x1ad   :  { %4527 = vmatprep.subr.bf16.mxu0 %v6188_v58 }
 0x1af   :  { %2864 = vmatpush1.bf16.msra.mxu1 %v5667_v10 }
 0x1b0   :  { %2865 = vmatprep.subr.bf16.mxu1 %v5676_v11  ;;  %4528 = vmatpush1.bf16.msra.mxu0 %v6186_v13  ;;  %v6219_v11 = vld [vmem:[%s8908_s3 + $0xe8] ss:$16 sps:$4 sm:$0xff]   ;;  %v6227_v13 = vld [vmem:[%s8908_s3 + $0x10c] ss:$16 sps:$4 sm:$0xff]  }
 0x1b1   :  { %4529 = vmatprep.subr.bf16.mxu0 %v6194_v17 }
 0x1b3   :  { %2866 = vmatpush1.bf16.msra.mxu1 %v5675_v18  ;;  %v6230_v18 = vld [vmem:[%s8908_s3 + $0x424] ss:$16 sps:$4 sm:$0xff]  }
 0x1b4   :  { %2867 = vmatprep.subr.bf16.mxu1 %v5684_v57  ;;  %4530 = vmatpush1.bf16.msra.mxu0 %v6192_v21  ;;  %v6225_v57 = vld [vmem:[%s8908_s3 + $0x108] ss:$16 sps:$4 sm:$0xff]   ;;  %v6233_v21 = vld [vmem:[%s8908_s3 + $0x12c] ss:$16 sps:$4 sm:$0xff]  }
 0x1b5   :  { %4531 = vmatprep.subr.bf16.mxu0 %v6200_v20  ;;  %v6231_v20 = vld [vmem:[%s8908_s3 + $0x128] ss:$16 sps:$4 sm:$0xff]  }
 0x1b7   :  { %2868 = vmatpush1.bf16.msra.mxu1 %v5683_v22  ;;  %v6239_v22 = vld [vmem:[%s8908_s3 + $0x14c] ss:$16 sps:$4 sm:$0xff]  }
 0x1b8   :  { %2869 = vmatprep.subr.bf16.mxu1 %v5692_v23  ;;  %4532 = vmatpush1.bf16.msra.mxu0 %v6198_v27  ;;  %v6234_v23 = vld [vmem:[%s8908_s3 + $0x440] ss:$16 sps:$4 sm:$0xff]   ;;  %v6242_v27 = vld [vmem:[%s8908_s3 + $0x464] ss:$16 sps:$4 sm:$0xff]  }
 0x1b9   :  { %4533 = vmatprep.subr.bf16.mxu0 %v6206_v26  ;;  %v6240_v26 = vld [vmem:[%s8908_s3 + $0x460] ss:$16 sps:$4 sm:$0xff]  }
 0x1bb   :  { %2870 = vmatpush1.bf16.msra.mxu1 %v5691_v28  ;;  %v6248_v28 = vld [vmem:[%s8908_s3 + $0x484] ss:$16 sps:$4 sm:$0xff]  }
 0x1bc   :  { %2871 = vmatprep.subr.bf16.mxu1 %v5700_v29  ;;  %4534 = vmatpush1.bf16.msra.mxu0 %v6204_v30  ;;  %v6243_v29 = vld [vmem:[%s8908_s3 + $0x168] ss:$16 sps:$4 sm:$0xff]   ;;  %v6251_v30 = vld [vmem:[%s8908_s3 + $0x18c] ss:$16 sps:$4 sm:$0xff]  }
 0x1bd   :  { %4535 = vmatprep.subr.bf16.mxu0 %v6212_v35  ;;  %v6249_v35 = vld [vmem:[%s8908_s3 + $0x188] ss:$16 sps:$4 sm:$0xff]  }
 0x1bf   :  { %2872 = vmatpush1.bf16.msra.mxu1 %v5699_v38  ;;  %v6257_v38 = vld [vmem:[%s8908_s3 + $0x1ac] ss:$16 sps:$4 sm:$0xff]  }
 0x1c0   :  { %2873 = vmatprep.subr.bf16.mxu1 %v5708_v39  ;;  %4536 = vmatpush1.bf16.msra.mxu0 %v6210_v40  ;;  %v6252_v39 = vld [vmem:[%s8908_s3 + $0x4a0] ss:$16 sps:$4 sm:$0xff]   ;;  %v6260_v40 = vld [vmem:[%s8908_s3 + $0x4c4] ss:$16 sps:$4 sm:$0xff]  }
 0x1c1   :  { %4537 = vmatprep.subr.bf16.mxu0 %v6218_v41  ;;  %v6255_v41 = vld [vmem:[%s8908_s3 + $0x1a8] ss:$16 sps:$4 sm:$0xff]  }
 0x1c3   :  { %2874 = vmatpush1.bf16.msra.mxu1 %v5707_v42  ;;  %v6263_v42 = vld [vmem:[%s8908_s3 + $0x1cc] ss:$16 sps:$4 sm:$0xff]  }
 0x1c4   :  { %4630 = vmatprep.subr.bf16.mxu1 %v6179_v43  ;;  %4538 = vmatpush1.bf16.msra.mxu0 %v6216_v44  ;;  %v6258_v43 = vld [vmem:[%s8908_s3 + $0x4c0] ss:$16 sps:$4 sm:$0xff]   ;;  %v6266_v44 = vld [vmem:[%s8908_s3 + $0x4e4] ss:$16 sps:$4 sm:$0xff]  }
 0x1c5   :  { %4548 = vmatprep.subr.bf16.mxu0 %v6224_v45  ;;  %v6261_v45 = vld [vmem:[%s8908_s3 + $0x1c8] ss:$16 sps:$4 sm:$0xff]  }
 0x1c6   :  { %2876 = vmatmul.mubr.bf16.vlgmr.msra.gmra.mrb[8].mxu1 %v7079_v33  ;;  %v6197_v33 = vld [vmem:[%s8908_s3 + $0x6c] ss:$16 sps:$4 sm:$0xff]  }
 0x1c7   :  { %4631 = vmatpush1.bf16.msra.mxu1 %v6177_v47  ;;  %4662 = vmatprep.mubr.bf16.mxu1 %v7784_v12  ;;  %v6195_v12 = vld [vmem:[%s8908_s3 + $0x68] ss:$16 sps:$4 sm:$0xff]   ;;  %v6269_v47 = vld [vmem:[%s8908_s3 + $0x1ec] ss:$16 sps:$4 sm:$0xff]  }
 0x1c8   :  { %4632 = vmatprep.subr.bf16.mxu1 %v6185_v49  ;;  %v6264_v49 = vld [vmem:[%s8908_s3 + $0x4e0] ss:$16 sps:$4 sm:$0xff]  }
 0x1cb   :  { %4633 = vmatpush1.bf16.msra.mxu1 %v6183_v50  ;;  %v6272_v50 = vld [vmem:[%s8908_s3 + $0x504] ss:$16 sps:$4 sm:$0xff]  }
 0x1cc   :  { %4634 = vmatprep.subr.bf16.mxu1 %v6191_v51  ;;  %v6267_v51 = vld [vmem:[%s8908_s3 + $0x1e8] ss:$16 sps:$4 sm:$0xff]  }
 0x1cf   :  { %4635 = vmatpush1.bf16.msra.mxu1 %v6189_v52  ;;  %v6275_v52 = vld [vmem:[%s8908_s3 + $0x20c] ss:$16 sps:$4 sm:$0xff]  }
 0x1d0   :  { %4636 = vmatprep.subr.bf16.mxu1 %v6197_v33  ;;  %v6270_v33 = vld [vmem:[%s8908_s3 + $0x500] ss:$16 sps:$4 sm:$0xff]  }
 0x1d3   :  { %4637 = vmatpush1.bf16.msra.mxu1 %v6195_v12  ;;  %v6278_v12 = vld [vmem:[%s8908_s3 + $0x524] ss:$16 sps:$4 sm:$0xff]  }
 0x1d4   :  { %4638 = vmatprep.subr.bf16.mxu1 %v6203_v53  ;;  %v6273_v53 = vld [vmem:[%s8908_s3 + $0x208] ss:$16 sps:$4 sm:$0xff]  }
 0x1d7   :  { %4639 = vmatpush1.bf16.msra.mxu1 %v6201_v55  ;;  %v6281_v55 = vld [vmem:[%s8908_s3 + $0x22c] ss:$16 sps:$4 sm:$0xff]  }
 0x1d8   :  { %4640 = vmatprep.subr.bf16.mxu1 %v6209_v59  ;;  %v6276_v59 = vld [vmem:[%s8908_s3 + $0x520] ss:$16 sps:$4 sm:$0xff]  }
 0x1d9   :  { %v2631_v0 = vpop.f32.mrb[4].mxu1 }
 0x1da   :  { %v6034_v1 = vadd.f32 %v2631_v0, %v443_v46  ;;  %v2633_v48 = vpop.f32.mrb[5].mxu1  ;;  %v6284_v46 = vld [vmem:[%s8908_s3 + $0x544] ss:$16 sps:$4 sm:$0xff]   ;;  %v6285_v0 = vld [vmem:[%s8908_s3 + $0x248] ss:$16 sps:$4 sm:$0xff]  }
 0x1db   :  { %v6035_v2 = vadd.f32 %v2633_v48, %v447_v60  ;;  %v2635_v3 = vpop.f32.mrb[6].mxu1  ;;  %4641 = vmatpush1.bf16.msra.mxu1 %v6207_v62  ;;  %v6279_v60 = vld [vmem:[%s8908_s3 + $0x228] ss:$16 sps:$4 sm:$0xff]   ;;  %v6287_v62 = vld [vmem:[%s8908_s3 + $0x24c] ss:$16 sps:$4 sm:$0xff]  }
 0x1dc   :  { %v2886_v5 = vmul.f32 0.2, %v6034_v1  ;;  %v2636_v6 = vpop.f32.mrb[7].mxu1  ;;  %4642 = vmatprep.subr.bf16.mxu1 %v6215_v63  ;;  %v6290_v63 = vld [vmem:[%s8908_s3 + $0x564] ss:$16 sps:$4 sm:$0xff]  }
 0x1dd   :  { %v2887_v8 = vmul.f32 0.2, %v6035_v2  ;;  %v6288_v48 = vld [vmem:[%s8908_s3 + $0x560] ss:$16 sps:$4 sm:$0xff]   ;;  %v6291_v3 = vld [vmem:[%s8908_s3 + $0x268] ss:$16 sps:$4 sm:$0xff]  }
 0x1de   :  { %v2894_v58 = vmax.f32 %v6034_v1, %v2886_v5  ;;  %v6293_v1 = vld [vmem:[%s8908_s3 + $0x26c] ss:$16 sps:$4 sm:$0xff]   ;;  %v6294_v5 = vld [vmem:[%s8908_s3 + $0x580] ss:$16 sps:$4 sm:$0xff]   ;;  %v6302_v6 = vld [vmem:[%s8908_s3 + $0x5a4] ss:$16 sps:$4 sm:$0xff]  }
 0x1df   :  { %v2895_v10 = vmax.f32 %v6035_v2, %v2887_v8  ;;  %4643 = vmatpush1.bf16.msra.mxu1 %v6213_v4  ;;  %v6296_v2 = vld [vmem:[%s8908_s3 + $0x584] ss:$16 sps:$4 sm:$0xff]   ;;  %v6299_v4 = vld [vmem:[%s8908_s3 + $0x28c] ss:$16 sps:$4 sm:$0xff]   ;;  %v450_v8 = vsub.s32 4, %v7694_v24 }
 0x1e0   :  { %4644 = vmatprep.subr.bf16.mxu1 %v6221_v7  ;;  %v8136_v17 = vpack.c.bf16 %v2894_v58, %v2894_v58  ;;  %v6297_v7 = vld [vmem:[%s8908_s3 + $0x288] ss:$16 sps:$4 sm:$0xff]   ;;  %v454_v58 = vsub.s32 5, %v7694_v24 }
 0x1e1   :  { %v8131_v14 = vpack.c.bf16 %v2895_v10, %v2895_v10  ;;  %v6305_v10 = vld [vmem:[%s8908_s3 + $0x2ac] ss:$16 sps:$4 sm:$0xff]  }
 0x1e3   :  { %4539 = vmatprep.mubr.bf16.mxu0 %v8131_v14  ;;  %4645 = vmatpush1.bf16.msra.mxu1 %v6219_v11  ;;  %v6300_v11 = vld [vmem:[%s8908_s3 + $0x5a0] ss:$16 sps:$4 sm:$0xff]  }
 0x1e4   :  { %4540 = vmatmul.mubr.bf16.vlgmr.msra.gmra.mrb[8].mxu0 %v8136_v17  ;;  %4646 = vmatprep.subr.bf16.mxu1 %v6227_v13  ;;  %v6308_v13 = vld [vmem:[%s8908_s3 + $0x5c4] ss:$16 sps:$4 sm:$0xff]  }
 0x1e5   :  { %4549 = vmatpush1.bf16.msra.mxu0 %v6222_v15  ;;  %v6303_v15 = vld [vmem:[%s8908_s3 + $0x2a8] ss:$16 sps:$4 sm:$0xff]  }
 0x1e6   :  { %4550 = vmatprep.subr.bf16.mxu0 %v6230_v18  ;;  %v455_v18 = vrot.slane %v7723_v36, %v454_v58  ;;  %v6416_v58 = vld [vmem:[%s8908_s3 + $0x704] ss:$16 sps:$4 sm:$0xff]  }
 0x1e7   :  { %4647 = vmatpush1.bf16.msra.mxu1 %v6225_v57  ;;  %v6311_v57 = vld [vmem:[%s8908_s3 + $0x2cc] ss:$16 sps:$4 sm:$0xff]  }
 0x1e8   :  { %4648 = vmatprep.subr.bf16.mxu1 %v6233_v21  ;;  %v6306_v21 = vld [vmem:[%s8908_s3 + $0x5c0] ss:$16 sps:$4 sm:$0xff]  }
 0x1e9   :  { %4551 = vmatpush1.bf16.msra.mxu0 %v6228_v16 }
 0x1ea   :  { %4552 = vmatprep.subr.bf16.mxu0 %v6236_v19  ;;  %v6314_v19 = vld [vmem:[%s8908_s3 + $0x5e4] ss:$16 sps:$4 sm:$0xff]  }
 0x1eb   :  { %4649 = vmatpush1.bf16.msra.mxu1 %v6231_v20 }
 0x1ec   :  { %4650 = vmatprep.subr.bf16.mxu1 %v6239_v22 }
 0x1ed   :  { %4553 = vmatpush1.bf16.msra.mxu0 %v6234_v23 }
 0x1ee   :  { %4554 = vmatprep.subr.bf16.mxu0 %v6242_v27 }
 0x1ef   :  { %4651 = vmatpush1.bf16.msra.mxu1 %v6237_v25  ;;  %v6317_v25 = vld [vmem:[%s8908_s3 + $0x2ec] ss:$16 sps:$4 sm:$0xff]  }
 0x1f0   :  { %4652 = vmatprep.subr.bf16.mxu1 %v6245_v61 }
 0x1f1   :  { %4555 = vmatpush1.bf16.msra.mxu0 %v6240_v26 }
 0x1f2   :  { %4556 = vmatprep.subr.bf16.mxu0 %v6248_v28  ;;  %v6312_v28 = vld [vmem:[%s8908_s3 + $0x5e0] ss:$16 sps:$4 sm:$0xff]  }
 0x1f3   :  { %4653 = vmatpush1.bf16.msra.mxu1 %v6243_v29 }
 0x1f4   :  { %4654 = vmatprep.subr.bf16.mxu1 %v6251_v30  ;;  %v6368_v30 = vld [vmem:[%s8908_s3 + $0x604] ss:$16 sps:$4 sm:$0xff]  }
 0x1f5   :  { %4557 = vmatpush1.bf16.msra.mxu0 %v6246_v32 }
 0x1f6   :  { %4558 = vmatprep.subr.bf16.mxu0 %v6254_v34  ;;  %v6315_v34 = vld [vmem:[%s8908_s3 + $0x2e8] ss:$16 sps:$4 sm:$0xff]  }
 0x1f7   :  { %4655 = vmatpush1.bf16.msra.mxu1 %v6249_v35 }
 0x1f8   :  { %4656 = vmatprep.subr.bf16.mxu1 %v6257_v38  ;;  %v6320_v38 = vld [vmem:[%s8908_s3 + $0x30c] ss:$16 sps:$4 sm:$0xff]  }
 0x1f9   :  { %4559 = vmatpush1.bf16.msra.mxu0 %v6252_v39 }
 0x1fa   :  { %4560 = vmatprep.subr.bf16.mxu0 %v6260_v40  ;;  %v6366_v40 = vld [vmem:[%s8908_s3 + $0x600] ss:$16 sps:$4 sm:$0xff]  }
 0x1fb   :  { %4657 = vmatpush1.bf16.msra.mxu1 %v6255_v41 }
 0x1fc   :  { %4658 = vmatprep.subr.bf16.mxu1 %v6263_v42  ;;  %v6318_v42 = vld [vmem:[%s8908_s3 + $0x308] ss:$16 sps:$4 sm:$0xff]  }
 0x1fd   :  { %4561 = vmatpush1.bf16.msra.mxu0 %v6258_v43  ;;  %v6374_v43 = vld [vmem:[%s8908_s3 + $0x624] ss:$16 sps:$4 sm:$0xff]  }
 0x1fe   :  { %4562 = vmatprep.subr.bf16.mxu0 %v6266_v44  ;;  %v6323_v44 = vld [vmem:[%s8908_s3 + $0x32c] ss:$16 sps:$4 sm:$0xff]  }
 0x1ff   :  { %4659 = vmatpush1.bf16.msra.mxu1 %v6261_v45  ;;  %v6372_v45 = vld [vmem:[%s8908_s3 + $0x620] ss:$16 sps:$4 sm:$0xff]  }
 0x200   :  { %4660 = vmatprep.subr.bf16.mxu1 %v6269_v47  ;;  %v6321_v47 = vld [vmem:[%s8908_s3 + $0x328] ss:$16 sps:$4 sm:$0xff]  }
 0x201   :  { %4563 = vmatpush1.bf16.msra.mxu0 %v6264_v49  ;;  %v6380_v49 = vld [vmem:[%s8908_s3 + $0x644] ss:$16 sps:$4 sm:$0xff]  }
 0x202   :  { %4564 = vmatprep.subr.bf16.mxu0 %v6272_v50  ;;  %v6326_v50 = vld [vmem:[%s8908_s3 + $0x34c] ss:$16 sps:$4 sm:$0xff]  }
 0x203   :  { %4661 = vmatpush1.bf16.msra.mxu1 %v6267_v51  ;;  %v6378_v51 = vld [vmem:[%s8908_s3 + $0x640] ss:$16 sps:$4 sm:$0xff]  }
 0x204   :  { %4671 = vmatprep.subr.bf16.mxu1 %v6275_v52  ;;  %v6324_v52 = vld [vmem:[%s8908_s3 + $0x348] ss:$16 sps:$4 sm:$0xff]  }
 0x205   :  { %4565 = vmatpush1.bf16.msra.mxu0 %v6270_v33  ;;  %v6386_v33 = vld [vmem:[%s8908_s3 + $0x664] ss:$16 sps:$4 sm:$0xff]  }
 0x206   :  { %4663 = vmatmul.mubr.bf16.vlgmr.msra.gmra.mrb[12].mxu1 %v7888_v9  ;;  %4566 = vmatprep.subr.bf16.mxu0 %v6278_v12  ;;  %v6282_v9 = vld [vmem:[%s8908_s3 + $0x540] ss:$16 sps:$4 sm:$0xff]   ;;  %v6329_v12 = vld [vmem:[%s8908_s3 + $0x36c] ss:$16 sps:$4 sm:$0xff]  }
 0x207   :  { %4672 = vmatpush1.bf16.msra.mxu1 %v6273_v53  ;;  %4703 = vmatprep.mubr.bf16.mxu1 %v8131_v14  ;;  %v451_v14 = vrot.slane %v7723_v36, %v450_v8  ;;  %v6309_v36 = vld [vmem:[%s8908_s3 + $0x2c8] ss:$16 sps:$4 sm:$0xff]   ;;  %v6384_v53 = vld [vmem:[%s8908_s3 + $0x660] ss:$16 sps:$4 sm:$0xff]  }
 0x208   :  { %4673 = vmatprep.subr.bf16.mxu1 %v6281_v55  ;;  %v6327_v55 = vld [vmem:[%s8908_s3 + $0x368] ss:$16 sps:$4 sm:$0xff]  }
 0x209   :  { %4567 = vmatpush1.bf16.msra.mxu0 %v6276_v59  ;;  %v6392_v59 = vld [vmem:[%s8908_s3 + $0x684] ss:$16 sps:$4 sm:$0xff]   ;;  %v6339_v8 = vld [vmem:[%s8908_s3 + $0x3e8] ss:$16 sps:$4 sm:$0xff]  }
 0x20a   :  { %4568 = vmatprep.subr.bf16.mxu0 %v6284_v46  ;;  %v6332_v46 = vld [vmem:[%s8908_s3 + $0x38c] ss:$16 sps:$4 sm:$0xff]  }
 0x20b   :  { %4674 = vmatpush1.bf16.msra.mxu1 %v6279_v60  ;;  %v6390_v60 = vld [vmem:[%s8908_s3 + $0x680] ss:$16 sps:$4 sm:$0xff]  }
 0x20c   :  { %4675 = vmatprep.subr.bf16.mxu1 %v6287_v62  ;;  %v6330_v62 = vld [vmem:[%s8908_s3 + $0x388] ss:$16 sps:$4 sm:$0xff]  }
 0x20d   :  { %4569 = vmatpush1.bf16.msra.mxu0 %v6282_v9  ;;  %v6398_v9 = vld [vmem:[%s8908_s3 + $0x6a4] ss:$16 sps:$4 sm:$0xff]  }
 0x20e   :  { %4570 = vmatprep.subr.bf16.mxu0 %v6290_v63  ;;  %v6335_v63 = vld [vmem:[%s8908_s3 + $0x3ac] ss:$16 sps:$4 sm:$0xff]  }
 0x20f   :  { %4676 = vmatpush1.bf16.msra.mxu1 %v6285_v0  ;;  %v6396_v0 = vld [vmem:[%s8908_s3 + $0x6a0] ss:$16 sps:$4 sm:$0xff]  }
 0x210   :  { %4677 = vmatprep.subr.bf16.mxu1 %v6293_v1  ;;  %v6333_v1 = vld [vmem:[%s8908_s3 + $0x3a8] ss:$16 sps:$4 sm:$0xff]  }
 0x211   :  { %4571 = vmatpush1.bf16.msra.mxu0 %v6288_v48  ;;  %v6404_v48 = vld [vmem:[%s8908_s3 + $0x6c4] ss:$16 sps:$4 sm:$0xff]  }
 0x212   :  { %4572 = vmatprep.subr.bf16.mxu0 %v6296_v2  ;;  %v6338_v2 = vld [vmem:[%s8908_s3 + $0x3cc] ss:$16 sps:$4 sm:$0xff]  }
 0x213   :  { %4678 = vmatpush1.bf16.msra.mxu1 %v6291_v3  ;;  %v6402_v3 = vld [vmem:[%s8908_s3 + $0x6c0] ss:$16 sps:$4 sm:$0xff]  }
 0x214   :  { %4679 = vmatprep.subr.bf16.mxu1 %v6299_v4  ;;  %v6336_v4 = vld [vmem:[%s8908_s3 + $0x3c8] ss:$16 sps:$4 sm:$0xff]  }
 0x215   :  { %4573 = vmatpush1.bf16.msra.mxu0 %v6294_v5  ;;  %v6410_v5 = vld [vmem:[%s8908_s3 + $0x6e4] ss:$16 sps:$4 sm:$0xff]  }
 0x216   :  { %4574 = vmatprep.subr.bf16.mxu0 %v6302_v6  ;;  %v6341_v6 = vld [vmem:[%s8908_s3 + $0x3ec] ss:$16 sps:$4 sm:$0xff]  }
 0x217   :  { %4680 = vmatpush1.bf16.msra.mxu1 %v6297_v7  ;;  %v6408_v7 = vld [vmem:[%s8908_s3 + $0x6e0] ss:$16 sps:$4 sm:$0xff]  }
 0x218   :  { %4681 = vmatprep.subr.bf16.mxu1 %v6305_v10  ;;  %v6344_v10 = vld [vmem:[%s8908_s3 + $0x40c] ss:$16 sps:$4 sm:$0xff]  }
 0x219   :  { %4575 = vmatpush1.bf16.msra.mxu0 %v6300_v11  ;;  %v6414_v11 = vld [vmem:[%s8908_s3 + $0x700] ss:$16 sps:$4 sm:$0xff]  }
 0x21a   :  { %v2754_v16 = vpop.f32.mrb[4].mxu0  ;;  %4576 = vmatprep.subr.bf16.mxu0 %v6308_v13  ;;  %v6342_v13 = vld [vmem:[%s8908_s3 + $0x408] ss:$16 sps:$4 sm:$0xff]  }
 0x21b   :  { %v6036_v20 = vadd.f32 %v2754_v16, %v451_v14  ;;  %v2756_v22 = vpop.f32.mrb[5].mxu0  ;;  %4682 = vmatpush1.bf16.msra.mxu1 %v6303_v15  ;;  %v6347_v14 = vld [vmem:[%s8908_s3 + $0x42c] ss:$16 sps:$4 sm:$0xff]   ;;  %v6422_v15 = vld [vmem:[%s8908_s3 + $0x724] ss:$16 sps:$4 sm:$0xff]  }
 0x21c   :  { %v6037_v23 = vadd.f32 %v2756_v22, %v455_v18  ;;  %v2758_v27 = vpop.f32.mrb[6].mxu0  ;;  %4683 = vmatprep.subr.bf16.mxu1 %v6311_v57  ;;  %v6345_v18 = vld [vmem:[%s8908_s3 + $0x428] ss:$16 sps:$4 sm:$0xff]   ;;  %v6420_v57 = vld [vmem:[%s8908_s3 + $0x720] ss:$16 sps:$4 sm:$0xff]  }
 0x21d   :  { %v2888_v61 = vmul.f32 0.2, %v6036_v20  ;;  %v2759_v26 = vpop.f32.mrb[7].mxu0  ;;  %4577 = vmatpush1.bf16.msra.mxu0 %v6306_v21  ;;  %v6428_v21 = vld [vmem:[%s8908_s3 + $0x744] ss:$16 sps:$4 sm:$0xff]  }
 0x21e   :  { %v2889_v29 = vmul.f32 0.2, %v6037_v23  ;;  %4578 = vmatprep.subr.bf16.mxu0 %v6314_v19  ;;  %v6348_v16 = vld [vmem:[%s8908_s3 + $0x448] ss:$16 sps:$4 sm:$0xff]   ;;  %v6426_v19 = vld [vmem:[%s8908_s3 + $0x740] ss:$16 sps:$4 sm:$0xff]  }
 0x21f   :  { %v2896_v32 = vmax.f32 %v6036_v20, %v2888_v61  ;;  %4684 = vmatpush1.bf16.msra.mxu1 %v6309_v36  ;;  %v6434_v20 = vld [vmem:[%s8908_s3 + $0x764] ss:$16 sps:$4 sm:$0xff]   ;;  %v6353_v22 = vld [vmem:[%s8908_s3 + $0x46c] ss:$16 sps:$4 sm:$0xff]   ;;  %v6351_v36 = vld [vmem:[%s8908_s3 + $0x468] ss:$16 sps:$4 sm:$0xff]  }
 0x220   :  { %v2897_v35 = vmax.f32 %v6037_v23, %v2889_v29  ;;  %4685 = vmatprep.subr.bf16.mxu1 %v6317_v25  ;;  %v6432_v23 = vld [vmem:[%s8908_s3 + $0x760] ss:$16 sps:$4 sm:$0xff]   ;;  %v6440_v27 = vld [vmem:[%s8908_s3 + $0x784] ss:$16 sps:$4 sm:$0xff]   ;;  %v6356_v25 = vld [vmem:[%s8908_s3 + $0x48c] ss:$16 sps:$4 sm:$0xff]  }
 0x221   :  { %4579 = vmatpush1.bf16.msra.mxu0 %v6312_v28  ;;  %v8340_v41 = vpack.c.bf16 %v2896_v32, %v2896_v32  ;;  %v6354_v61 = vld [vmem:[%s8908_s3 + $0x488] ss:$16 sps:$4 sm:$0xff]   ;;  %v6438_v26 = vld [vmem:[%s8908_s3 + $0x780] ss:$16 sps:$4 sm:$0xff]   ;;  %v6446_v28 = vld [vmem:[%s8908_s3 + $0x7a4] ss:$16 sps:$4 sm:$0xff]  }
 0x222   :  { %v8335_v39 = vpack.c.bf16 %v2897_v35, %v2897_v35  ;;  %4589 = vmatprep.subr.bf16.mxu0 %v6368_v30  ;;  %v6359_v29 = vld [vmem:[%s8908_s3 + $0x4ac] ss:$16 sps:$4 sm:$0xff]   ;;  %v6357_v30 = vld [vmem:[%s8908_s3 + $0x4a8] ss:$16 sps:$4 sm:$0xff]   ;;  %v6444_v32 = vld [vmem:[%s8908_s3 + $0x7a0] ss:$16 sps:$4 sm:$0xff]  }
 0x223   :  { %4686 = vmatpush1.bf16.msra.mxu1 %v6315_v34  ;;  %v6452_v34 = vld [vmem:[%s8908_s3 + $0x7c4] ss:$16 sps:$4 sm:$0xff]   ;;  %v6362_v35 = vld [vmem:[%s8908_s3 + $0x4cc] ss:$16 sps:$4 sm:$0xff]  }
 0x224   :  { %4580 = vmatprep.mubr.bf16.mxu0 %v8335_v39  ;;  %4687 = vmatprep.subr.bf16.mxu1 %v6320_v38  ;;  %v6360_v38 = vld [vmem:[%s8908_s3 + $0x4c8] ss:$16 sps:$4 sm:$0xff]  }
 0x225   :  { %4581 = vmatmul.mubr.bf16.vlgmr.msra.gmra.mrb[8].mxu0 %v8340_v41 }
 0x226   :  { %4590 = vmatpush1.bf16.msra.mxu0 %v6366_v40  ;;  %v6365_v40 = vld [vmem:[%s8908_s3 + $0x4ec] ss:$16 sps:$4 sm:$0xff]  }
 0x227   :  { %4688 = vmatpush1.bf16.msra.mxu1 %v6318_v42  ;;  %4591 = vmatprep.subr.bf16.mxu0 %v6374_v43  ;;  %v6458_v42 = vld [vmem:[%s8908_s3 + $0x7e4] ss:$16 sps:$4 sm:$0xff]   ;;  %v6456_v43 = vld [vmem:[%s8908_s3 + $0x7e0] ss:$16 sps:$4 sm:$0xff]  }
 0x228   :  { %4689 = vmatprep.subr.bf16.mxu1 %v6323_v44  ;;  %v6363_v44 = vld [vmem:[%s8908_s3 + $0x4e8] ss:$16 sps:$4 sm:$0xff]  }
 0x22a   :  { %4592 = vmatpush1.bf16.msra.mxu0 %v6372_v45  ;;  %v6488_v45 = vld [vmem:[%s8910_s5 + $0x4] ss:$8 sps:$4 sm:$0xff]  }
 0x22b   :  { %4690 = vmatpush1.bf16.msra.mxu1 %v6321_v47  ;;  %4593 = vmatprep.subr.bf16.mxu0 %v6380_v49  ;;  %v6371_v47 = vld [vmem:[%s8908_s3 + $0x50c] ss:$16 sps:$4 sm:$0xff]   ;;  %v6369_v49 = vld [vmem:[%s8908_s3 + $0x508] ss:$16 sps:$4 sm:$0xff]  }
 0x22c   :  { %4691 = vmatprep.subr.bf16.mxu1 %v6326_v50  ;;  %v6377_v50 = vld [vmem:[%s8908_s3 + $0x52c] ss:$16 sps:$4 sm:$0xff]  }
 0x22e   :  { %4594 = vmatpush1.bf16.msra.mxu0 %v6378_v51  ;;  %v6375_v51 = vld [vmem:[%s8908_s3 + $0x528] ss:$16 sps:$4 sm:$0xff]  }
 0x22f   :  { %4692 = vmatpush1.bf16.msra.mxu1 %v6324_v52  ;;  %4595 = vmatprep.subr.bf16.mxu0 %v6386_v33  ;;  %v6383_v52 = vld [vmem:[%s8908_s3 + $0x54c] ss:$16 sps:$4 sm:$0xff]   ;;  %v6381_v33 = vld [vmem:[%s8908_s3 + $0x548] ss:$16 sps:$4 sm:$0xff]  }
 0x230   :  { %4693 = vmatprep.subr.bf16.mxu1 %v6329_v12  ;;  %v6389_v12 = vld [vmem:[%s8908_s3 + $0x56c] ss:$16 sps:$4 sm:$0xff]  }
 0x232   :  { %4596 = vmatpush1.bf16.msra.mxu0 %v6384_v53  ;;  %v6387_v53 = vld [vmem:[%s8908_s3 + $0x568] ss:$16 sps:$4 sm:$0xff]  }
 0x233   :  { %4694 = vmatpush1.bf16.msra.mxu1 %v6327_v55  ;;  %4597 = vmatprep.subr.bf16.mxu0 %v6392_v59  ;;  %v6395_v55 = vld [vmem:[%s8908_s3 + $0x58c] ss:$16 sps:$4 sm:$0xff]   ;;  %v6393_v59 = vld [vmem:[%s8908_s3 + $0x588] ss:$16 sps:$4 sm:$0xff]  }
 0x234   :  { %4695 = vmatprep.subr.bf16.mxu1 %v6332_v46  ;;  %v6401_v46 = vld [vmem:[%s8908_s3 + $0x5ac] ss:$16 sps:$4 sm:$0xff]  }
 0x236   :  { %4598 = vmatpush1.bf16.msra.mxu0 %v6390_v60  ;;  %v6399_v60 = vld [vmem:[%s8908_s3 + $0x5a8] ss:$16 sps:$4 sm:$0xff]  }
 0x237   :  { %4696 = vmatpush1.bf16.msra.mxu1 %v6330_v62  ;;  %4599 = vmatprep.subr.bf16.mxu0 %v6398_v9  ;;  %v6407_v62 = vld [vmem:[%s8908_s3 + $0x5cc] ss:$16 sps:$4 sm:$0xff]   ;;  %v6405_v9 = vld [vmem:[%s8908_s3 + $0x5c8] ss:$16 sps:$4 sm:$0xff]  }
 0x238   :  { %4697 = vmatprep.subr.bf16.mxu1 %v6335_v63  ;;  %v6413_v63 = vld [vmem:[%s8908_s3 + $0x5ec] ss:$16 sps:$4 sm:$0xff]  }
 0x23a   :  { %4600 = vmatpush1.bf16.msra.mxu0 %v6396_v0  ;;  %v6411_v0 = vld [vmem:[%s8908_s3 + $0x5e8] ss:$16 sps:$4 sm:$0xff]  }
 0x23b   :  { %4698 = vmatpush1.bf16.msra.mxu1 %v6333_v1  ;;  %4601 = vmatprep.subr.bf16.mxu0 %v6404_v48  ;;  %v6419_v1 = vld [vmem:[%s8908_s3 + $0x60c] ss:$16 sps:$4 sm:$0xff]   ;;  %v6417_v48 = vld [vmem:[%s8908_s3 + $0x608] ss:$16 sps:$4 sm:$0xff]  }
 0x23c   :  { %4699 = vmatprep.subr.bf16.mxu1 %v6338_v2  ;;  %v6425_v2 = vld [vmem:[%s8908_s3 + $0x62c] ss:$16 sps:$4 sm:$0xff]  }
 0x23e   :  { %4602 = vmatpush1.bf16.msra.mxu0 %v6402_v3  ;;  %v6423_v3 = vld [vmem:[%s8908_s3 + $0x628] ss:$16 sps:$4 sm:$0xff]  }
 0x23f   :  { %4700 = vmatpush1.bf16.msra.mxu1 %v6336_v4  ;;  %4603 = vmatprep.subr.bf16.mxu0 %v6410_v5  ;;  %v6431_v4 = vld [vmem:[%s8908_s3 + $0x64c] ss:$16 sps:$4 sm:$0xff]   ;;  %v6429_v5 = vld [vmem:[%s8908_s3 + $0x648] ss:$16 sps:$4 sm:$0xff]  }
 0x240   :  { %4701 = vmatprep.subr.bf16.mxu1 %v6341_v6  ;;  %v6435_v6 = vld [vmem:[%s8908_s3 + $0x668] ss:$16 sps:$4 sm:$0xff]  }
 0x242   :  { %4604 = vmatpush1.bf16.msra.mxu0 %v6408_v7  ;;  %v6443_v7 = vld [vmem:[%s8908_s3 + $0x68c] ss:$16 sps:$4 sm:$0xff]  }
 0x243   :  { %4702 = vmatpush1.bf16.msra.mxu1 %v6339_v8  ;;  %4605 = vmatprep.subr.bf16.mxu0 %v6416_v58  ;;  %v458_v8 = vsub.s32 6, %v7694_v24  ;;  %v6441_v58 = vld [vmem:[%s8908_s3 + $0x688] ss:$16 sps:$4 sm:$0xff]  }
 0x244   :  { %4712 = vmatprep.subr.bf16.mxu1 %v6344_v10  ;;  %v462_v10 = vsub.s32 7, %v7694_v24  ;;  %v6576_v24 = vld [vmem:[%s8910_s5 + $0x1e0] ss:$8 sps:$4 sm:$0xff]  }
 0x246   :  { %4704 = vmatmul.mubr.bf16.vlgmr.msra.gmra.mrb[12].mxu1 %v8136_v17  ;;  %4606 = vmatpush1.bf16.msra.mxu0 %v6414_v11  ;;  %v6350_v17 = vld [vmem:[%s8908_s3 + $0x44c] ss:$16 sps:$4 sm:$0xff]  }
 0x247   :  { %4713 = vmatpush1.bf16.msra.mxu1 %v6342_v13  ;;  %4744 = vmatprep.mubr.bf16.mxu1 %v8335_v39  ;;  %v6450_v39 = vld [vmem:[%s8908_s3 + $0x7c0] ss:$16 sps:$4 sm:$0xff]   ;;  %v6449_v11 = vld [vmem:[%s8908_s3 + $0x6ac] ss:$16 sps:$4 sm:$0xff]  }
 0x248   :  { %4714 = vmatprep.subr.bf16.mxu1 %v6347_v14  ;;  %4607 = vmatprep.subr.bf16.mxu0 %v6422_v15  ;;  %v6586_v13 = vld [vmem:[%s8909_s2] sm:$0xff] }
 0x249   :  { %v459_v14 = vrot.slane %v6586_v13, %v458_v8  ;;  %v463_v15 = vrot.slane %v6586_v13, %v462_v10  ;;  %v6518_v8 = vld [vmem:[%s8910_s5 + $0xa4] ss:$8 sps:$4 sm:$0xff]   ;;  %v6521_v10 = vld [vmem:[%s8910_s5 + $0xb4] ss:$8 sps:$4 sm:$0xff]  }
 0x24a   :  { %4608 = vmatpush1.bf16.msra.mxu0 %v6420_v57  ;;  %v6455_v57 = vld [vmem:[%s8908_s3 + $0x6cc] ss:$16 sps:$4 sm:$0xff]  }
 0x24b   :  { %4715 = vmatpush1.bf16.msra.mxu1 %v6345_v18  ;;  %4609 = vmatprep.subr.bf16.mxu0 %v6428_v21  ;;  %v6447_v18 = vld [vmem:[%s8908_s3 + $0x6a8] ss:$16 sps:$4 sm:$0xff]   ;;  %v6524_v13 = vld [vmem:[%s8910_s5 + $0xc4] ss:$8 sps:$4 sm:$0xff]  }
 0x24c   :  { %4716 = vmatprep.subr.bf16.mxu1 %v6350_v17 }
 0x24e   :  { %4610 = vmatpush1.bf16.msra.mxu0 %v6426_v19 }
 0x24f   :  { %4717 = vmatpush1.bf16.msra.mxu1 %v6348_v16  ;;  %4611 = vmatprep.subr.bf16.mxu0 %v6434_v20 }
 0x250   :  { %4718 = vmatprep.subr.bf16.mxu1 %v6353_v22  ;;  %v6453_v22 = vld [vmem:[%s8908_s3 + $0x6c8] ss:$16 sps:$4 sm:$0xff]  }
 0x252   :  { %4612 = vmatpush1.bf16.msra.mxu0 %v6432_v23 }
 0x253   :  { %4719 = vmatpush1.bf16.msra.mxu1 %v6351_v36  ;;  %4613 = vmatprep.subr.bf16.mxu0 %v6440_v27  ;;  %v6461_v27 = vld [vmem:[%s8908_s3 + $0x6ec] ss:$16 sps:$4 sm:$0xff]  }
 0x254   :  { %4720 = vmatprep.subr.bf16.mxu1 %v6356_v25 }
 0x256   :  { %4614 = vmatpush1.bf16.msra.mxu0 %v6438_v26 }
 0x257   :  { %4721 = vmatpush1.bf16.msra.mxu1 %v6354_v61  ;;  %4615 = vmatprep.subr.bf16.mxu0 %v6446_v28  ;;  %v6459_v28 = vld [vmem:[%s8908_s3 + $0x6e8] ss:$16 sps:$4 sm:$0xff]  }
 0x258   :  { %4722 = vmatprep.subr.bf16.mxu1 %v6359_v29 }
 0x25a   :  { %4616 = vmatpush1.bf16.msra.mxu0 %v6444_v32  ;;  %v6486_v32 = vld [vmem:[%s8910_s5] ss:$8 sps:$4 sm:$0xff]  }
 0x25b   :  { %4723 = vmatpush1.bf16.msra.mxu1 %v6357_v30  ;;  %4617 = vmatprep.subr.bf16.mxu0 %v6452_v34  ;;  %v6464_v30 = vld [vmem:[%s8908_s3 + $0x70c] ss:$16 sps:$4 sm:$0xff]  }
 0x25c   :  { %4724 = vmatprep.subr.bf16.mxu1 %v6362_v35  ;;  %v6491_v35 = vld [vmem:[%s8910_s5 + $0x14] ss:$8 sps:$4 sm:$0xff]  }
 0x25e   :  { %4618 = vmatpush1.bf16.msra.mxu0 %v6450_v39  ;;  %v6467_v39 = vld [vmem:[%s8908_s3 + $0x72c] ss:$16 sps:$4 sm:$0xff]  }
 0x25f   :  { %4725 = vmatpush1.bf16.msra.mxu1 %v6360_v38  ;;  %4619 = vmatprep.subr.bf16.mxu0 %v6458_v42  ;;  %v6462_v38 = vld [vmem:[%s8908_s3 + $0x708] ss:$16 sps:$4 sm:$0xff]   ;;  %v6494_v42 = vld [vmem:[%s8910_s5 + $0x24] ss:$8 sps:$4 sm:$0xff]  }
 0x260   :  { %4726 = vmatprep.subr.bf16.mxu1 %v6365_v40  ;;  %v6489_v40 = vld [vmem:[%s8910_s5 + $0x10] ss:$8 sps:$4 sm:$0xff]  }
 0x262   :  { %4620 = vmatpush1.bf16.msra.mxu0 %v6456_v43  ;;  %v6465_v43 = vld [vmem:[%s8908_s3 + $0x728] ss:$16 sps:$4 sm:$0xff]  }
 0x263   :  { %4727 = vmatpush1.bf16.msra.mxu1 %v6363_v44  ;;  %5202 = vmatprep.subr.bf16.mxu0 %v6488_v45  ;;  %v6470_v44 = vld [vmem:[%s8908_s3 + $0x74c] ss:$16 sps:$4 sm:$0xff]   ;;  %v6492_v45 = vld [vmem:[%s8910_s5 + $0x20] ss:$8 sps:$4 sm:$0xff]  }
 0x264   :  { %4728 = vmatprep.subr.bf16.mxu1 %v6371_v47  ;;  %v6497_v47 = vld [vmem:[%s8910_s5 + $0x34] ss:$8 sps:$4 sm:$0xff]  }
 0x267   :  { %4729 = vmatpush1.bf16.msra.mxu1 %v6369_v49  ;;  %v6468_v49 = vld [vmem:[%s8908_s3 + $0x748] ss:$16 sps:$4 sm:$0xff]  }
 0x268   :  { %4730 = vmatprep.subr.bf16.mxu1 %v6377_v50  ;;  %v6473_v50 = vld [vmem:[%s8908_s3 + $0x76c] ss:$16 sps:$4 sm:$0xff]  }
 0x26b   :  { %4731 = vmatpush1.bf16.msra.mxu1 %v6375_v51  ;;  %v6495_v51 = vld [vmem:[%s8910_s5 + $0x30] ss:$8 sps:$4 sm:$0xff]  }
 0x26c   :  { %4732 = vmatprep.subr.bf16.mxu1 %v6383_v52  ;;  %v6500_v52 = vld [vmem:[%s8910_s5 + $0x44] ss:$8 sps:$4 sm:$0xff]  }
 0x26f   :  { %4733 = vmatpush1.bf16.msra.mxu1 %v6381_v33  ;;  %v6471_v33 = vld [vmem:[%s8908_s3 + $0x768] ss:$16 sps:$4 sm:$0xff]  }
 0x270   :  { %4734 = vmatprep.subr.bf16.mxu1 %v6389_v12  ;;  %v6476_v12 = vld [vmem:[%s8908_s3 + $0x78c] ss:$16 sps:$4 sm:$0xff]  }
 0x273   :  { %4735 = vmatpush1.bf16.msra.mxu1 %v6387_v53  ;;  %v6498_v53 = vld [vmem:[%s8910_s5 + $0x40] ss:$8 sps:$4 sm:$0xff]  }
 0x274   :  { %4736 = vmatprep.subr.bf16.mxu1 %v6395_v55  ;;  %v6503_v55 = vld [vmem:[%s8910_s5 + $0x54] ss:$8 sps:$4 sm:$0xff]  }
 0x277   :  { %4737 = vmatpush1.bf16.msra.mxu1 %v6393_v59  ;;  %v6474_v59 = vld [vmem:[%s8908_s3 + $0x788] ss:$16 sps:$4 sm:$0xff]  }
 0x278   :  { %4738 = vmatprep.subr.bf16.mxu1 %v6401_v46  ;;  %v6479_v46 = vld [vmem:[%s8908_s3 + $0x7ac] ss:$16 sps:$4 sm:$0xff]  }
 0x27b   :  { %4739 = vmatpush1.bf16.msra.mxu1 %v6399_v60  ;;  %v6501_v60 = vld [vmem:[%s8910_s5 + $0x50] ss:$8 sps:$4 sm:$0xff]  }
 0x27c   :  { %4740 = vmatprep.subr.bf16.mxu1 %v6407_v62  ;;  %v6506_v62 = vld [vmem:[%s8910_s5 + $0x64] ss:$8 sps:$4 sm:$0xff]  }
 0x27f   :  { %4741 = vmatpush1.bf16.msra.mxu1 %v6405_v9  ;;  %v6477_v9 = vld [vmem:[%s8908_s3 + $0x7a8] ss:$16 sps:$4 sm:$0xff]  }
 0x280   :  { %4742 = vmatprep.subr.bf16.mxu1 %v6413_v63  ;;  %v6482_v63 = vld [vmem:[%s8908_s3 + $0x7cc] ss:$16 sps:$4 sm:$0xff]  }
 0x283   :  { %4743 = vmatpush1.bf16.msra.mxu1 %v6411_v0  ;;  %v6504_v0 = vld [vmem:[%s8910_s5 + $0x60] ss:$8 sps:$4 sm:$0xff]  }
 0x284   :  { %4753 = vmatprep.subr.bf16.mxu1 %v6419_v1  ;;  %v6509_v1 = vld [vmem:[%s8910_s5 + $0x74] ss:$8 sps:$4 sm:$0xff]  }
 0x286   :  { %4745 = vmatmul.mubr.bf16.vlgmr.msra.gmra.mrb[12].mxu1 %v8340_v41  ;;  %v6437_v41 = vld [vmem:[%s8908_s3 + $0x66c] ss:$16 sps:$4 sm:$0xff]  }
 0x287   :  { %4754 = vmatpush1.bf16.msra.mxu1 %v6417_v48  ;;  %v6480_v48 = vld [vmem:[%s8908_s3 + $0x7c8] ss:$16 sps:$4 sm:$0xff]  }
 0x288   :  { %4755 = vmatprep.subr.bf16.mxu1 %v6425_v2  ;;  %v6485_v2 = vld [vmem:[%s8908_s3 + $0x7ec] ss:$16 sps:$4 sm:$0xff]  }
 0x28b   :  { %4756 = vmatpush1.bf16.msra.mxu1 %v6423_v3  ;;  %v6507_v3 = vld [vmem:[%s8910_s5 + $0x70] ss:$8 sps:$4 sm:$0xff]  }
 0x28c   :  { %4757 = vmatprep.subr.bf16.mxu1 %v6431_v4  ;;  %v6512_v4 = vld [vmem:[%s8910_s5 + $0x84] ss:$8 sps:$4 sm:$0xff]  }
 0x28f   :  { %4758 = vmatpush1.bf16.msra.mxu1 %v6429_v5  ;;  %v6483_v5 = vld [vmem:[%s8908_s3 + $0x7e8] ss:$16 sps:$4 sm:$0xff]  }
 0x290   :  { %4759 = vmatprep.subr.bf16.mxu1 %v6437_v41  ;;  %v6510_v41 = vld [vmem:[%s8910_s5 + $0x80] ss:$8 sps:$4 sm:$0xff]  }
 0x293   :  { %4760 = vmatpush1.bf16.msra.mxu1 %v6435_v6  ;;  %v6515_v6 = vld [vmem:[%s8910_s5 + $0x94] ss:$8 sps:$4 sm:$0xff]  }
 0x294   :  { %4761 = vmatprep.subr.bf16.mxu1 %v6443_v7  ;;  %v6513_v7 = vld [vmem:[%s8910_s5 + $0x90] ss:$8 sps:$4 sm:$0xff]  }
 0x297   :  { %4762 = vmatpush1.bf16.msra.mxu1 %v6441_v58  ;;  %v6516_v58 = vld [vmem:[%s8910_s5 + $0xa0] ss:$8 sps:$4 sm:$0xff]  }
 0x298   :  { %4763 = vmatprep.subr.bf16.mxu1 %v6449_v11  ;;  %v6519_v11 = vld [vmem:[%s8910_s5 + $0xb0] ss:$8 sps:$4 sm:$0xff]  }
 0x299   :  { %v2877_v21 = vpop.f32.mrb[8].mxu1 }
 0x29a   :  { %v6038_v17 = vadd.f32 %v2877_v21, %v459_v14  ;;  %v2879_v16 = vpop.f32.mrb[9].mxu1  ;;  %v6522_v14 = vld [vmem:[%s8910_s5 + $0xc0] ss:$8 sps:$4 sm:$0xff]  }
 0x29b   :  { %v6039_v19 = vadd.f32 %v2879_v16, %v463_v15  ;;  %v2881_v20 = vpop.f32.mrb[10].mxu1  ;;  %4764 = vmatpush1.bf16.msra.mxu1 %v6447_v18  ;;  %v6527_v15 = vld [vmem:[%s8910_s5 + $0xd4] ss:$8 sps:$4 sm:$0xff]   ;;  %v6525_v18 = vld [vmem:[%s8910_s5 + $0xd0] ss:$8 sps:$4 sm:$0xff]  }
 0x29c   :  { %v2890_v36 = vmul.f32 0.2, %v6038_v17  ;;  %v2882_v23 = vpop.f32.mrb[11].mxu1  ;;  %4765 = vmatprep.subr.bf16.mxu1 %v6455_v57  ;;  %v6530_v57 = vld [vmem:[%s8910_s5 + $0xe4] ss:$8 sps:$4 sm:$0xff]  }
 0x29d   :  { %v2891_v25 = vmul.f32 0.2, %v6039_v19  ;;  %v6528_v21 = vld [vmem:[%s8910_s5 + $0xe0] ss:$8 sps:$4 sm:$0xff]   ;;  %v6531_v16 = vld [vmem:[%s8910_s5 + $0xf0] ss:$8 sps:$4 sm:$0xff]  }
 0x29e   :  { %v2898_v61 = vmax.f32 %v6038_v17, %v2890_v36  ;;  %v6533_v17 = vld [vmem:[%s8910_s5 + $0xf4] ss:$8 sps:$4 sm:$0xff]   ;;  %v8785_v20 = vld [vmem:[%s8911_s4] sm:$0xf] }
 0x29f   :  { %v2899_v26 = vmax.f32 %v6039_v19, %v2891_v25  ;;  %4766 = vmatpush1.bf16.msra.mxu1 %v6453_v22  ;;  %v6536_v19 = vld [vmem:[%s8910_s5 + $0x104] ss:$8 sps:$4 sm:$0xff]   ;;  %v3169_v22 = vrot.slane %v8785_v20, %v7709_v31  ;;  %v3173_v36 = vrot.slane %v8785_v20, %v7726_v37 }
 0x2a0   :  { %4767 = vmatprep.subr.bf16.mxu1 %v6461_v27  ;;  %v8640_v34 = vpack.c.bf16 %v2898_v61, %v2898_v61 }
 0x2a1   :  { %v2907_v29 = vpack.c.bf16 %v2899_v26, %v2899_v26 }
 0x2a3   :  { %4621 = vmatprep.mubr.bf16.mxu0 %v2907_v29  ;;  %4768 = vmatpush1.bf16.msra.mxu1 %v6459_v28 }
 0x2a4   :  { %4785 = vmatprep.mubr.bf16.mxu1 %v2907_v29  ;;  %4622 = vmatmul.mubr.bf16.vlgmr.msra.gmra.mrb[8].mxu0 %v8640_v34 }
 0x2a5   :  { %4769 = vmatprep.subr.bf16.mxu1 %v6464_v30  ;;  %5203 = vmatpush1.bf16.msra.mxu0 %v6486_v32 }
 0x2a6   :  { %5204 = vmatprep.subr.bf16.mxu0 %v6491_v35 }
 0x2a7   :  { %4770 = vmatpush1.bf16.msra.mxu1 %v6462_v38  ;;  %v6534_v38 = vld [vmem:[%s8910_s5 + $0x100] ss:$8 sps:$4 sm:$0xff]  }
 0x2a8   :  { %4771 = vmatprep.subr.bf16.mxu1 %v6467_v39 }
 0x2a9   :  { %5205 = vmatpush1.bf16.msra.mxu0 %v6489_v40  ;;  %v6539_v40 = vld [vmem:[%s8910_s5 + $0x114] ss:$8 sps:$4 sm:$0xff]  }
 0x2aa   :  { %5206 = vmatprep.subr.bf16.mxu0 %v6494_v42  ;;  %v6537_v42 = vld [vmem:[%s8910_s5 + $0x110] ss:$8 sps:$4 sm:$0xff]  }
 0x2ab   :  { %4772 = vmatpush1.bf16.msra.mxu1 %v6465_v43  ;;  %v6542_v43 = vld [vmem:[%s8910_s5 + $0x124] ss:$8 sps:$4 sm:$0xff]  }
 0x2ac   :  { %4773 = vmatprep.subr.bf16.mxu1 %v6470_v44  ;;  %v6540_v44 = vld [vmem:[%s8910_s5 + $0x120] ss:$8 sps:$4 sm:$0xff]  }
 0x2ad   :  { %5207 = vmatpush1.bf16.msra.mxu0 %v6492_v45  ;;  %v6545_v45 = vld [vmem:[%s8910_s5 + $0x134] ss:$8 sps:$4 sm:$0xff]  }
 0x2ae   :  { %5208 = vmatprep.subr.bf16.mxu0 %v6497_v47  ;;  %v6543_v47 = vld [vmem:[%s8910_s5 + $0x130] ss:$8 sps:$4 sm:$0xff]  }
 0x2af   :  { %4774 = vmatpush1.bf16.msra.mxu1 %v6468_v49  ;;  %v6548_v49 = vld [vmem:[%s8910_s5 + $0x144] ss:$8 sps:$4 sm:$0xff]  }
 0x2b0   :  { %4775 = vmatprep.subr.bf16.mxu1 %v6473_v50  ;;  %v6546_v50 = vld [vmem:[%s8910_s5 + $0x140] ss:$8 sps:$4 sm:$0xff]  }
 0x2b1   :  { %5209 = vmatpush1.bf16.msra.mxu0 %v6495_v51  ;;  %v6551_v51 = vld [vmem:[%s8910_s5 + $0x154] ss:$8 sps:$4 sm:$0xff]  }
 0x2b2   :  { %5210 = vmatprep.subr.bf16.mxu0 %v6500_v52  ;;  %v6549_v52 = vld [vmem:[%s8910_s5 + $0x150] ss:$8 sps:$4 sm:$0xff]  }
 0x2b3   :  { %4776 = vmatpush1.bf16.msra.mxu1 %v6471_v33  ;;  %v6554_v33 = vld [vmem:[%s8910_s5 + $0x164] ss:$8 sps:$4 sm:$0xff]  }
 0x2b4   :  { %4777 = vmatprep.subr.bf16.mxu1 %v6476_v12  ;;  %v6552_v12 = vld [vmem:[%s8910_s5 + $0x160] ss:$8 sps:$4 sm:$0xff]  }
 0x2b5   :  { %5211 = vmatpush1.bf16.msra.mxu0 %v6498_v53  ;;  %v3181_v53 = vrot.slane %v8785_v20, %v446_v56  ;;  %v6560_v56 = vld [vmem:[%s8910_s5 + $0x184] ss:$8 sps:$4 sm:$0xff]  }
 0x2b6   :  { %5212 = vmatprep.subr.bf16.mxu0 %v6503_v55  ;;  %v6557_v55 = vld [vmem:[%s8910_s5 + $0x174] ss:$8 sps:$4 sm:$0xff]  }
 0x2b7   :  { %4778 = vmatpush1.bf16.msra.mxu1 %v6474_v59 }
 0x2b8   :  { %4779 = vmatprep.subr.bf16.mxu1 %v6479_v46 }
 0x2b9   :  { %5213 = vmatpush1.bf16.msra.mxu0 %v6501_v60 }
 0x2ba   :  { %5214 = vmatprep.subr.bf16.mxu0 %v6506_v62 }
 0x2bb   :  { %4780 = vmatpush1.bf16.msra.mxu1 %v6477_v9  ;;  %v6555_v9 = vld [vmem:[%s8910_s5 + $0x170] ss:$8 sps:$4 sm:$0xff]  }
 0x2bc   :  { %4781 = vmatprep.subr.bf16.mxu1 %v6482_v63 }
 0x2bd   :  { %5215 = vmatpush1.bf16.msra.mxu0 %v6504_v0 }
 0x2be   :  { %5216 = vmatprep.subr.bf16.mxu0 %v6509_v1 }
 0x2bf   :  { %4782 = vmatpush1.bf16.msra.mxu1 %v6480_v48  ;;  %v6558_v48 = vld [vmem:[%s8910_s5 + $0x180] ss:$8 sps:$4 sm:$0xff]  }
 0x2c0   :  { %4783 = vmatprep.subr.bf16.mxu1 %v6485_v2  ;;  %v6563_v2 = vld [vmem:[%s8910_s5 + $0x194] ss:$8 sps:$4 sm:$0xff]  }
 0x2c1   :  { %5217 = vmatpush1.bf16.msra.mxu0 %v6507_v3 }
 0x2c2   :  { %5218 = vmatprep.subr.bf16.mxu0 %v6512_v4  ;;  %v6561_v4 = vld [vmem:[%s8910_s5 + $0x190] ss:$8 sps:$4 sm:$0xff]  }
 0x2c3   :  { %4784 = vmatpush1.bf16.msra.mxu1 %v6483_v5  ;;  %v6566_v5 = vld [vmem:[%s8910_s5 + $0x1a4] ss:$8 sps:$4 sm:$0xff]  }
 0x2c5   :  { %5219 = vmatpush1.bf16.msra.mxu0 %v6510_v41  ;;  %v6564_v41 = vld [vmem:[%s8910_s5 + $0x1a0] ss:$8 sps:$4 sm:$0xff]  }
 0x2c6   :  { %4786 = vmatmul.mubr.bf16.vlgmr.msra.gmra.mrb[12].mxu1 %v8640_v34  ;;  %5220 = vmatprep.subr.bf16.mxu0 %v6515_v6  ;;  %v6569_v6 = vld [vmem:[%s8910_s5 + $0x1b4] ss:$8 sps:$4 sm:$0xff]  }
 0x2c9   :  { %5221 = vmatpush1.bf16.msra.mxu0 %v6513_v7  ;;  %v6567_v7 = vld [vmem:[%s8910_s5 + $0x1b0] ss:$8 sps:$4 sm:$0xff]  }
 0x2ca   :  { %5222 = vmatprep.subr.bf16.mxu0 %v6518_v8  ;;  %v6572_v8 = vld [vmem:[%s8910_s5 + $0x1c4] ss:$8 sps:$4 sm:$0xff]  }
 0x2cd   :  { %5223 = vmatpush1.bf16.msra.mxu0 %v6516_v58  ;;  %v6570_v58 = vld [vmem:[%s8910_s5 + $0x1c0] ss:$8 sps:$4 sm:$0xff]  }
 0x2ce   :  { %5224 = vmatprep.subr.bf16.mxu0 %v6521_v10  ;;  %v3177_v10 = vrot.slane %v8785_v20, %v442_v54 }
 0x2d1   :  { %5225 = vmatpush1.bf16.msra.mxu0 %v6519_v11  ;;  %v6575_v11 = vld [vmem:[%s8910_s5 + $0x1d4] ss:$8 sps:$4 sm:$0xff]  }
 0x2d2   :  { %5226 = vmatprep.subr.bf16.mxu0 %v6524_v13  ;;  %v6573_v13 = vld [vmem:[%s8910_s5 + $0x1d0] ss:$8 sps:$4 sm:$0xff]  }
 0x2d5   :  { %5227 = vmatpush1.bf16.msra.mxu0 %v6522_v14 }
 0x2d6   :  { %5228 = vmatprep.subr.bf16.mxu0 %v6527_v15  ;;  %v6578_v15 = vld [vmem:[%s8910_s5 + $0x1e4] ss:$8 sps:$4 sm:$0xff]  }
 0x2d9   :  { %5229 = vmatpush1.bf16.msra.mxu0 %v6525_v18  ;;  %v6581_v18 = vld [vmem:[%s8910_s5 + $0x1f4] ss:$8 sps:$4 sm:$0xff]  }
 0x2da   :  { %5230 = vmatprep.subr.bf16.mxu0 %v6530_v57  ;;  %v6579_v57 = vld [vmem:[%s8910_s5 + $0x1f0] ss:$8 sps:$4 sm:$0xff]  }
 0x2dd   :  { %5231 = vmatpush1.bf16.msra.mxu0 %v6528_v21 }
 0x2de   :  { %5232 = vmatprep.subr.bf16.mxu0 %v6533_v17 }
 0x2e1   :  { %5233 = vmatpush1.bf16.msra.mxu0 %v6531_v16  ;;  %v14_v16 = vstv %s8912_s8 }
 0x2e2   :  { %5243 = vmatprep.subr.bf16.mxu0 %v6536_v19  ;;  %15 = vst [vmem:[#allocation2] sm:$0x1] %v14_v16  ;;  %v4870_v19 = vld [vmem:[%s8913_s6] sm:$0x3] }
 0x2e3   :  { %v4875_v20 = vrot.slane %v4870_v19, %v7709_v31 }
 0x377   :  { %v4623_v23 = vpop.f32.mrb[8].mxu0 }
 0x378   :  { %v6040_v27 = vadd.f32 %v4623_v23, %v3169_v22  ;;  %v4625_v25 = vpop.f32.mrb[9].mxu0  ;;  %v4879_v22 = vrot.slane %v4870_v19, %v7726_v37  ;;  %v5288_v23 = vld [vmem:[%s8914_s7] sm:$0x3] }
 0x379   :  { %v6041_v61 = vadd.f32 %v4625_v25, %v3173_v36  ;;  %v4627_v26 = vpop.f32.mrb[10].mxu0 }
 0x37a   :  { %v4794_v28 = vmul.f32 0.2, %v6040_v27  ;;  %v4628_v29 = vpop.f32.mrb[11].mxu0 }
 0x37b   :  { %v4795_v30 = vmul.f32 0.2, %v6041_v61 }
 0x37c   :  { %v4798_v32 = vmax.f32 %v6040_v27, %v4794_v28 }
 0x37d   :  { %v4799_v34 = vmax.f32 %v6041_v61, %v4795_v30  ;;  %v5293_v30 = vrot.slane %v5288_v23, %v7709_v31 }
 0x37e   :  { %v4802_v39 = vpack.c.bf16 %v4798_v32, %v4798_v32 }
 0x37f   :  { %v4803_v35 = vpack.c.bf16 %v4799_v34, %v4799_v34  ;;  %v5297_v34 = vrot.slane %v5288_v23, %v7726_v37 }
 0x381   :  { %5234 = vmatprep.mubr.bf16.mxu0 %v4803_v35 }
 0x382   :  { %5235 = vmatmul.mubr.bf16.vlgmr.msra.gmra.mrb[12].mxu0 %v4802_v39 }
 0x383   :  { %5244 = vmatpush1.bf16.msra.mxu0 %v6534_v38 }
 0x384   :  { %5245 = vmatprep.subr.bf16.mxu0 %v6539_v40 }
 0x387   :  { %5246 = vmatpush1.bf16.msra.mxu0 %v6537_v42 }
 0x388   :  { %5247 = vmatprep.subr.bf16.mxu0 %v6542_v43  ;;  %v6029_v43 = vld [vmem:[#allocation2] ss:$0 sm:$0xff] }
 0x38b   :  { %5248 = vmatpush1.bf16.msra.mxu0 %v6540_v44 }
 0x38c   :  { %5249 = vmatprep.subr.bf16.mxu0 %v6545_v45 }
 0x38f   :  { %5250 = vmatpush1.bf16.msra.mxu0 %v6543_v47 }
 0x390   :  { %5251 = vmatprep.subr.bf16.mxu0 %v6548_v49 }
 0x393   :  { %5252 = vmatpush1.bf16.msra.mxu0 %v6546_v50 }
 0x394   :  { %5253 = vmatprep.subr.bf16.mxu0 %v6551_v51 }
 0x397   :  { %5254 = vmatpush1.bf16.msra.mxu0 %v6549_v52 }
 0x398   :  { %5255 = vmatprep.subr.bf16.mxu0 %v6554_v33 }
 0x399   :  { %v4787_v59 = vpop.f32.mrb[12].mxu1 }
 0x39a   :  { %v4789_v46 = vpop.f32.mrb[13].mxu1  ;;  %v6042_v14 = vadd.f32 %v4787_v59, %v3177_v10 }
 0x39b   :  { %v6043_v60 = vadd.f32 %v4789_v46, %v3181_v53  ;;  %5256 = vmatpush1.bf16.msra.mxu0 %v6552_v12  ;;  %v4791_v62 = vpop.f32.mrb[14].mxu1 }
 0x39c   :  { %v4792_v63 = vpop.f32.mrb[15].mxu1  ;;  %5257 = vmatprep.subr.bf16.mxu0 %v6557_v55  ;;  %v4796_v54 = vmul.f32 0.2, %v6042_v14 }
 0x39d   :  { %v4797_v0 = vmul.f32 0.2, %v6043_v60 }
 0x39e   :  { %v4800_v21 = vmax.f32 %v6042_v14, %v4796_v54 }
 0x39f   :  { %v4801_v1 = vmax.f32 %v6043_v60, %v4797_v0  ;;  %5258 = vmatpush1.bf16.msra.mxu0 %v6555_v9 }
 0x3a0   :  { %5259 = vmatprep.subr.bf16.mxu0 %v6560_v56  ;;  %v4804_v17 = vpack.c.bf16 %v4800_v21, %v4800_v21 }
 0x3a1   :  { %v4805_v3 = vpack.c.bf16 %v4801_v1, %v4801_v1 }
 0x3a3   :  { %5260 = vmatpush1.bf16.msra.mxu0 %v6558_v48  ;;  %5275 = vmatprep.mubr.bf16.mxu0 %v4805_v3 }
 0x3a4   :  { %5261 = vmatprep.subr.bf16.mxu0 %v6563_v2 }
 0x3a7   :  { %5262 = vmatpush1.bf16.msra.mxu0 %v6561_v4 }
 0x3a8   :  { %5263 = vmatprep.subr.bf16.mxu0 %v6566_v5 }
 0x3ab   :  { %5264 = vmatpush1.bf16.msra.mxu0 %v6564_v41 }
 0x3ac   :  { %5265 = vmatprep.subr.bf16.mxu0 %v6569_v6 }
 0x3af   :  { %5266 = vmatpush1.bf16.msra.mxu0 %v6567_v7 }
 0x3b0   :  { %5267 = vmatprep.subr.bf16.mxu0 %v6572_v8 }
 0x3b3   :  { %5268 = vmatpush1.bf16.msra.mxu0 %v6570_v58 }
 0x3b4   :  { %5269 = vmatprep.subr.bf16.mxu0 %v6575_v11 }
 0x3b7   :  { %5270 = vmatpush1.bf16.msra.mxu0 %v6573_v13 }
 0x3b8   :  { %5271 = vmatprep.subr.bf16.mxu0 %v6578_v15 }
 0x3bb   :  { %5272 = vmatpush1.bf16.msra.mxu0 %v6576_v24 }
 0x3bc   :  { %5273 = vmatprep.subr.bf16.mxu0 %v6581_v18 }
 0x3bf   :  { %5274 = vmatpush1.bf16.msra.mxu0 %v6579_v57 }
 0x3c2   :  { %5276 = vmatmul.mubr.bf16.vlgmr.msra.gmra.mrb[12].mxu0 %v4804_v17 }
 0x495   :  { %v5277_v36 = vpop.f32.mrb[12].mxu0 }
 0x496   :  { %v6044_v27 = vadd.f32 %v5277_v36, %v4875_v20  ;;  %v5279_v25 = vpop.f32.mrb[13].mxu0 }
 0x497   :  { %v6045_v61 = vadd.f32 %v5279_v25, %v4879_v22  ;;  %v5281_v26 = vpop.f32.mrb[14].mxu0 }
 0x498   :  { %v5284_v28 = vmul.f32 0.2, %v6044_v27  ;;  %v5282_v29 = vpop.f32.mrb[15].mxu0 }
 0x499   :  { %v5285_v32 = vmul.f32 0.2, %v6045_v61 }
 0x49a   :  { %v5286_v35 = vmax.f32 %v6044_v27, %v5284_v28 }
 0x49b   :  { %v5287_v38 = vmax.f32 %v6045_v61, %v5285_v32 }
 0x49c   :  { %v5300_v39 = vmul.f32 %v5293_v30, %v5286_v35 }
 0x49d   :  { %v5301_v40 = vmul.f32 %v5297_v34, %v5287_v38 }
 0x49f   :  { %v5302_v42 = vadd.f32 %v5301_v40, %v5300_v39 }
 0x4a1   :  { %5303 = vadd.xlane.f32.xlu0 %v5302_v42 }
 0x52e   :  { %v5304_v44 = vpop.xlane.xlu0 %5303 }
 0x52f   :  { %v5312_v45 = vadd.f32 %v6029_v43, %v5304_v44 }
 0x531   :  { %v5313_v47 = vsub.f32 0.0, %v5312_v45 }
 0x533   :  { %v5314_v49 = vmul.f32 1.442695, %v5313_v47 }
 0x535   :  { %6582 = vpow2.f32 %v5314_v49 }
 0x53f   :  { %v6583_v50 = vpop.eup %6582 }
 0x540   :  { %v5316_v51 = vadd.f32 1.0, %v6583_v50 }
 0x542   :  { %6584 = vrcp.f32 %v5316_v51 }
 0x54c   :  { %v6585_v31 = vpop.eup %6584 }
 0x54d   :  { %5320 = vst.msk [vmem:[%s8915_s9] sm:$0xff] %vm5319_vm0, %v6585_v31 }

</bundles_post_ra>
